<compile_context>
chip_gen: v7x
topology: tpu7x:2x2x1
jax: 0.10.0
libtpu: 0.0.40
codegen_flags: <defaults>
</compile_context>

<pallas_src>
import jax
import jax.numpy as jnp
import numpy as np
from jax import lax
from jax.experimental import pallas as pl
from jax.experimental.pallas import tpu as pltpu

# MXU input dtype.  bf16 is native on v5e/v6e/v7x and halves DMA/VMEM bytes;
# accumulation stays f32.  Set to jnp.float32 to match PyTorch bit-for-bit.
COMPUTE_DTYPE = jnp.bfloat16


def _round_up(x, m):
    return ((x + m - 1) // m) * m


def _row_tiling(m, max_tile):
    """Pick (tile, grid, m_pad) for tiling `m` independent rows.

    tile is a multiple of 8, tiles are balanced (no big round-up waste), and
    the grid gets >=2 steps when there is enough work so both of v7x's two
    TensorCores are used (harmless on single-core v5e/v6e)."""
    m8 = _round_up(max(m, 8), 8)
    grid = -(-m8 // max_tile)
    if grid == 1 and m8 >= 1024:
        grid = 2
    tile = _round_up(-(-m8 // grid), 8)
    return tile, grid, tile * grid


# ---------------------------------------------------------------------------
# Pallas kernels
# ---------------------------------------------------------------------------

def _conv_pool_kernel(p_ref, w_ref, o_ref):
    """Fused conv-as-matmul + 2x2 max-pool for one tile of pooled pixels.

    p_ref: [4, tile, K] bf16 -- im2col patches, one slab per pool-window
           position (dy, dx); row r of every slab maps to the same pooled
           output pixel.  Last column is 1.0 (hits the folded bias row).
    w_ref: [K, Cout] bf16    -- (kh, kw, cin)-ordered weight, bias in last row.
    o_ref: [tile, Cout] bf16 -- pooled conv output (no nonlinearity — matches
           the PyTorch module, which has no ReLU after the convs).
    """
    w = w_ref[...]
    acc = jnp.dot(p_ref[0], w, preferred_element_type=jnp.float32)
    for g in range(1, 4):
        acc = jnp.maximum(
            acc, jnp.dot(p_ref[g], w, preferred_element_type=jnp.float32))
    o_ref[...] = acc.astype(o_ref.dtype)


def _mlp_kernel(x_ref, w1_ref, w2_ref, w3_ref, o_ref):
    """Fused fc1+ReLU -> fc2+ReLU -> fc3.  Biases live in the packed weights:
    x[:, 576] == 1 -> h1[:, 120] == 1 -> h2[:, 84] == 1 feed the bias rows."""
    dt = w1_ref.dtype
    h1 = jnp.dot(x_ref[...], w1_ref[...], preferred_element_type=jnp.float32)
    h1 = jnp.maximum(h1, 0.0).astype(dt)
    h2 = jnp.dot(h1, w2_ref[...], preferred_element_type=jnp.float32)
    h2 = jnp.maximum(h2, 0.0).astype(dt)
    o_ref[...] = jnp.dot(h2, w3_ref[...], preferred_element_type=jnp.float32)


# ---------------------------------------------------------------------------
# Pallas wrappers
# ---------------------------------------------------------------------------

def conv_pool_pallas(patches, w_packed, *, max_tile=4096):
    """patches: [4, M, K], w_packed: [K, Cout]  ->  pooled conv out [M, Cout].

    M = batch * pooled_h * pooled_w.  Rows are independent, so M is tiled in
    chunks of `tile` pooled pixels regardless of image boundaries.
    """
    g4, m, k = patches.shape
    kk, cout = w_packed.shape
    assert g4 == 4 and kk == k
    tile, grid, m_pad = _row_tiling(m, max_tile)
    if m_pad != m:
        patches = jnp.pad(patches, ((0, 0), (0, m_pad - m), (0, 0)))

    isz = patches.dtype.itemsize
    cost = pl.CostEstimate(
        flops=2 * 4 * m_pad * k * cout,
        transcendentals=0,
        bytes_accessed=(4 * m_pad * k + k * cout + m_pad * cout) * isz)
    out = pl.pallas_call(
        _conv_pool_kernel,
        out_shape=jax.ShapeDtypeStruct((m_pad, cout), patches.dtype),
        grid=(grid,),
        in_specs=[
            pl.BlockSpec((4, tile, k), lambda i: (0, i, 0)),
            pl.BlockSpec((k, cout), lambda i: (0, 0)),
        ],
        out_specs=pl.BlockSpec((tile, cout), lambda i: (i, 0)),
        compiler_params=pltpu.CompilerParams(
            dimension_semantics=("parallel",)),
        cost_estimate=cost,
    )(patches, w_packed)
    return out[:m]


def mlp_pallas(x_flat, w1p, w2p, w3p, *, max_tile=1024):
    """x_flat: [B, 577] bf16 (576 features + ones column) -> logits [B, 10] f32."""
    b, k1 = x_flat.shape
    n1, n2, n_out = w1p.shape[1], w2p.shape[1], w3p.shape[1]
    tile, grid, b_pad = _row_tiling(b, max_tile)
    if b_pad != b:
        x_flat = jnp.pad(x_flat, ((0, b_pad - b), (0, 0)))

    isz = x_flat.dtype.itemsize
    cost = pl.CostEstimate(
        flops=2 * b_pad * (k1 * n1 + n1 * n2 + n2 * n_out),
        transcendentals=0,
        bytes_accessed=(b_pad * k1 + w1p.size + w2p.size + w3p.size) * isz
        + b_pad * n_out * 4)
    out = pl.pallas_call(
        _mlp_kernel,
        out_shape=jax.ShapeDtypeStruct((b_pad, n_out), jnp.float32),
        grid=(grid,),
        in_specs=[
            pl.BlockSpec((tile, k1), lambda i: (i, 0)),
            pl.BlockSpec(w1p.shape, lambda i: (0, 0)),
            pl.BlockSpec(w2p.shape, lambda i: (0, 0)),
            pl.BlockSpec(w3p.shape, lambda i: (0, 0)),
        ],
        out_specs=pl.BlockSpec((tile, n_out), lambda i: (i, 0)),
        compiler_params=pltpu.CompilerParams(
            dimension_semantics=("parallel",)),
        cost_estimate=cost,
    )(x_flat, w1p, w2p, w3p)
    return out[:b]


# ---------------------------------------------------------------------------
# XLA-side im2col, grouped by 2x2 pool-window position
# ---------------------------------------------------------------------------

def pool_grouped_patches(x_nhwc, kh, kw, pad, pooled_h, pooled_w):
    """Build im2col patches grouped by 2x2 pool-window position.

    Returns [4, B*pooled_h*pooled_w, kh*kw*C + 1]; column (i, j, c) of group
    (dy, dx) at pooled pixel (b, y', x') holds x_pad[b, 2y'+dy+i, 2x'+dx+j, c];
    the last column is 1.0 (hits the folded bias row of the packed weight).
    # TODO(synk): fuse this gather into the conv kernel (manual DMA of
    # overlapping input rows) to drop the remaining HBM patch round-trip.
    """
    b, _, _, c = x_nhwc.shape
    xp = jnp.pad(x_nhwc, ((0, 0), (pad, pad), (pad, pad), (0, 0)))
    groups = []
    for dy in range(2):
        for dx in range(2):
            cols = [
                xp[:, dy + i: dy + i + 2 * (pooled_h - 1) + 1: 2,
                      dx + j: dx + j + 2 * (pooled_w - 1) + 1: 2, :]
                for i in range(kh) for j in range(kw)
            ]
            g = jnp.concatenate(cols, axis=-1)
            groups.append(g.reshape(b * pooled_h * pooled_w, kh * kw * c))
    p = jnp.stack(groups, axis=0)
    ones = jnp.ones((4, p.shape[1], 1), p.dtype)
    return jnp.concatenate([p, ones], axis=-1)


# ---------------------------------------------------------------------------
# Parameters (torch layout) + packing into bias-folded bf16 weights
# ---------------------------------------------------------------------------

def init_params(key):
    ks = jax.random.split(key, 10)

    def uniform(k, shape, fan_in):
        bound = 1.0 / jnp.sqrt(fan_in)
        return jax.random.uniform(k, shape, jnp.float32, -bound, bound)

    return {
        # Conv2d(3, 6, kernel_size=5, padding=1)
        "conv1_w": uniform(ks[0], (6, 3, 5, 5), 3 * 5 * 5),
        "conv1_b": uniform(ks[1], (6,), 3 * 5 * 5),
        # Conv2d(6, 16, kernel_size=5, padding=1)
        "conv2_w": uniform(ks[2], (16, 6, 5, 5), 6 * 5 * 5),
        "conv2_b": uniform(ks[3], (16,), 6 * 5 * 5),
        # Linear(576, 120) stored [in (C,H,W order), out]
        "fc1_w": uniform(ks[4], (576, 120), 576),
        "fc1_b": uniform(ks[5], (120,), 576),
        "fc2_w": uniform(ks[6], (120, 84), 120),
        "fc2_b": uniform(ks[7], (84,), 120),
        "fc3_w": uniform(ks[8], (84, 10), 84),
        "fc3_b": uniform(ks[9], (10,), 84),
    }


def _fold_bias(w_mat, b, ones_col=False):
    """[K, N] weight + [N] bias -> [K+1, N(+1)] with the bias as the last row.
    If ones_col, append a column that is 0 except 1.0 in the bias row so the
    NEXT fused layer's bias row also sees a ones column in its input."""
    w = jnp.concatenate([w_mat, b[None, :]], axis=0)
    if ones_col:
        col = jnp.zeros((w.shape[0], 1), w.dtype).at[-1, 0].set(1.0)
        w = jnp.concatenate([w, col], axis=-1)
    return w.astype(COMPUTE_DTYPE)


def pack_params(p):
    """Torch-layout params -> bias-folded bf16 Pallas weights.

    Conv weight rows are ordered (kh, kw, cin) to match the im2col columns.
    fc1 rows are permuted from torch's Flatten order (c, y, x) to the kernel's
    natural (y, x, c) order so no activation transpose/relayout is needed."""
    c1 = p["conv1_w"].transpose(2, 3, 1, 0).reshape(75, 6)
    c2 = p["conv2_w"].transpose(2, 3, 1, 0).reshape(150, 16)
    fc1 = (p["fc1_w"].reshape(16, 6, 6, 120)
           .transpose(1, 2, 0, 3).reshape(576, 120))
    return {
        "conv1_w": _fold_bias(c1, p["conv1_b"]),                    # [76, 6]
        "conv2_w": _fold_bias(c2, p["conv2_b"]),                    # [151, 16]
        "fc1_w": _fold_bias(fc1, p["fc1_b"], ones_col=True),        # [577, 121]
        "fc2_w": _fold_bias(p["fc2_w"], p["fc2_b"], ones_col=True),  # [121, 85]
        "fc3_w": _fold_bias(p["fc3_w"], p["fc3_b"]),                # [85, 10]
    }


# ---------------------------------------------------------------------------
# Forward
# ---------------------------------------------------------------------------

@jax.jit
def lenet5_forward(packed, x):
    """x: [B, 3, 32, 32] float32 NCHW (same as the PyTorch module)."""
    b = x.shape[0]
    h = x.astype(COMPUTE_DTYPE).transpose(0, 2, 3, 1)      # NHWC bf16, once
    # conv1(3->6, k5, p1) fused with maxpool2 : [B,32,32,3] -> [B,15,15,6]
    p1 = pool_grouped_patches(h, 5, 5, 1, 15, 15)          # [4, B*225, 76]
    h = conv_pool_pallas(p1, packed["conv1_w"]).reshape(b, 15, 15, 6)
    # conv2(6->16, k5, p1) fused with maxpool2 : [B,15,15,6] -> [B*36, 16]
    p2 = pool_grouped_patches(h, 5, 5, 1, 6, 6)            # [4, B*36, 151]
    h = conv_pool_pallas(p2, packed["conv2_w"])            # rows=(b,y,x), lanes=c
    # Flatten (order folded into fc1 weights) + fused MLP with folded biases.
    h = h.reshape(b, 576)
    h = jnp.concatenate([h, jnp.ones((b, 1), h.dtype)], axis=-1)   # ones column
    return mlp_pallas(h, packed["fc1_w"], packed["fc2_w"], packed["fc3_w"])


# ---------------------------------------------------------------------------
# Pure-JAX f32 reference (mirrors the PyTorch module) for validation
# ---------------------------------------------------------------------------

def lenet5_reference(p, x):
    def conv(h, w, bias):
        out = lax.conv_general_dilated(
            h, w, (1, 1), [(1, 1), (1, 1)],
            dimension_numbers=("NCHW", "OIHW", "NCHW"))
        return out + bias[None, :, None, None]

    def pool(h):
        return lax.reduce_window(h, -jnp.inf, lax.max,
                                 (1, 1, 2, 2), (1, 1, 2, 2), "VALID")

    h = pool(conv(x, p["conv1_w"], p["conv1_b"]))
    h = pool(conv(h, p["conv2_w"], p["conv2_b"]))
    h = h.reshape(h.shape[0], -1)                          # (C, H, W) flatten
    h = jnp.maximum(h @ p["fc1_w"] + p["fc1_b"], 0.0)
    h = jnp.maximum(h @ p["fc2_w"] + p["fc2_b"], 0.0)
    return h @ p["fc3_w"] + p["fc3_b"]


if __name__ == "__main__":
    key = jax.random.PRNGKey(0)
    pkey, xkey = jax.random.split(key)
    params = init_params(pkey)
    packed = pack_params(params)
    # Spatial size must be 32x32 so the 16*6*6 flatten matches the module.
    x = jax.random.normal(xkey, (2, 3, 32, 32), dtype=jnp.float32)

    logits = lenet5_forward(packed, x)
    jax.block_until_ready(logits)
    assert logits.shape == (2, 10) and logits.dtype == jnp.float32

    ref = lenet5_reference(params, x)
    np.testing.assert_allclose(np.asarray(logits), np.asarray(ref),
                               rtol=0.1, atol=0.05)   # bf16 MXU vs f32 ref
    print("KERNEL_OK")
</pallas_src>

<mosaic_0001>
module attributes {stable_mosaic.version = 11 : i64} {
  func.func @_conv_pool_kernel(%arg0: i32, %arg1: memref<4x456x76xbf16, #tpu.memory_space<vmem>>, %arg2: memref<76x6xbf16, #tpu.memory_space<vmem>>, %arg3: memref<456x6xbf16, #tpu.memory_space<vmem>>) attributes {dimension_semantics = [#tpu.dimension_semantics<parallel>], iteration_bounds = array<i64: 1>, scalar_prefetch = 0 : i64, scratch_operands = 0 : i64, tpu.core_type = #tpu.core_type<tc>, window_params = [{transform_indices = @transform_0, window_bounds = array<i64: 4, 456, 76>}, {pipeline_mode = #tpu.pipeline_mode<synchronous>, transform_indices = @transform_1, window_bounds = array<i64: 76, 6>}, {transform_indices = @transform_2, window_bounds = array<i64: 456, 6>}]} {
    %c0 = arith.constant 0 : index
    %c0_0 = arith.constant 0 : index
    %0 = vector.load %arg2[%c0, %c0_0] : memref<76x6xbf16, #tpu.memory_space<vmem>>, vector<76x6xbf16>
    %c0_1 = arith.constant 0 : index
    %c0_2 = arith.constant 0 : index
    %c0_3 = arith.constant 0 : index
    %1 = vector.load %arg1[%c0_1, %c0_2, %c0_3] : memref<4x456x76xbf16, #tpu.memory_space<vmem>>, vector<1x456x76xbf16>
    %2 = vector.shape_cast %1 : vector<1x456x76xbf16> to vector<456x76xbf16>
    %cst = arith.constant dense<0.000000e+00> : vector<456x6xf32>
    %3 = tpu.matmul %2, %0, %cst {dimension_numbers = #tpu.dot_dimension_numbers<[1], [0], [0], [1], [0, 0, 1, 1], [], []>} : vector<456x76xbf16>, vector<76x6xbf16>, vector<456x6xf32> -> vector<456x6xf32>
    %c1 = arith.constant 1 : index
    %c0_4 = arith.constant 0 : index
    %c0_5 = arith.constant 0 : index
    %4 = vector.load %arg1[%c1, %c0_4, %c0_5] : memref<4x456x76xbf16, #tpu.memory_space<vmem>>, vector<1x456x76xbf16>
    %5 = vector.shape_cast %4 : vector<1x456x76xbf16> to vector<456x76xbf16>
    %cst_6 = arith.constant dense<0.000000e+00> : vector<456x6xf32>
    %6 = tpu.matmul %5, %0, %cst_6 {dimension_numbers = #tpu.dot_dimension_numbers<[1], [0], [0], [1], [0, 0, 1, 1], [], []>} : vector<456x76xbf16>, vector<76x6xbf16>, vector<456x6xf32> -> vector<456x6xf32>
    %7 = arith.maximumf %3, %6 : vector<456x6xf32>
    %c2 = arith.constant 2 : index
    %c0_7 = arith.constant 0 : index
    %c0_8 = arith.constant 0 : index
    %8 = vector.load %arg1[%c2, %c0_7, %c0_8] : memref<4x456x76xbf16, #tpu.memory_space<vmem>>, vector<1x456x76xbf16>
    %9 = vector.shape_cast %8 : vector<1x456x76xbf16> to vector<456x76xbf16>
    %cst_9 = arith.constant dense<0.000000e+00> : vector<456x6xf32>
    %10 = tpu.matmul %9, %0, %cst_9 {dimension_numbers = #tpu.dot_dimension_numbers<[1], [0], [0], [1], [0, 0, 1, 1], [], []>} : vector<456x76xbf16>, vector<76x6xbf16>, vector<456x6xf32> -> vector<456x6xf32>
    %11 = arith.maximumf %7, %10 : vector<456x6xf32>
    %c3 = arith.constant 3 : index
    %c0_10 = arith.constant 0 : index
    %c0_11 = arith.constant 0 : index
    %12 = vector.load %arg1[%c3, %c0_10, %c0_11] : memref<4x456x76xbf16, #tpu.memory_space<vmem>>, vector<1x456x76xbf16>
    %13 = vector.shape_cast %12 : vector<1x456x76xbf16> to vector<456x76xbf16>
    %cst_12 = arith.constant dense<0.000000e+00> : vector<456x6xf32>
    %14 = tpu.matmul %13, %0, %cst_12 {dimension_numbers = #tpu.dot_dimension_numbers<[1], [0], [0], [1], [0, 0, 1, 1], [], []>} : vector<456x76xbf16>, vector<76x6xbf16>, vector<456x6xf32> -> vector<456x6xf32>
    %15 = arith.maximumf %11, %14 : vector<456x6xf32>
    %16 = arith.truncf %15 : vector<456x6xf32> to vector<456x6xbf16>
    %c0_13 = arith.constant 0 : index
    %c0_14 = arith.constant 0 : index
    %17 = vector.load %arg3[%c0_13, %c0_14] : memref<456x6xbf16, #tpu.memory_space<vmem>>, vector<456x6xbf16>
    tpu.vector_store %arg3[%c0_13, %c0_14], %16 {strides = array<i32>} : memref<456x6xbf16, #tpu.memory_space<vmem>>, vector<456x6xbf16>,
    return
  }
  func.func @transform_0(%arg0: i32) -> (i32, i32, i32) {
    %c0_i32 = arith.constant 0 : i32
    %c0_i32_0 = arith.constant 0 : i32
    %c0_i32_1 = arith.constant 0 : i32
    return %c0_i32, %arg0, %c0_i32_0 : i32, i32, i32
  }
  func.func @transform_1(%arg0: i32) -> (i32, i32) {
    %c0_i32 = arith.constant 0 : i32
    %c0_i32_0 = arith.constant 0 : i32
    %c0_i32_1 = arith.constant 0 : i32
    return %c0_i32, %c0_i32_0 : i32, i32
  }
  func.func @transform_2(%arg0: i32) -> (i32, i32) {
    %c0_i32 = arith.constant 0 : i32
    %c0_i32_0 = arith.constant 0 : i32
    return %arg0, %c0_i32 : i32, i32
  }
}

module attributes {stable_mosaic.version = 11 : i64} {
  func.func @_conv_pool_kernel(%arg0: i32, %arg1: memref<4x72x151xbf16, #tpu.memory_space<vmem>>, %arg2: memref<151x16xbf16, #tpu.memory_space<vmem>>, %arg3: memref<72x16xbf16, #tpu.memory_space<vmem>>) attributes {dimension_semantics = [#tpu.dimension_semantics<parallel>], iteration_bounds = array<i64: 1>, scalar_prefetch = 0 : i64, scratch_operands = 0 : i64, tpu.core_type = #tpu.core_type<tc>, window_params = [{transform_indices = @transform_0, window_bounds = array<i64: 4, 72, 151>}, {pipeline_mode = #tpu.pipeline_mode<synchronous>, transform_indices = @transform_1, window_bounds = array<i64: 151, 16>}, {transform_indices = @transform_2, window_bounds = array<i64: 72, 16>}]} {
    %c0 = arith.constant 0 : index
    %c0_0 = arith.constant 0 : index
    %0 = vector.load %arg2[%c0, %c0_0] : memref<151x16xbf16, #tpu.memory_space<vmem>>, vector<151x16xbf16>
    %c0_1 = arith.constant 0 : index
    %c0_2 = arith.constant 0 : index
    %c0_3 = arith.constant 0 : index
    %1 = vector.load %arg1[%c0_1, %c0_2, %c0_3] : memref<4x72x151xbf16, #tpu.memory_space<vmem>>, vector<1x72x151xbf16>
    %2 = vector.shape_cast %1 : vector<1x72x151xbf16> to vector<72x151xbf16>
    %cst = arith.constant dense<0.000000e+00> : vector<72x16xf32>
    %3 = tpu.matmul %2, %0, %cst {dimension_numbers = #tpu.dot_dimension_numbers<[1], [0], [0], [1], [0, 0, 1, 1], [], []>} : vector<72x151xbf16>, vector<151x16xbf16>, vector<72x16xf32> -> vector<72x16xf32>
    %c1 = arith.constant 1 : index
    %c0_4 = arith.constant 0 : index
    %c0_5 = arith.constant 0 : index
    %4 = vector.load %arg1[%c1, %c0_4, %c0_5] : memref<4x72x151xbf16, #tpu.memory_space<vmem>>, vector<1x72x151xbf16>
    %5 = vector.shape_cast %4 : vector<1x72x151xbf16> to vector<72x151xbf16>
    %cst_6 = arith.constant dense<0.000000e+00> : vector<72x16xf32>
    %6 = tpu.matmul %5, %0, %cst_6 {dimension_numbers = #tpu.dot_dimension_numbers<[1], [0], [0], [1], [0, 0, 1, 1], [], []>} : vector<72x151xbf16>, vector<151x16xbf16>, vector<72x16xf32> -> vector<72x16xf32>
    %7 = arith.maximumf %3, %6 : vector<72x16xf32>
    %c2 = arith.constant 2 : index
    %c0_7 = arith.constant 0 : index
    %c0_8 = arith.constant 0 : index
    %8 = vector.load %arg1[%c2, %c0_7, %c0_8] : memref<4x72x151xbf16, #tpu.memory_space<vmem>>, vector<1x72x151xbf16>
    %9 = vector.shape_cast %8 : vector<1x72x151xbf16> to vector<72x151xbf16>
    %cst_9 = arith.constant dense<0.000000e+00> : vector<72x16xf32>
    %10 = tpu.matmul %9, %0, %cst_9 {dimension_numbers = #tpu.dot_dimension_numbers<[1], [0], [0], [1], [0, 0, 1, 1], [], []>} : vector<72x151xbf16>, vector<151x16xbf16>, vector<72x16xf32> -> vector<72x16xf32>
    %11 = arith.maximumf %7, %10 : vector<72x16xf32>
    %c3 = arith.constant 3 : index
    %c0_10 = arith.constant 0 : index
    %c0_11 = arith.constant 0 : index
    %12 = vector.load %arg1[%c3, %c0_10, %c0_11] : memref<4x72x151xbf16, #tpu.memory_space<vmem>>, vector<1x72x151xbf16>
    %13 = vector.shape_cast %12 : vector<1x72x151xbf16> to vector<72x151xbf16>
    %cst_12 = arith.constant dense<0.000000e+00> : vector<72x16xf32>
    %14 = tpu.matmul %13, %0, %cst_12 {dimension_numbers = #tpu.dot_dimension_numbers<[1], [0], [0], [1], [0, 0, 1, 1], [], []>} : vector<72x151xbf16>, vector<151x16xbf16>, vector<72x16xf32> -> vector<72x16xf32>
    %15 = arith.maximumf %11, %14 : vector<72x16xf32>
    %16 = arith.truncf %15 : vector<72x16xf32> to vector<72x16xbf16>
    %c0_13 = arith.constant 0 : index
    %c0_14 = arith.constant 0 : index
    %17 = vector.load %arg3[%c0_13, %c0_14] : memref<72x16xbf16, #tpu.memory_space<vmem>>, vector<72x16xbf16>
    tpu.vector_store %arg3[%c0_13, %c0_14], %16 {strides = array<i32>} : memref<72x16xbf16, #tpu.memory_space<vmem>>, vector<72x16xbf16>,
    return
  }
  func.func @transform_0(%arg0: i32) -> (i32, i32, i32) {
    %c0_i32 = arith.constant 0 : i32
    %c0_i32_0 = arith.constant 0 : i32
    %c0_i32_1 = arith.constant 0 : i32
    return %c0_i32, %arg0, %c0_i32_0 : i32, i32, i32
  }
  func.func @transform_1(%arg0: i32) -> (i32, i32) {
    %c0_i32 = arith.constant 0 : i32
    %c0_i32_0 = arith.constant 0 : i32
    %c0_i32_1 = arith.constant 0 : i32
    return %c0_i32, %c0_i32_0 : i32, i32
  }
  func.func @transform_2(%arg0: i32) -> (i32, i32) {
    %c0_i32 = arith.constant 0 : i32
    %c0_i32_0 = arith.constant 0 : i32
    return %arg0, %c0_i32 : i32, i32
  }
}

module attributes {stable_mosaic.version = 11 : i64} {
  func.func @_mlp_kernel(%arg0: i32, %arg1: memref<8x577xbf16, #tpu.memory_space<vmem>>, %arg2: memref<577x121xbf16, #tpu.memory_space<vmem>>, %arg3: memref<121x85xbf16, #tpu.memory_space<vmem>>, %arg4: memref<85x10xbf16, #tpu.memory_space<vmem>>, %arg5: memref<8x10xf32, #tpu.memory_space<vmem>>) attributes {dimension_semantics = [#tpu.dimension_semantics<parallel>], iteration_bounds = array<i64: 1>, scalar_prefetch = 0 : i64, scratch_operands = 0 : i64, tpu.core_type = #tpu.core_type<tc>, window_params = [{transform_indices = @transform_0, window_bounds = array<i64: 8, 577>}, {pipeline_mode = #tpu.pipeline_mode<synchronous>, transform_indices = @transform_1, window_bounds = array<i64: 577, 121>}, {pipeline_mode = #tpu.pipeline_mode<synchronous>, transform_indices = @transform_2, window_bounds = array<i64: 121, 85>}, {pipeline_mode = #tpu.pipeline_mode<synchronous>, transform_indices = @transform_3, window_bounds = array<i64: 85, 10>}, {transform_indices = @transform_4, window_bounds = array<i64: 8, 10>}]} {
    %c0 = arith.constant 0 : index
    %c0_0 = arith.constant 0 : index
    %0 = vector.load %arg1[%c0, %c0_0] : memref<8x577xbf16, #tpu.memory_space<vmem>>, vector<8x577xbf16>
    %c0_1 = arith.constant 0 : index
    %c0_2 = arith.constant 0 : index
    %1 = vector.load %arg2[%c0_1, %c0_2] : memref<577x121xbf16, #tpu.memory_space<vmem>>, vector<577x121xbf16>
    %cst = arith.constant dense<0.000000e+00> : vector<8x121xf32>
    %2 = tpu.matmul %0, %1, %cst {dimension_numbers = #tpu.dot_dimension_numbers<[1], [0], [0], [1], [0, 0, 1, 1], [], []>} : vector<8x577xbf16>, vector<577x121xbf16>, vector<8x121xf32> -> vector<8x121xf32>
    %cst_3 = arith.constant 0.000000e+00 : f32
    %3 = vector.broadcast %cst_3 : f32 to vector<8x121xf32>
    %4 = arith.maximumf %2, %3 : vector<8x121xf32>
    %5 = arith.truncf %4 : vector<8x121xf32> to vector<8x121xbf16>
    %c0_4 = arith.constant 0 : index
    %c0_5 = arith.constant 0 : index
    %6 = vector.load %arg3[%c0_4, %c0_5] : memref<121x85xbf16, #tpu.memory_space<vmem>>, vector<121x85xbf16>
    %cst_6 = arith.constant dense<0.000000e+00> : vector<8x85xf32>
    %7 = tpu.matmul %5, %6, %cst_6 {dimension_numbers = #tpu.dot_dimension_numbers<[1], [0], [0], [1], [0, 0, 1, 1], [], []>} : vector<8x121xbf16>, vector<121x85xbf16>, vector<8x85xf32> -> vector<8x85xf32>
    %cst_7 = arith.constant 0.000000e+00 : f32
    %8 = vector.broadcast %cst_7 : f32 to vector<8x85xf32>
    %9 = arith.maximumf %7, %8 : vector<8x85xf32>
    %10 = arith.truncf %9 : vector<8x85xf32> to vector<8x85xbf16>
    %c0_8 = arith.constant 0 : index
    %c0_9 = arith.constant 0 : index
    %11 = vector.load %arg4[%c0_8, %c0_9] : memref<85x10xbf16, #tpu.memory_space<vmem>>, vector<85x10xbf16>
    %cst_10 = arith.constant dense<0.000000e+00> : vector<8x10xf32>
    %12 = tpu.matmul %10, %11, %cst_10 {dimension_numbers = #tpu.dot_dimension_numbers<[1], [0], [0], [1], [0, 0, 1, 1], [], []>} : vector<8x85xbf16>, vector<85x10xbf16>, vector<8x10xf32> -> vector<8x10xf32>
    %c0_11 = arith.constant 0 : index
    %c0_12 = arith.constant 0 : index
    %13 = vector.load %arg5[%c0_11, %c0_12] : memref<8x10xf32, #tpu.memory_space<vmem>>, vector<8x10xf32>
    tpu.vector_store %arg5[%c0_11, %c0_12], %12 {strides = array<i32>} : memref<8x10xf32, #tpu.memory_space<vmem>>, vector<8x10xf32>,
    return
  }
  func.func @transform_0(%arg0: i32) -> (i32, i32) {
    %c0_i32 = arith.constant 0 : i32
    %c0_i32_0 = arith.constant 0 : i32
    return %arg0, %c0_i32 : i32, i32
  }
  func.func @transform_1(%arg0: i32) -> (i32, i32) {
    %c0_i32 = arith.constant 0 : i32
    %c0_i32_0 = arith.constant 0 : i32
    %c0_i32_1 = arith.constant 0 : i32
    return %c0_i32, %c0_i32_0 : i32, i32
  }
  func.func @transform_2(%arg0: i32) -> (i32, i32) {
    %c0_i32 = arith.constant 0 : i32
    %c0_i32_0 = arith.constant 0 : i32
    %c0_i32_1 = arith.constant 0 : i32
    return %c0_i32, %c0_i32_0 : i32, i32
  }
  func.func @transform_3(%arg0: i32) -> (i32, i32) {
    %c0_i32 = arith.constant 0 : i32
    %c0_i32_0 = arith.constant 0 : i32
    %c0_i32_1 = arith.constant 0 : i32
    return %c0_i32, %c0_i32_0 : i32, i32
  }
  func.func @transform_4(%arg0: i32) -> (i32, i32) {
    %c0_i32 = arith.constant 0 : i32
    %c0_i32_0 = arith.constant 0 : i32
    return %arg0, %c0_i32 : i32, i32
  }
}

</mosaic_0001>

<bundles_post_ra>
// kernel: lenet5_forward.3
= control target key start
LH: loop header
LB: loop body
LE: loop exit
PB: predicated region body
PF: predicated region fallthrough
CT: control target
= control target key end

     0   :  { %v5502_v0 = vmov 0.0   ;;  %vm4011_vm0 = vmmov 0   ;;  %vm339_vm1 = vcmask 1045504   ;;  %vm251_vm2 = vcmask 621568   ;;  %s5499_s1 = inlined_call_operand.vmem [shape: bf16[76,6], index: 1, kind: input, shape index: {}]   ;;  %s5500_s0 = inlined_call_operand.vmem [shape: bf16[4,456,76], index: 0, kind: input, shape index: {}]   ;;  %s5501_s2 = inlined_call_operand.vmem [shape: bf16[456,6], index: 2, kind: output, shape index: {}]  }
   0x1   :  { %3383 = vmatprep.subr.bf16.mxu0 %v5502_v0  ;;  %3509 = vmatprep.subr.bf16.mxu1 %v5502_v0  ;;  %v3889_v1 = vld [vmem:[%s5499_s1] sm:$0xff]   ;;  %v3890_v2 = vld [vmem:[%s5499_s1 + $0x8] sm:$0xff]   ;;  %v3891_v3 = vld [vmem:[%s5499_s1 + $0x10] sm:$0xff]   ;;  %vm2663_vm3 = vcmask 44032  }
   0x2   :  { %3393 = vmatprep.mubr.msk.bf16.mxu0 %vm4011_vm0, %v5502_v0  ;;  %3519 = vmatprep.mubr.msk.bf16.mxu1 %vm4011_vm0, %v5502_v0  ;;  %v3892_v4 = vld [vmem:[%s5499_s1 + $0x18] sm:$0xff]   ;;  %v3893_v5 = vld [vmem:[%s5499_s1 + $0x20] sm:$0x3f]   ;;  %v3896_v9 = vld [vmem:[%s5500_s0 + $0x8] sm:$0xff]  }
   0x3   :  { %3384 = vmatpush3.bf16.msra.mxu0 %v3889_v1  ;;  %3510 = vmatpush3.bf16.msra.mxu1 %v3889_v1  ;;  %v341_v6 = vsel %vm339_vm1, %v3893_v5, 0  ;;  %v3894_v7 = vld [vmem:[%s5500_s0] sm:$0xff]   ;;  %v3897_v10 = vld [vmem:[%s5500_s0 + $0xec] sm:$0xff]   ;;  %v3899_v12 = vld [vmem:[%s5500_s0 + $0xf4] sm:$0xff]  }
   0x4   :  { %3385 = vmatprep.subr.bf16.mxu0 %v5502_v0  ;;  %3511 = vmatprep.subr.bf16.mxu1 %v5502_v0  ;;  %v3895_v8 = vld [vmem:[%s5500_s0 + $0xe4] sm:$0xff]   ;;  %v3898_v11 = vld [vmem:[%s5500_s0 + $0x10] sm:$0xff]   ;;  %v3900_v13 = vld [vmem:[%s5500_s0 + $0x18] sm:$0xff]  }
   0x5   :  { %v3901_v14 = vld [vmem:[%s5500_s0 + $0xfc] sm:$0xff]   ;;  %v3903_v16 = vld [vmem:[%s5500_s0 + $0x104] sm:$0xff]   ;;  %v3905_v18 = vld [vmem:[%s5500_s0 + $0x10c] sm:$0xff]  }
   0x6   :  { %v3902_v15 = vld [vmem:[%s5500_s0 + $0x20] sm:$0xff]   ;;  %v3904_v17 = vld [vmem:[%s5500_s0 + $0x28] sm:$0xff]   ;;  %v3906_v19 = vld [vmem:[%s5500_s0 + $0x30] sm:$0xff]  }
   0x7   :  { %3386 = vmatpush3.bf16.msra.mxu0 %v3890_v2  ;;  %3512 = vmatpush3.bf16.msra.mxu1 %v3890_v2  ;;  %v3907_v20 = vld [vmem:[%s5500_s0 + $0x114] sm:$0xff]   ;;  %v3909_v22 = vld [vmem:[%s5500_s0 + $0x11c] sm:$0xff]   ;;  %v3911_v24 = vld [vmem:[%s5500_s0 + $0x124] sm:$0xff]  }
   0x8   :  { %3387 = vmatprep.subr.bf16.mxu0 %v5502_v0  ;;  %3513 = vmatprep.subr.bf16.mxu1 %v5502_v0  ;;  %v3908_v21 = vld [vmem:[%s5500_s0 + $0x38] sm:$0xff]   ;;  %v3910_v23 = vld [vmem:[%s5500_s0 + $0x40] sm:$0xff]   ;;  %v3912_v25 = vld [vmem:[%s5500_s0 + $0x48] sm:$0xff]  }
   0x9   :  { %v3913_v26 = vld [vmem:[%s5500_s0 + $0x12c] sm:$0xff]   ;;  %v3915_v28 = vld [vmem:[%s5500_s0 + $0x134] sm:$0xff]   ;;  %v3917_v30 = vld [vmem:[%s5500_s0 + $0x13c] sm:$0xff]  }
   0xa   :  { %v3914_v27 = vld [vmem:[%s5500_s0 + $0x50] sm:$0xff]   ;;  %v3916_v29 = vld [vmem:[%s5500_s0 + $0x58] sm:$0xff]   ;;  %v3918_v31 = vld [vmem:[%s5500_s0 + $0x60] sm:$0xff]  }
   0xb   :  { %3388 = vmatpush3.bf16.msra.mxu0 %v3891_v3  ;;  %3514 = vmatpush3.bf16.msra.mxu1 %v3891_v3  ;;  %v3919_v32 = vld [vmem:[%s5500_s0 + $0x144] sm:$0xff]   ;;  %v3921_v34 = vld [vmem:[%s5500_s0 + $0x14c] sm:$0xff]   ;;  %v3923_v36 = vld [vmem:[%s5500_s0 + $0x154] sm:$0xff]  }
   0xc   :  { %3389 = vmatprep.subr.bf16.mxu0 %v5502_v0  ;;  %3515 = vmatprep.subr.bf16.mxu1 %v5502_v0  ;;  %v3920_v33 = vld [vmem:[%s5500_s0 + $0x68] sm:$0xff]   ;;  %v3922_v35 = vld [vmem:[%s5500_s0 + $0x70] sm:$0xff]   ;;  %v3924_v37 = vld [vmem:[%s5500_s0 + $0x78] sm:$0xff]  }
   0xd   :  { %v3925_v38 = vld [vmem:[%s5500_s0 + $0x15c] sm:$0xff]   ;;  %v3927_v40 = vld [vmem:[%s5500_s0 + $0x164] sm:$0xff]   ;;  %v3929_v42 = vld [vmem:[%s5500_s0 + $0x16c] sm:$0xff]  }
   0xe   :  { %v3926_v39 = vld [vmem:[%s5500_s0 + $0x80] sm:$0xff]   ;;  %v3928_v41 = vld [vmem:[%s5500_s0 + $0x88] sm:$0xff]   ;;  %v3930_v43 = vld [vmem:[%s5500_s0 + $0x90] sm:$0xff]  }
   0xf   :  { %3390 = vmatpush3.bf16.msra.mxu0 %v3892_v4  ;;  %3516 = vmatpush3.bf16.msra.mxu1 %v3892_v4  ;;  %v3931_v44 = vld [vmem:[%s5500_s0 + $0x174] sm:$0xff]   ;;  %v3933_v46 = vld [vmem:[%s5500_s0 + $0x17c] sm:$0xff]   ;;  %v3935_v48 = vld [vmem:[%s5500_s0 + $0x184] sm:$0xff]  }
  0x10   :  { %3391 = vmatprep.subr.bf16.mxu0 %v5502_v0  ;;  %3517 = vmatprep.subr.bf16.mxu1 %v5502_v0  ;;  %v3932_v45 = vld [vmem:[%s5500_s0 + $0x98] sm:$0xff]   ;;  %v3934_v47 = vld [vmem:[%s5500_s0 + $0xa0] sm:$0xff]   ;;  %v3936_v49 = vld [vmem:[%s5500_s0 + $0xa8] sm:$0xff]  }
  0x11   :  { %v3937_v50 = vld [vmem:[%s5500_s0 + $0x18c] sm:$0xff]   ;;  %v3939_v52 = vld [vmem:[%s5500_s0 + $0x194] sm:$0xff]   ;;  %v3941_v54 = vld [vmem:[%s5500_s0 + $0x19c] sm:$0xff]  }
  0x12   :  { %v3938_v51 = vld [vmem:[%s5500_s0 + $0xb0] sm:$0xff]   ;;  %v3940_v53 = vld [vmem:[%s5500_s0 + $0xb8] sm:$0xff]   ;;  %v3942_v55 = vld [vmem:[%s5500_s0 + $0xc0] sm:$0xff]  }
  0x13   :  { %3392 = vmatpush3.bf16.msra.mxu0 %v341_v6  ;;  %3518 = vmatpush3.bf16.msra.mxu1 %v341_v6  ;;  %v3943_v56 = vld [vmem:[%s5500_s0 + $0x1a4] sm:$0xff]   ;;  %v3945_v58 = vld [vmem:[%s5500_s0 + $0x1ac] sm:$0xff]   ;;  %v3947_v60 = vld [vmem:[%s5500_s0 + $0x1b4] sm:$0xff]  }
  0x14   :  { %3635 = vmatprep.subr.bf16.mxu0 %v5502_v0  ;;  %3761 = vmatprep.subr.bf16.mxu1 %v5502_v0  ;;  %v3944_v57 = vld [vmem:[%s5500_s0 + $0xc8] sm:$0xff]   ;;  %v3946_v59 = vld [vmem:[%s5500_s0 + $0xd0] sm:$0xff]  }
  0x16   :  { %3394 = vmatmul.mubr.msk.bf16.vlgmr.msra.gmra.mrb[0].mxu0 %vm251_vm2, %v3894_v7  ;;  %3520 = vmatmul.mubr.msk.bf16.vlgmr.msra.gmra.mrb[0].mxu1 %vm251_vm2, %v3895_v8 }
  0x17   :  { %3636 = vmatpush3.bf16.msra.mxu0 %v3889_v1  ;;  %3762 = vmatpush3.bf16.msra.mxu1 %v3889_v1 }
  0x18   :  { %3397 = vmatprep.mubr.msk.bf16.mxu0 %vm4011_vm0, %v5502_v0  ;;  %3523 = vmatprep.mubr.msk.bf16.mxu1 %vm4011_vm0, %v5502_v0 }
  0x19   :  { %3637 = vmatprep.subr.bf16.mxu0 %v5502_v0  ;;  %3763 = vmatprep.subr.bf16.mxu1 %v5502_v0 }
  0x1b   :  { %3638 = vmatpush3.bf16.msra.mxu0 %v3890_v2  ;;  %3764 = vmatpush3.bf16.msra.mxu1 %v3890_v2 }
  0x1c   :  { %3639 = vmatprep.subr.bf16.mxu0 %v5502_v0  ;;  %3765 = vmatprep.subr.bf16.mxu1 %v5502_v0 }
  0x1e   :  { %3398 = vmatmul.mubr.msk.bf16.gmra.mrb[4].mxu0 %vm251_vm2, %v3896_v9  ;;  %3524 = vmatmul.mubr.msk.bf16.gmra.mrb[4].mxu1 %vm251_vm2, %v3897_v10 }
  0x1f   :  { %3401 = vmatprep.mubr.msk.bf16.mxu0 %vm4011_vm0, %v5502_v0  ;;  %3527 = vmatprep.mubr.msk.bf16.mxu1 %vm4011_vm0, %v5502_v0 }
  0x20   :  { %3640 = vmatpush3.bf16.msra.mxu0 %v3891_v3  ;;  %3766 = vmatpush3.bf16.msra.mxu1 %v3891_v3  ;;  %v3948_v3 = vld [vmem:[%s5500_s0 + $0xd8] sm:$0xff]  }
  0x21   :  { %3641 = vmatprep.subr.bf16.mxu0 %v5502_v0  ;;  %3767 = vmatprep.subr.bf16.mxu1 %v5502_v0 }
  0x24   :  { %3642 = vmatpush3.bf16.msra.mxu0 %v3892_v4  ;;  %3768 = vmatpush3.bf16.msra.mxu1 %v3892_v4  ;;  %v3949_v4 = vld [vmem:[%s5500_s0 + $0x1bc] sm:$0xff]  }
  0x25   :  { %3643 = vmatprep.subr.bf16.mxu0 %v5502_v0  ;;  %3769 = vmatprep.subr.bf16.mxu1 %v5502_v0 }
  0x26   :  { %3402 = vmatmul.mubr.msk.bf16.gmra.mrb[8].mxu0 %vm251_vm2, %v3898_v11  ;;  %3528 = vmatmul.mubr.msk.bf16.gmra.mrb[8].mxu1 %vm251_vm2, %v3899_v12 }
  0x27   :  { %3405 = vmatprep.mubr.msk.bf16.mxu0 %vm4011_vm0, %v5502_v0  ;;  %3531 = vmatprep.mubr.msk.bf16.mxu1 %vm4011_vm0, %v5502_v0 }
  0x28   :  { %3644 = vmatpush3.bf16.msra.mxu0 %v341_v6  ;;  %3770 = vmatpush3.bf16.msra.mxu1 %v341_v6 }
  0x2e   :  { %3406 = vmatmul.mubr.msk.bf16.gmra.mrb[12].mxu0 %vm251_vm2, %v3900_v13  ;;  %3532 = vmatmul.mubr.msk.bf16.gmra.mrb[12].mxu1 %vm251_vm2, %v3901_v14 }
  0x2f   :  { %3409 = vmatprep.mubr.msk.bf16.mxu0 %vm4011_vm0, %v5502_v0  ;;  %3535 = vmatprep.mubr.msk.bf16.mxu1 %vm4011_vm0, %v5502_v0 }
  0x36   :  { %3410 = vmatmul.mubr.msk.bf16.gmra.mrb[16].mxu0 %vm251_vm2, %v3902_v15  ;;  %3536 = vmatmul.mubr.msk.bf16.gmra.mrb[16].mxu1 %vm251_vm2, %v3903_v16  ;;  %v3950_v15 = vld [vmem:[%s5500_s0 + $0xe0] ss:$0 sps:$4 sm:$0xff]   ;;  %v3951_v16 = vld [vmem:[%s5500_s0 + $0x1c4] ss:$0 sps:$4 sm:$0xff]  }
  0x37   :  { %3413 = vmatprep.mubr.msk.bf16.mxu0 %vm4011_vm0, %v5502_v0  ;;  %3539 = vmatprep.mubr.msk.bf16.mxu1 %vm4011_vm0, %v5502_v0 }
  0x3e   :  { %3414 = vmatmul.mubr.msk.bf16.gmra.mrb[20].mxu0 %vm251_vm2, %v3904_v17  ;;  %3540 = vmatmul.mubr.msk.bf16.gmra.mrb[20].mxu1 %vm251_vm2, %v3905_v18 }
  0x3f   :  { %3417 = vmatprep.mubr.msk.bf16.mxu0 %vm4011_vm0, %v5502_v0  ;;  %3543 = vmatprep.mubr.msk.bf16.mxu1 %vm4011_vm0, %v5502_v0 }
  0x46   :  { %3418 = vmatmul.mubr.msk.bf16.gmra.mrb[24].mxu0 %vm251_vm2, %v3906_v19  ;;  %3544 = vmatmul.mubr.msk.bf16.gmra.mrb[24].mxu1 %vm251_vm2, %v3907_v20 }
  0x47   :  { %3421 = vmatprep.mubr.msk.bf16.mxu0 %vm4011_vm0, %v5502_v0  ;;  %3547 = vmatprep.mubr.msk.bf16.mxu1 %vm4011_vm0, %v5502_v0 }
  0x4e   :  { %3422 = vmatmul.mubr.msk.bf16.gmra.mrb[28].mxu0 %vm251_vm2, %v3908_v21  ;;  %3548 = vmatmul.mubr.msk.bf16.gmra.mrb[28].mxu1 %vm251_vm2, %v3909_v22 }
  0x4f   :  { %3425 = vmatprep.mubr.msk.bf16.mxu0 %vm4011_vm0, %v5502_v0  ;;  %3551 = vmatprep.mubr.msk.bf16.mxu1 %vm4011_vm0, %v5502_v0 }
  0x56   :  { %3426 = vmatmul.mubr.msk.bf16.gmra.mrb[32].mxu0 %vm251_vm2, %v3910_v23  ;;  %3552 = vmatmul.mubr.msk.bf16.gmra.mrb[32].mxu1 %vm251_vm2, %v3911_v24 }
  0x57   :  { %3429 = vmatprep.mubr.msk.bf16.mxu0 %vm4011_vm0, %v5502_v0  ;;  %3555 = vmatprep.mubr.msk.bf16.mxu1 %vm4011_vm0, %v5502_v0 }
  0x5e   :  { %3430 = vmatmul.mubr.msk.bf16.gmra.mrb[36].mxu0 %vm251_vm2, %v3912_v25  ;;  %3556 = vmatmul.mubr.msk.bf16.gmra.mrb[36].mxu1 %vm251_vm2, %v3913_v26 }
  0x5f   :  { %3433 = vmatprep.mubr.msk.bf16.mxu0 %vm4011_vm0, %v5502_v0  ;;  %3559 = vmatprep.mubr.msk.bf16.mxu1 %vm4011_vm0, %v5502_v0 }
  0x66   :  { %3434 = vmatmul.mubr.msk.bf16.gmra.mrb[40].mxu0 %vm251_vm2, %v3914_v27  ;;  %3560 = vmatmul.mubr.msk.bf16.gmra.mrb[40].mxu1 %vm251_vm2, %v3915_v28  ;;  %v3952_v27 = vld [vmem:[%s5500_s0 + $0x1c8] sm:$0xff]  }
  0x67   :  { %3437 = vmatprep.mubr.msk.bf16.mxu0 %vm4011_vm0, %v5502_v0  ;;  %3563 = vmatprep.mubr.msk.bf16.mxu1 %vm4011_vm0, %v5502_v0  ;;  %v3953_v28 = vld [vmem:[%s5500_s0 + $0x2ac] sm:$0xff]  }
  0x6e   :  { %3438 = vmatmul.mubr.msk.bf16.gmra.mrb[44].mxu0 %vm251_vm2, %v3916_v29  ;;  %3564 = vmatmul.mubr.msk.bf16.gmra.mrb[44].mxu1 %vm251_vm2, %v3917_v30 }
  0x6f   :  { %3441 = vmatprep.mubr.msk.bf16.mxu0 %vm4011_vm0, %v5502_v0  ;;  %3567 = vmatprep.mubr.msk.bf16.mxu1 %vm4011_vm0, %v5502_v0 }
  0x76   :  { %3442 = vmatmul.mubr.msk.bf16.gmra.mrb[48].mxu0 %vm251_vm2, %v3918_v31  ;;  %3568 = vmatmul.mubr.msk.bf16.gmra.mrb[48].mxu1 %vm251_vm2, %v3919_v32 }
  0x77   :  { %3445 = vmatprep.mubr.msk.bf16.mxu0 %vm4011_vm0, %v5502_v0  ;;  %3571 = vmatprep.mubr.msk.bf16.mxu1 %vm4011_vm0, %v5502_v0 }
  0x7e   :  { %3446 = vmatmul.mubr.msk.bf16.gmra.mrb[52].mxu0 %vm251_vm2, %v3920_v33  ;;  %3572 = vmatmul.mubr.msk.bf16.gmra.mrb[52].mxu1 %vm251_vm2, %v3921_v34 }
  0x7f   :  { %3449 = vmatprep.mubr.msk.bf16.mxu0 %vm4011_vm0, %v5502_v0  ;;  %3575 = vmatprep.mubr.msk.bf16.mxu1 %vm4011_vm0, %v5502_v0 }
  0x86   :  { %3450 = vmatmul.mubr.msk.bf16.gmra.mrb[56].mxu0 %vm251_vm2, %v3922_v35  ;;  %3576 = vmatmul.mubr.msk.bf16.gmra.mrb[56].mxu1 %vm251_vm2, %v3923_v36 }
  0x87   :  { %3453 = vmatprep.mubr.msk.bf16.mxu0 %vm4011_vm0, %v5502_v0  ;;  %3579 = vmatprep.mubr.msk.bf16.mxu1 %vm4011_vm0, %v5502_v0 }
  0x8e   :  { %3454 = vmatmul.mubr.msk.bf16.gmra.mrb[60].mxu0 %vm251_vm2, %v3924_v37  ;;  %3580 = vmatmul.mubr.msk.bf16.gmra.mrb[60].mxu1 %vm251_vm2, %v3925_v38 }
  0x8f   :  { %3457 = vmatprep.mubr.msk.bf16.mxu0 %vm4011_vm0, %v5502_v0  ;;  %3583 = vmatprep.mubr.msk.bf16.mxu1 %vm4011_vm0, %v5502_v0 }
  0x96   :  { %3458 = vmatmul.mubr.msk.bf16.gmra.mrb[64].mxu0 %vm251_vm2, %v3926_v39  ;;  %3584 = vmatmul.mubr.msk.bf16.gmra.mrb[64].mxu1 %vm251_vm2, %v3927_v40  ;;  %v3954_v39 = vld [vmem:[%s5500_s0 + $0x1d0] sm:$0xff]  }
  0x97   :  { %3461 = vmatprep.mubr.msk.bf16.mxu0 %vm4011_vm0, %v5502_v0  ;;  %3587 = vmatprep.mubr.msk.bf16.mxu1 %vm4011_vm0, %v5502_v0  ;;  %v3955_v40 = vld [vmem:[%s5500_s0 + $0x2b4] sm:$0xff]  }
  0x9e   :  { %3462 = vmatmul.mubr.msk.bf16.gmra.mrb[68].mxu0 %vm251_vm2, %v3928_v41  ;;  %3588 = vmatmul.mubr.msk.bf16.gmra.mrb[68].mxu1 %vm251_vm2, %v3929_v42 }
  0x9f   :  { %3465 = vmatprep.mubr.msk.bf16.mxu0 %vm4011_vm0, %v5502_v0  ;;  %3591 = vmatprep.mubr.msk.bf16.mxu1 %vm4011_vm0, %v5502_v0 }
  0xa6   :  { %3466 = vmatmul.mubr.msk.bf16.gmra.mrb[72].mxu0 %vm251_vm2, %v3930_v43  ;;  %3592 = vmatmul.mubr.msk.bf16.gmra.mrb[72].mxu1 %vm251_vm2, %v3931_v44 }
  0xa7   :  { %3469 = vmatprep.mubr.msk.bf16.mxu0 %vm4011_vm0, %v5502_v0  ;;  %3595 = vmatprep.mubr.msk.bf16.mxu1 %vm4011_vm0, %v5502_v0 }
  0xae   :  { %3470 = vmatmul.mubr.msk.bf16.gmra.mrb[76].mxu0 %vm251_vm2, %v3932_v45  ;;  %3596 = vmatmul.mubr.msk.bf16.gmra.mrb[76].mxu1 %vm251_vm2, %v3933_v46 }
  0xaf   :  { %3473 = vmatprep.mubr.msk.bf16.mxu0 %vm4011_vm0, %v5502_v0  ;;  %3599 = vmatprep.mubr.msk.bf16.mxu1 %vm4011_vm0, %v5502_v0 }
  0xb6   :  { %3474 = vmatmul.mubr.msk.bf16.gmra.mrb[80].mxu0 %vm251_vm2, %v3934_v47  ;;  %3600 = vmatmul.mubr.msk.bf16.gmra.mrb[80].mxu1 %vm251_vm2, %v3935_v48 }
  0xb7   :  { %3477 = vmatprep.mubr.msk.bf16.mxu0 %vm4011_vm0, %v5502_v0  ;;  %3603 = vmatprep.mubr.msk.bf16.mxu1 %vm4011_vm0, %v5502_v0 }
  0xbe   :  { %3478 = vmatmul.mubr.msk.bf16.gmra.mrb[84].mxu0 %vm251_vm2, %v3936_v49  ;;  %3604 = vmatmul.mubr.msk.bf16.gmra.mrb[84].mxu1 %vm251_vm2, %v3937_v50 }
  0xbf   :  { %3481 = vmatprep.mubr.msk.bf16.mxu0 %vm4011_vm0, %v5502_v0  ;;  %3607 = vmatprep.mubr.msk.bf16.mxu1 %vm4011_vm0, %v5502_v0 }
  0xc6   :  { %3482 = vmatmul.mubr.msk.bf16.gmra.mrb[88].mxu0 %vm251_vm2, %v3938_v51  ;;  %3608 = vmatmul.mubr.msk.bf16.gmra.mrb[88].mxu1 %vm251_vm2, %v3939_v52  ;;  %v3956_v51 = vld [vmem:[%s5500_s0 + $0x1d8] sm:$0xff]  }
  0xc7   :  { %3485 = vmatprep.mubr.msk.bf16.mxu0 %vm4011_vm0, %v5502_v0  ;;  %3611 = vmatprep.mubr.msk.bf16.mxu1 %vm4011_vm0, %v5502_v0  ;;  %v3957_v52 = vld [vmem:[%s5500_s0 + $0x2bc] sm:$0xff]  }
  0xce   :  { %3486 = vmatmul.mubr.msk.bf16.gmra.mrb[92].mxu0 %vm251_vm2, %v3940_v53  ;;  %3612 = vmatmul.mubr.msk.bf16.gmra.mrb[92].mxu1 %vm251_vm2, %v3941_v54 }
  0xcf   :  { %3489 = vmatprep.mubr.msk.bf16.mxu0 %vm4011_vm0, %v5502_v0  ;;  %3615 = vmatprep.mubr.msk.bf16.mxu1 %vm4011_vm0, %v5502_v0 }
  0xd6   :  { %3490 = vmatmul.mubr.msk.bf16.gmra.mrb[96].mxu0 %vm251_vm2, %v3942_v55  ;;  %3616 = vmatmul.mubr.msk.bf16.gmra.mrb[96].mxu1 %vm251_vm2, %v3943_v56 }
  0xd7   :  { %3493 = vmatprep.mubr.msk.bf16.mxu0 %vm4011_vm0, %v5502_v0  ;;  %3619 = vmatprep.mubr.msk.bf16.mxu1 %vm4011_vm0, %v5502_v0 }
  0xde   :  { %3494 = vmatmul.mubr.msk.bf16.gmra.mrb[100].mxu0 %vm251_vm2, %v3944_v57  ;;  %3620 = vmatmul.mubr.msk.bf16.gmra.mrb[100].mxu1 %vm251_vm2, %v3945_v58 }
  0xdf   :  { %3497 = vmatprep.mubr.msk.bf16.mxu0 %vm4011_vm0, %v5502_v0  ;;  %3623 = vmatprep.mubr.msk.bf16.mxu1 %vm4011_vm0, %v5502_v0 }
  0xe6   :  { %3498 = vmatmul.mubr.msk.bf16.gmra.mrb[104].mxu0 %vm251_vm2, %v3946_v59  ;;  %3624 = vmatmul.mubr.msk.bf16.gmra.mrb[104].mxu1 %vm251_vm2, %v3947_v60 }
  0xe7   :  { %3501 = vmatprep.mubr.msk.bf16.mxu0 %vm4011_vm0, %v5502_v0  ;;  %3627 = vmatprep.mubr.msk.bf16.mxu1 %vm4011_vm0, %v5502_v0 }
  0xe9   :  { %v4390_v61 = vpop.f32.mrb[0].mxu0  ;;  %v4392_v62 = vpop.f32.mrb[0].mxu1 }
  0xea   :  { %v3395_v1 = vpop.f32.mrb[1].mxu0  ;;  %v3521_v2 = vpop.f32.mrb[1].mxu1 }
  0xeb   :  { %v4402_v5 = vpop.f32.mrb[2].mxu0  ;;  %v4404_v6 = vpop.f32.mrb[2].mxu1 }
  0xec   :  { %v3396_v8 = vpop.f32.mrb[3].mxu0  ;;  %v3522_v9 = vpop.f32.mrb[3].mxu1 }
  0xee   :  { %3502 = vmatmul.mubr.msk.bf16.gmra.mrb[108].mxu0 %vm251_vm2, %v3948_v3  ;;  %3628 = vmatmul.mubr.msk.bf16.gmra.mrb[108].mxu1 %vm251_vm2, %v3949_v4  ;;  %v3958_v3 = vld [vmem:[%s5500_s0 + $0x1e0] sm:$0xff]  }
  0xef   :  { %3505 = vmatprep.mubr.msk.bf16.mxu0 %vm4011_vm0, %v5502_v0  ;;  %3631 = vmatprep.mubr.msk.bf16.mxu1 %vm4011_vm0, %v5502_v0  ;;  %v3959_v4 = vld [vmem:[%s5500_s0 + $0x2c4] sm:$0xff]  }
  0xf1   :  { %v4414_v10 = vpop.f32.mrb[4].mxu0  ;;  %v4416_v11 = vpop.f32.mrb[4].mxu1 }
  0xf2   :  { %v3399_v13 = vpop.f32.mrb[5].mxu0  ;;  %v3525_v14 = vpop.f32.mrb[5].mxu1 }
  0xf3   :  { %v4426_v17 = vpop.f32.mrb[6].mxu0  ;;  %v4428_v18 = vpop.f32.mrb[6].mxu1 }
  0xf4   :  { %v3400_v20 = vpop.f32.mrb[7].mxu0  ;;  %v3526_v21 = vpop.f32.mrb[7].mxu1 }
  0xf6   :  { %3506 = vmatmul.mubr.msk.bf16.gmra.mrb[112].mxu0 %vm251_vm2, %v3950_v15  ;;  %3632 = vmatmul.mubr.msk.bf16.gmra.mrb[112].mxu1 %vm251_vm2, %v3951_v16 }
  0xf7   :  { %3645 = vmatprep.mubr.msk.bf16.mxu0 %vm4011_vm0, %v5502_v0  ;;  %3771 = vmatprep.mubr.msk.bf16.mxu1 %vm4011_vm0, %v5502_v0 }
  0xf9   :  { %v4438_v22 = vpop.f32.mrb[8].mxu0  ;;  %v4440_v23 = vpop.f32.mrb[8].mxu1 }
  0xfa   :  { %v3403_v25 = vpop.f32.mrb[9].mxu0  ;;  %v3529_v26 = vpop.f32.mrb[9].mxu1 }
  0xfb   :  { %v4450_v29 = vpop.f32.mrb[10].mxu0  ;;  %v4452_v30 = vpop.f32.mrb[10].mxu1 }
  0xfc   :  { %v3404_v32 = vpop.f32.mrb[11].mxu0  ;;  %v3530_v33 = vpop.f32.mrb[11].mxu1 }
  0xfe   :  { %3646 = vmatmul.mubr.msk.bf16.vlgmr.msra.gmra.mrb[116].mxu0 %vm251_vm2, %v3952_v27  ;;  %3772 = vmatmul.mubr.msk.bf16.vlgmr.msra.gmra.mrb[116].mxu1 %vm251_vm2, %v3953_v28  ;;  %v3960_v27 = vld [vmem:[%s5500_s0 + $0x1e8] sm:$0xff]  }
  0xff   :  { %3649 = vmatprep.mubr.msk.bf16.mxu0 %vm4011_vm0, %v5502_v0  ;;  %3775 = vmatprep.mubr.msk.bf16.mxu1 %vm4011_vm0, %v5502_v0  ;;  %v3961_v28 = vld [vmem:[%s5500_s0 + $0x2cc] sm:$0xff]  }
 0x101   :  { %v4462_v34 = vpop.f32.mrb[12].mxu0  ;;  %v4464_v35 = vpop.f32.mrb[12].mxu1 }
 0x102   :  { %v3407_v37 = vpop.f32.mrb[13].mxu0  ;;  %v3533_v38 = vpop.f32.mrb[13].mxu1 }
 0x103   :  { %v4474_v41 = vpop.f32.mrb[14].mxu0  ;;  %v4476_v42 = vpop.f32.mrb[14].mxu1 }
 0x104   :  { %v3408_v44 = vpop.f32.mrb[15].mxu0  ;;  %v3534_v45 = vpop.f32.mrb[15].mxu1 }
 0x106   :  { %3650 = vmatmul.mubr.msk.bf16.gmra.mrb[120].mxu0 %vm251_vm2, %v3954_v39  ;;  %3776 = vmatmul.mubr.msk.bf16.gmra.mrb[120].mxu1 %vm251_vm2, %v3955_v40 }
 0x107   :  { %3653 = vmatprep.mubr.msk.bf16.mxu0 %vm4011_vm0, %v5502_v0  ;;  %3779 = vmatprep.mubr.msk.bf16.mxu1 %vm4011_vm0, %v5502_v0 }
 0x109   :  { %v4486_v46 = vpop.f32.mrb[16].mxu0  ;;  %v4488_v47 = vpop.f32.mrb[16].mxu1 }
 0x10a   :  { %v3411_v49 = vpop.f32.mrb[17].mxu0  ;;  %v3537_v50 = vpop.f32.mrb[17].mxu1 }
 0x10b   :  { %v4498_v53 = vpop.f32.mrb[18].mxu0  ;;  %v4500_v54 = vpop.f32.mrb[18].mxu1 }
 0x10c   :  { %v3412_v56 = vpop.f32.mrb[19].mxu0  ;;  %v3538_v57 = vpop.f32.mrb[19].mxu1 }
 0x10e   :  { %3654 = vmatmul.mubr.msk.bf16.gmra.mrb[124].mxu0 %vm251_vm2, %v3956_v51  ;;  %3780 = vmatmul.mubr.msk.bf16.gmra.mrb[124].mxu1 %vm251_vm2, %v3957_v52  ;;  %v3962_v51 = vld [vmem:[%s5500_s0 + $0x1f0] sm:$0xff]  }
 0x10f   :  { %3657 = vmatprep.mubr.msk.bf16.mxu0 %vm4011_vm0, %v5502_v0  ;;  %3783 = vmatprep.mubr.msk.bf16.mxu1 %vm4011_vm0, %v5502_v0  ;;  %v3963_v52 = vld [vmem:[%s5500_s0 + $0x2d4] sm:$0xff]  }
 0x111   :  { %v4510_v58 = vpop.f32.mrb[20].mxu0  ;;  %v4512_v59 = vpop.f32.mrb[20].mxu1 }
 0x112   :  { %v3415_v1 = vpop.f32.mrb[21].mxu0  ;;  %v3541_v2 = vpop.f32.mrb[21].mxu1 }
 0x113   :  { %v4522_v8 = vpop.f32.mrb[22].mxu0  ;;  %v4524_v9 = vpop.f32.mrb[22].mxu1 }
 0x114   :  { %v3416_v14 = vpop.f32.mrb[23].mxu0  ;;  %v3542_v15 = vpop.f32.mrb[23].mxu1 }
 0x116   :  { %3658 = vmatmul.mubr.msk.bf16.gmra.mrb[128].mxu0 %vm251_vm2, %v3958_v3  ;;  %3784 = vmatmul.mubr.msk.bf16.gmra.mrb[128].mxu1 %vm251_vm2, %v3959_v4 }
 0x117   :  { %3661 = vmatprep.mubr.msk.bf16.mxu0 %vm4011_vm0, %v5502_v0  ;;  %3787 = vmatprep.mubr.msk.bf16.mxu1 %vm4011_vm0, %v5502_v0 }
 0x119   :  { %v4534_v16 = vpop.f32.mrb[24].mxu0  ;;  %v4536_v20 = vpop.f32.mrb[24].mxu1 }
 0x11a   :  { %v3419_v25 = vpop.f32.mrb[25].mxu0  ;;  %v3545_v26 = vpop.f32.mrb[25].mxu1 }
 0x11b   :  { %v4546_v32 = vpop.f32.mrb[26].mxu0  ;;  %v4548_v33 = vpop.f32.mrb[26].mxu1 }
 0x11c   :  { %v3420_v38 = vpop.f32.mrb[27].mxu0  ;;  %v3546_v39 = vpop.f32.mrb[27].mxu1 }
 0x11e   :  { %3662 = vmatmul.mubr.msk.bf16.gmra.mrb[132].mxu0 %vm251_vm2, %v3960_v27  ;;  %3788 = vmatmul.mubr.msk.bf16.gmra.mrb[132].mxu1 %vm251_vm2, %v3961_v28  ;;  %v3964_v27 = vld [vmem:[%s5500_s0 + $0x1f8] sm:$0xff]  }
 0x11f   :  { %3665 = vmatprep.mubr.msk.bf16.mxu0 %vm4011_vm0, %v5502_v0  ;;  %3791 = vmatprep.mubr.msk.bf16.mxu1 %vm4011_vm0, %v5502_v0  ;;  %v3965_v28 = vld [vmem:[%s5500_s0 + $0x2dc] sm:$0xff]  }
 0x121   :  { %v4558_v40 = vpop.f32.mrb[28].mxu0  ;;  %v4560_v44 = vpop.f32.mrb[28].mxu1 }
 0x122   :  { %v3423_v49 = vpop.f32.mrb[29].mxu0  ;;  %v3549_v50 = vpop.f32.mrb[29].mxu1 }
 0x123   :  { %v4570_v56 = vpop.f32.mrb[30].mxu0  ;;  %v4572_v57 = vpop.f32.mrb[30].mxu1 }
 0x124   :  { %v3424_v2 = vpop.f32.mrb[31].mxu0  ;;  %v3550_v3 = vpop.f32.mrb[31].mxu1 }
 0x126   :  { %3666 = vmatmul.mubr.msk.bf16.gmra.mrb[136].mxu0 %vm251_vm2, %v3962_v51  ;;  %3792 = vmatmul.mubr.msk.bf16.gmra.mrb[136].mxu1 %vm251_vm2, %v3963_v52 }
 0x127   :  { %3669 = vmatprep.mubr.msk.bf16.mxu0 %vm4011_vm0, %v5502_v0  ;;  %3795 = vmatprep.mubr.msk.bf16.mxu1 %vm4011_vm0, %v5502_v0 }
 0x129   :  { %v4582_v4 = vpop.f32.mrb[32].mxu0  ;;  %v4584_v14 = vpop.f32.mrb[32].mxu1 }
 0x12a   :  { %v3427_v25 = vpop.f32.mrb[33].mxu0  ;;  %v3553_v26 = vpop.f32.mrb[33].mxu1 }
 0x12b   :  { %v4594_v38 = vpop.f32.mrb[34].mxu0  ;;  %v4596_v39 = vpop.f32.mrb[34].mxu1 }
 0x12c   :  { %v3428_v50 = vpop.f32.mrb[35].mxu0  ;;  %v3554_v51 = vpop.f32.mrb[35].mxu1 }
 0x12e   :  { %3670 = vmatmul.mubr.msk.bf16.gmra.mrb[140].mxu0 %vm251_vm2, %v3964_v27  ;;  %3796 = vmatmul.mubr.msk.bf16.gmra.mrb[140].mxu1 %vm251_vm2, %v3965_v28  ;;  %v3966_v27 = vld [vmem:[%s5500_s0 + $0x200] sm:$0xff]  }
 0x12f   :  { %3673 = vmatprep.mubr.msk.bf16.mxu0 %vm4011_vm0, %v5502_v0  ;;  %3799 = vmatprep.mubr.msk.bf16.mxu1 %vm4011_vm0, %v5502_v0  ;;  %v3967_v28 = vld [vmem:[%s5500_s0 + $0x2e4] sm:$0xff]  }
 0x131   :  { %v4606_v52 = vpop.f32.mrb[36].mxu0  ;;  %v4608_v2 = vpop.f32.mrb[36].mxu1 }
 0x132   :  { %v3431_v25 = vpop.f32.mrb[37].mxu0  ;;  %v3557_v26 = vpop.f32.mrb[37].mxu1 }
 0x133   :  { %v4618_v50 = vpop.f32.mrb[38].mxu0  ;;  %v4620_v51 = vpop.f32.mrb[38].mxu1 }
 0x134   :  { %v3432_v15 = vpop.f32.mrb[39].mxu0  ;;  %v3558_v1 = vpop.f32.mrb[39].mxu1 }
 0x135   :  { %v3968_v1 = vld [vmem:[%s5500_s0 + $0x208] sm:$0xff]  }
 0x136   :  { %3674 = vmatmul.mubr.msk.bf16.gmra.mrb[144].mxu0 %vm251_vm2, %v3966_v27  ;;  %3800 = vmatmul.mubr.msk.bf16.gmra.mrb[144].mxu1 %vm251_vm2, %v3967_v28  ;;  %v3969_v27 = vld [vmem:[%s5500_s0 + $0x2ec] sm:$0xff]  }
 0x137   :  { %3677 = vmatprep.mubr.msk.bf16.mxu0 %vm4011_vm0, %v5502_v0  ;;  %3803 = vmatprep.mubr.msk.bf16.mxu1 %vm4011_vm0, %v5502_v0 }
 0x139   :  { %v4630_v25 = vpop.f32.mrb[40].mxu0  ;;  %v4632_v26 = vpop.f32.mrb[40].mxu1 }
 0x13a   :  { %v3435_v49 = vpop.f32.mrb[41].mxu0  ;;  %v3561_v15 = vpop.f32.mrb[41].mxu1 }
 0x13b   :  { %v4642_v28 = vpop.f32.mrb[42].mxu0  ;;  %v4644_v45 = vpop.f32.mrb[42].mxu1 }
 0x13c   :  { %v3436_v21 = vpop.f32.mrb[43].mxu0  ;;  %v3562_v13 = vpop.f32.mrb[43].mxu1 }
 0x13d   :  { %v3970_v13 = vld [vmem:[%s5500_s0 + $0x210] sm:$0xff]  }
 0x13e   :  { %3678 = vmatmul.mubr.msk.bf16.gmra.mrb[148].mxu0 %vm251_vm2, %v3968_v1  ;;  %3804 = vmatmul.mubr.msk.bf16.gmra.mrb[148].mxu1 %vm251_vm2, %v3969_v27  ;;  %v3971_v1 = vld [vmem:[%s5500_s0 + $0x2f4] sm:$0xff]  }
 0x13f   :  { %3681 = vmatprep.mubr.msk.bf16.mxu0 %vm4011_vm0, %v5502_v0  ;;  %3807 = vmatprep.mubr.msk.bf16.mxu1 %vm4011_vm0, %v5502_v0 }
 0x141   :  { %v4654_v49 = vpop.f32.mrb[44].mxu0  ;;  %v4656_v15 = vpop.f32.mrb[44].mxu1 }
 0x142   :  { %v3439_v37 = vpop.f32.mrb[45].mxu0  ;;  %v3565_v21 = vpop.f32.mrb[45].mxu1 }
 0x143   :  { %v4666_v27 = vpop.f32.mrb[46].mxu0  ;;  %v4668_v60 = vpop.f32.mrb[46].mxu1 }
 0x144   :  { %v3440_v48 = vpop.f32.mrb[47].mxu0  ;;  %v3566_v43 = vpop.f32.mrb[47].mxu1 }
 0x145   :  { %v3972_v43 = vld [vmem:[%s5500_s0 + $0x218] sm:$0xff]  }
 0x146   :  { %3682 = vmatmul.mubr.msk.bf16.gmra.mrb[152].mxu0 %vm251_vm2, %v3970_v13  ;;  %3808 = vmatmul.mubr.msk.bf16.gmra.mrb[152].mxu1 %vm251_vm2, %v3971_v1  ;;  %v3973_v13 = vld [vmem:[%s5500_s0 + $0x2fc] sm:$0xff]  }
 0x147   :  { %3685 = vmatprep.mubr.msk.bf16.mxu0 %vm4011_vm0, %v5502_v0  ;;  %3811 = vmatprep.mubr.msk.bf16.mxu1 %vm4011_vm0, %v5502_v0 }
 0x149   :  { %v4678_v37 = vpop.f32.mrb[48].mxu0  ;;  %v4680_v21 = vpop.f32.mrb[48].mxu1 }
 0x14a   :  { %5569 = vst [vmem:[#allocation2_spill] sm:$0xff] %v4680_v21  ;;  %v3443_v55 = vpop.f32.mrb[49].mxu0  ;;  %v3569_v48 = vpop.f32.mrb[49].mxu1 }
 0x14b   :  { %v4690_v1 = vpop.f32.mrb[50].mxu0  ;;  %v4692_v36 = vpop.f32.mrb[50].mxu1 }
 0x14c   :  { %5570 = vst [vmem:[#allocation3_spill] sm:$0xff] %v4690_v1  ;;  %5571 = vst [vmem:[#allocation4_spill] sm:$0xff] %v4692_v36  ;;  %v3444_v24 = vpop.f32.mrb[51].mxu0  ;;  %v3570_v19 = vpop.f32.mrb[51].mxu1 }
 0x14d   :  { %v3974_v19 = vld [vmem:[%s5500_s0 + $0x220] sm:$0xff]  }
 0x14e   :  { %3686 = vmatmul.mubr.msk.bf16.gmra.mrb[156].mxu0 %vm251_vm2, %v3972_v43  ;;  %3812 = vmatmul.mubr.msk.bf16.gmra.mrb[156].mxu1 %vm251_vm2, %v3973_v13  ;;  %v3975_v43 = vld [vmem:[%s5500_s0 + $0x304] sm:$0xff]  }
 0x14f   :  { %3689 = vmatprep.mubr.msk.bf16.mxu0 %vm4011_vm0, %v5502_v0  ;;  %3815 = vmatprep.mubr.msk.bf16.mxu1 %vm4011_vm0, %v5502_v0 }
 0x151   :  { %v4702_v55 = vpop.f32.mrb[52].mxu0  ;;  %v4704_v48 = vpop.f32.mrb[52].mxu1 }
 0x152   :  { %5572 = vst [vmem:[#allocation5_spill] sm:$0xff] %v4702_v55  ;;  %5573 = vst [vmem:[#allocation6_spill] sm:$0xff] %v4704_v48  ;;  %v3447_v31 = vpop.f32.mrb[53].mxu0  ;;  %v3573_v24 = vpop.f32.mrb[53].mxu1  ;;  %v5635_v48 = vmax.f32 %v4390_v61, %v4392_v62 }
 0x153   :  { %v4714_v13 = vpop.f32.mrb[54].mxu0  ;;  %v4716_v12 = vpop.f32.mrb[54].mxu1  ;;  %v5576_v31 = vmov 0.0  }
 0x154   :  { %5574 = vst [vmem:[#allocation7_spill] sm:$0xff] %v4714_v13  ;;  %5575 = vst [vmem:[#allocation8_spill] sm:$0xff] %v4716_v12  ;;  %v3448_v63 = vpop.f32.mrb[55].mxu0  ;;  %v3574_v0 = vpop.f32.mrb[55].mxu1 }
 0x155   :  { %v3976_v0 = vld [vmem:[%s5500_s0 + $0x228] sm:$0xff]  }
 0x156   :  { %3690 = vmatmul.mubr.msk.bf16.gmra.mrb[160].mxu0 %vm251_vm2, %v3974_v19  ;;  %3816 = vmatmul.mubr.msk.bf16.gmra.mrb[160].mxu1 %vm251_vm2, %v3975_v43  ;;  %v3977_v19 = vld [vmem:[%s5500_s0 + $0x30c] sm:$0xff]  }
 0x157   :  { %3693 = vmatprep.mubr.msk.bf16.mxu0 %vm4011_vm0, %v5576_v31  ;;  %3819 = vmatprep.mubr.msk.bf16.mxu1 %vm4011_vm0, %v5576_v31 }
 0x159   :  { %v4726_v24 = vpop.f32.mrb[56].mxu0  ;;  %v4728_v3 = vpop.f32.mrb[56].mxu1 }
 0x15a   :  { %5577 = vst [vmem:[#allocation9_spill] sm:$0xff] %v4726_v24  ;;  %5578 = vst [vmem:[#allocation10_spill] sm:$0xff] %v4728_v3  ;;  %v3451_v7 = vpop.f32.mrb[57].mxu0  ;;  %v3577_v63 = vpop.f32.mrb[57].mxu1 }
 0x15b   :  { %v4738_v43 = vpop.f32.mrb[58].mxu0  ;;  %v4740_v12 = vpop.f32.mrb[58].mxu1 }
 0x15c   :  { %5579 = vst [vmem:[#allocation11_spill] sm:$0xff] %v4738_v43  ;;  %5580 = vst [vmem:[#allocation12_spill] sm:$0xff] %v4740_v12  ;;  %v3452_v55 = vpop.f32.mrb[59].mxu0  ;;  %v3578_v36 = vpop.f32.mrb[59].mxu1 }
 0x15d   :  { %v3978_v36 = vld [vmem:[%s5500_s0 + $0x230] sm:$0xff]  }
 0x15e   :  { %3694 = vmatmul.mubr.msk.bf16.gmra.mrb[164].mxu0 %vm251_vm2, %v3976_v0  ;;  %3820 = vmatmul.mubr.msk.bf16.gmra.mrb[164].mxu1 %vm251_vm2, %v3977_v19  ;;  %v3979_v0 = vld [vmem:[%s5500_s0 + $0x314] sm:$0xff]  }
 0x15f   :  { %3697 = vmatprep.mubr.msk.bf16.mxu0 %vm4011_vm0, %v5576_v31  ;;  %3823 = vmatprep.mubr.msk.bf16.mxu1 %vm4011_vm0, %v5576_v31 }
 0x161   :  { %v4750_v7 = vpop.f32.mrb[60].mxu0  ;;  %v4752_v63 = vpop.f32.mrb[60].mxu1 }
 0x162   :  { %5581 = vst [vmem:[#allocation13_spill] sm:$0xff] %v4750_v7  ;;  %5582 = vst [vmem:[#allocation14_spill] sm:$0xff] %v4752_v63  ;;  %v3455_v13 = vpop.f32.mrb[61].mxu0  ;;  %v3581_v55 = vpop.f32.mrb[61].mxu1 }
 0x163   :  { %v4762_v19 = vpop.f32.mrb[62].mxu0  ;;  %v4764_v12 = vpop.f32.mrb[62].mxu1 }
 0x164   :  { %5583 = vst [vmem:[#allocation15_spill] sm:$0xff] %v4762_v19  ;;  %5584 = vst [vmem:[#allocation16_spill] sm:$0xff] %v4764_v12  ;;  %v3456_v3 = vpop.f32.mrb[63].mxu0  ;;  %v3582_v24 = vpop.f32.mrb[63].mxu1 }
 0x165   :  { %v3980_v24 = vld [vmem:[%s5500_s0 + $0x238] sm:$0xff]  }
 0x166   :  { %3698 = vmatmul.mubr.msk.bf16.gmra.mrb[168].mxu0 %vm251_vm2, %v3978_v36  ;;  %3824 = vmatmul.mubr.msk.bf16.gmra.mrb[168].mxu1 %vm251_vm2, %v3979_v0  ;;  %v3981_v36 = vld [vmem:[%s5500_s0 + $0x31c] sm:$0xff]  }
 0x167   :  { %3701 = vmatprep.mubr.msk.bf16.mxu0 %vm4011_vm0, %v5576_v31  ;;  %3827 = vmatprep.mubr.msk.bf16.mxu1 %vm4011_vm0, %v5576_v31 }
 0x169   :  { %v4774_v13 = vpop.f32.mrb[64].mxu0  ;;  %v4776_v55 = vpop.f32.mrb[64].mxu1 }
 0x16a   :  { %5585 = vst [vmem:[#allocation17_spill] sm:$0xff] %v4774_v13  ;;  %5586 = vst [vmem:[#allocation18_spill] sm:$0xff] %v4776_v55  ;;  %v3459_v43 = vpop.f32.mrb[65].mxu0  ;;  %v3585_v3 = vpop.f32.mrb[65].mxu1 }
 0x16b   :  { %v4786_v0 = vpop.f32.mrb[66].mxu0  ;;  %v4788_v12 = vpop.f32.mrb[66].mxu1 }
 0x16c   :  { %5587 = vst [vmem:[#allocation19_spill] sm:$0xff] %v4786_v0  ;;  %5588 = vst [vmem:[#allocation20_spill] sm:$0xff] %v4788_v12  ;;  %v3460_v63 = vpop.f32.mrb[67].mxu0  ;;  %v3586_v7 = vpop.f32.mrb[67].mxu1 }
 0x16d   :  { %v3982_v7 = vld [vmem:[%s5500_s0 + $0x240] sm:$0xff]  }
 0x16e   :  { %3702 = vmatmul.mubr.msk.bf16.gmra.mrb[172].mxu0 %vm251_vm2, %v3980_v24  ;;  %3828 = vmatmul.mubr.msk.bf16.gmra.mrb[172].mxu1 %vm251_vm2, %v3981_v36  ;;  %v3983_v24 = vld [vmem:[%s5500_s0 + $0x324] sm:$0xff]  }
 0x16f   :  { %3705 = vmatprep.mubr.msk.bf16.mxu0 %vm4011_vm0, %v5576_v31  ;;  %3831 = vmatprep.mubr.msk.bf16.mxu1 %vm4011_vm0, %v5576_v31 }
 0x171   :  { %v4798_v43 = vpop.f32.mrb[68].mxu0  ;;  %v4800_v3 = vpop.f32.mrb[68].mxu1 }
 0x172   :  { %5589 = vst [vmem:[#allocation21_spill] sm:$0xff] %v4798_v43  ;;  %5590 = vst [vmem:[#allocation22_spill] sm:$0xff] %v4800_v3  ;;  %v3463_v19 = vpop.f32.mrb[69].mxu0  ;;  %v3589_v63 = vpop.f32.mrb[69].mxu1 }
 0x173   :  { %v4810_v36 = vpop.f32.mrb[70].mxu0  ;;  %v4812_v12 = vpop.f32.mrb[70].mxu1 }
 0x174   :  { %5591 = vst [vmem:[#allocation23_spill] sm:$0xff] %v4810_v36  ;;  %5592 = vst [vmem:[#allocation24_spill] sm:$0xff] %v4812_v12  ;;  %v3464_v55 = vpop.f32.mrb[71].mxu0  ;;  %v3590_v13 = vpop.f32.mrb[71].mxu1 }
 0x175   :  { %v3984_v13 = vld [vmem:[%s5500_s0 + $0x248] sm:$0xff]  }
 0x176   :  { %3706 = vmatmul.mubr.msk.bf16.gmra.mrb[176].mxu0 %vm251_vm2, %v3982_v7  ;;  %3832 = vmatmul.mubr.msk.bf16.gmra.mrb[176].mxu1 %vm251_vm2, %v3983_v24  ;;  %v3985_v7 = vld [vmem:[%s5500_s0 + $0x32c] sm:$0xff]  }
 0x177   :  { %3709 = vmatprep.mubr.msk.bf16.mxu0 %vm4011_vm0, %v5576_v31  ;;  %3835 = vmatprep.mubr.msk.bf16.mxu1 %vm4011_vm0, %v5576_v31 }
 0x179   :  { %v4822_v19 = vpop.f32.mrb[72].mxu0  ;;  %v4824_v63 = vpop.f32.mrb[72].mxu1 }
 0x17a   :  { %5593 = vst [vmem:[#allocation25_spill] sm:$0xff] %v4822_v19  ;;  %5594 = vst [vmem:[#allocation26_spill] sm:$0xff] %v4824_v63  ;;  %v3467_v0 = vpop.f32.mrb[73].mxu0  ;;  %v3593_v55 = vpop.f32.mrb[73].mxu1 }
 0x17b   :  { %v4834_v24 = vpop.f32.mrb[74].mxu0  ;;  %v4836_v12 = vpop.f32.mrb[74].mxu1 }
 0x17c   :  { %5595 = vst [vmem:[#allocation27_spill] sm:$0xff] %v4834_v24  ;;  %5596 = vst [vmem:[#allocation28_spill] sm:$0xff] %v4836_v12  ;;  %v3468_v3 = vpop.f32.mrb[75].mxu0  ;;  %v3594_v43 = vpop.f32.mrb[75].mxu1 }
 0x17d   :  { %v3986_v43 = vld [vmem:[%s5500_s0 + $0x250] sm:$0xff]  }
 0x17e   :  { %3710 = vmatmul.mubr.msk.bf16.gmra.mrb[180].mxu0 %vm251_vm2, %v3984_v13  ;;  %3836 = vmatmul.mubr.msk.bf16.gmra.mrb[180].mxu1 %vm251_vm2, %v3985_v7  ;;  %v3987_v13 = vld [vmem:[%s5500_s0 + $0x334] sm:$0xff]  }
 0x17f   :  { %3713 = vmatprep.mubr.msk.bf16.mxu0 %vm4011_vm0, %v5576_v31  ;;  %3839 = vmatprep.mubr.msk.bf16.mxu1 %vm4011_vm0, %v5576_v31 }
 0x181   :  { %v4846_v0 = vpop.f32.mrb[76].mxu0  ;;  %v4848_v55 = vpop.f32.mrb[76].mxu1 }
 0x182   :  { %5597 = vst [vmem:[#allocation29_spill] sm:$0xff] %v4846_v0  ;;  %5598 = vst [vmem:[#allocation30_spill] sm:$0xff] %v4848_v55  ;;  %v3471_v36 = vpop.f32.mrb[77].mxu0  ;;  %v3597_v3 = vpop.f32.mrb[77].mxu1 }
 0x183   :  { %v4858_v7 = vpop.f32.mrb[78].mxu0  ;;  %v4860_v12 = vpop.f32.mrb[78].mxu1 }
 0x184   :  { %5599 = vst [vmem:[#allocation31_spill] sm:$0xff] %v4858_v7  ;;  %5600 = vst [vmem:[#allocation32_spill] sm:$0xff] %v4860_v12  ;;  %v3472_v63 = vpop.f32.mrb[79].mxu0  ;;  %v3598_v19 = vpop.f32.mrb[79].mxu1 }
 0x185   :  { %v3988_v19 = vld [vmem:[%s5500_s0 + $0x258] sm:$0xff]  }
 0x186   :  { %3714 = vmatmul.mubr.msk.bf16.gmra.mrb[184].mxu0 %vm251_vm2, %v3986_v43  ;;  %3840 = vmatmul.mubr.msk.bf16.gmra.mrb[184].mxu1 %vm251_vm2, %v3987_v13  ;;  %v3989_v43 = vld [vmem:[%s5500_s0 + $0x33c] sm:$0xff]  }
 0x187   :  { %3717 = vmatprep.mubr.msk.bf16.mxu0 %vm4011_vm0, %v5576_v31  ;;  %3843 = vmatprep.mubr.msk.bf16.mxu1 %vm4011_vm0, %v5576_v31 }
 0x189   :  { %v4870_v36 = vpop.f32.mrb[80].mxu0  ;;  %v4872_v3 = vpop.f32.mrb[80].mxu1 }
 0x18a   :  { %5601 = vst [vmem:[#allocation33_spill] sm:$0xff] %v4870_v36  ;;  %5602 = vst [vmem:[#allocation34_spill] sm:$0xff] %v4872_v3  ;;  %v3475_v24 = vpop.f32.mrb[81].mxu0  ;;  %v3601_v63 = vpop.f32.mrb[81].mxu1 }
 0x18b   :  { %v4882_v13 = vpop.f32.mrb[82].mxu0  ;;  %v4884_v12 = vpop.f32.mrb[82].mxu1 }
 0x18c   :  { %5603 = vst [vmem:[#allocation35_spill] sm:$0xff] %v4882_v13  ;;  %5604 = vst [vmem:[#allocation36_spill] sm:$0xff] %v4884_v12  ;;  %v3476_v55 = vpop.f32.mrb[83].mxu0  ;;  %v3602_v0 = vpop.f32.mrb[83].mxu1 }
 0x18d   :  { %v3990_v0 = vld [vmem:[%s5500_s0 + $0x260] sm:$0xff]  }
 0x18e   :  { %3718 = vmatmul.mubr.msk.bf16.gmra.mrb[188].mxu0 %vm251_vm2, %v3988_v19  ;;  %3844 = vmatmul.mubr.msk.bf16.gmra.mrb[188].mxu1 %vm251_vm2, %v3989_v43  ;;  %v3991_v19 = vld [vmem:[%s5500_s0 + $0x344] sm:$0xff]  }
 0x18f   :  { %3721 = vmatprep.mubr.msk.bf16.mxu0 %vm4011_vm0, %v5576_v31  ;;  %3847 = vmatprep.mubr.msk.bf16.mxu1 %vm4011_vm0, %v5576_v31 }
 0x191   :  { %v4894_v24 = vpop.f32.mrb[84].mxu0  ;;  %v4896_v63 = vpop.f32.mrb[84].mxu1 }
 0x192   :  { %5605 = vst [vmem:[#allocation37_spill] sm:$0xff] %v4894_v24  ;;  %5606 = vst [vmem:[#allocation38_spill] sm:$0xff] %v4896_v63  ;;  %v3479_v7 = vpop.f32.mrb[85].mxu0  ;;  %v3605_v55 = vpop.f32.mrb[85].mxu1 }
 0x193   :  { %v4906_v43 = vpop.f32.mrb[86].mxu0  ;;  %v4908_v12 = vpop.f32.mrb[86].mxu1 }
 0x194   :  { %5607 = vst [vmem:[#allocation39_spill] sm:$0xff] %v4906_v43  ;;  %5608 = vst [vmem:[#allocation40_spill] sm:$0xff] %v4908_v12  ;;  %v3480_v3 = vpop.f32.mrb[87].mxu0  ;;  %v3606_v36 = vpop.f32.mrb[87].mxu1 }
 0x195   :  { %v3992_v36 = vld [vmem:[%s5500_s0 + $0x268] sm:$0xff]  }
 0x196   :  { %3722 = vmatmul.mubr.msk.bf16.gmra.mrb[192].mxu0 %vm251_vm2, %v3990_v0  ;;  %3848 = vmatmul.mubr.msk.bf16.gmra.mrb[192].mxu1 %vm251_vm2, %v3991_v19  ;;  %v3993_v0 = vld [vmem:[%s5500_s0 + $0x34c] sm:$0xff]  }
 0x197   :  { %3725 = vmatprep.mubr.msk.bf16.mxu0 %vm4011_vm0, %v5576_v31  ;;  %3851 = vmatprep.mubr.msk.bf16.mxu1 %vm4011_vm0, %v5576_v31 }
 0x199   :  { %v4918_v7 = vpop.f32.mrb[88].mxu0  ;;  %v4920_v55 = vpop.f32.mrb[88].mxu1 }
 0x19a   :  { %5609 = vst [vmem:[#allocation41_spill] sm:$0xff] %v4918_v7  ;;  %5610 = vst [vmem:[#allocation42_spill] sm:$0xff] %v4920_v55  ;;  %v3483_v13 = vpop.f32.mrb[89].mxu0  ;;  %v3609_v3 = vpop.f32.mrb[89].mxu1 }
 0x19b   :  { %v4930_v19 = vpop.f32.mrb[90].mxu0  ;;  %v4932_v12 = vpop.f32.mrb[90].mxu1 }
 0x19c   :  { %5611 = vst [vmem:[#allocation43_spill] sm:$0xff] %v4930_v19  ;;  %5612 = vst [vmem:[#allocation44_spill] sm:$0xff] %v4932_v12  ;;  %v3484_v63 = vpop.f32.mrb[91].mxu0  ;;  %v3610_v24 = vpop.f32.mrb[91].mxu1 }
 0x19d   :  { %v3994_v24 = vld [vmem:[%s5500_s0 + $0x270] sm:$0xff]  }
 0x19e   :  { %3726 = vmatmul.mubr.msk.bf16.gmra.mrb[196].mxu0 %vm251_vm2, %v3992_v36  ;;  %3852 = vmatmul.mubr.msk.bf16.gmra.mrb[196].mxu1 %vm251_vm2, %v3993_v0  ;;  %v3995_v36 = vld [vmem:[%s5500_s0 + $0x354] sm:$0xff]  }
 0x19f   :  { %3729 = vmatprep.mubr.msk.bf16.mxu0 %vm4011_vm0, %v5576_v31  ;;  %3855 = vmatprep.mubr.msk.bf16.mxu1 %vm4011_vm0, %v5576_v31 }
 0x1a1   :  { %v4942_v13 = vpop.f32.mrb[92].mxu0  ;;  %v4944_v3 = vpop.f32.mrb[92].mxu1 }
 0x1a2   :  { %5613 = vst [vmem:[#allocation45_spill] sm:$0xff] %v4942_v13  ;;  %5614 = vst [vmem:[#allocation46_spill] sm:$0xff] %v4944_v3  ;;  %v3487_v43 = vpop.f32.mrb[93].mxu0  ;;  %v3613_v63 = vpop.f32.mrb[93].mxu1 }
 0x1a3   :  { %v4954_v0 = vpop.f32.mrb[94].mxu0  ;;  %v4956_v12 = vpop.f32.mrb[94].mxu1 }
 0x1a4   :  { %5615 = vst [vmem:[#allocation47_spill] sm:$0xff] %v4954_v0  ;;  %5616 = vst [vmem:[#allocation48_spill] sm:$0xff] %v4956_v12  ;;  %v3488_v55 = vpop.f32.mrb[95].mxu0  ;;  %v3614_v7 = vpop.f32.mrb[95].mxu1 }
 0x1a5   :  { %v3996_v7 = vld [vmem:[%s5500_s0 + $0x278] sm:$0xff]  }
 0x1a6   :  { %3730 = vmatmul.mubr.msk.bf16.gmra.mrb[200].mxu0 %vm251_vm2, %v3994_v24  ;;  %3856 = vmatmul.mubr.msk.bf16.gmra.mrb[200].mxu1 %vm251_vm2, %v3995_v36  ;;  %v3997_v24 = vld [vmem:[%s5500_s0 + $0x35c] sm:$0xff]  }
 0x1a7   :  { %3733 = vmatprep.mubr.msk.bf16.mxu0 %vm4011_vm0, %v5576_v31  ;;  %3859 = vmatprep.mubr.msk.bf16.mxu1 %vm4011_vm0, %v5576_v31 }
 0x1a9   :  { %v4966_v43 = vpop.f32.mrb[96].mxu0  ;;  %v4968_v63 = vpop.f32.mrb[96].mxu1 }
 0x1aa   :  { %5617 = vst [vmem:[#allocation49_spill] sm:$0xff] %v4966_v43  ;;  %5618 = vst [vmem:[#allocation50_spill] sm:$0xff] %v4968_v63  ;;  %v3491_v19 = vpop.f32.mrb[97].mxu0  ;;  %v3617_v55 = vpop.f32.mrb[97].mxu1 }
 0x1ab   :  { %v4978_v36 = vpop.f32.mrb[98].mxu0  ;;  %v4980_v12 = vpop.f32.mrb[98].mxu1 }
 0x1ac   :  { %5619 = vst [vmem:[#allocation51_spill] sm:$0xff] %v4978_v36  ;;  %5620 = vst [vmem:[#allocation52_spill] sm:$0xff] %v4980_v12  ;;  %v3492_v3 = vpop.f32.mrb[99].mxu0  ;;  %v3618_v13 = vpop.f32.mrb[99].mxu1 }
 0x1ad   :  { %v3998_v13 = vld [vmem:[%s5500_s0 + $0x280] sm:$0xff]  }
 0x1ae   :  { %3734 = vmatmul.mubr.msk.bf16.gmra.mrb[204].mxu0 %vm251_vm2, %v3996_v7  ;;  %3860 = vmatmul.mubr.msk.bf16.gmra.mrb[204].mxu1 %vm251_vm2, %v3997_v24  ;;  %v3999_v7 = vld [vmem:[%s5500_s0 + $0x364] sm:$0xff]  }
 0x1af   :  { %3737 = vmatprep.mubr.msk.bf16.mxu0 %vm4011_vm0, %v5576_v31  ;;  %3863 = vmatprep.mubr.msk.bf16.mxu1 %vm4011_vm0, %v5576_v31 }
 0x1b1   :  { %v4990_v19 = vpop.f32.mrb[100].mxu0  ;;  %v4992_v55 = vpop.f32.mrb[100].mxu1 }
 0x1b2   :  { %5621 = vst [vmem:[#allocation53_spill] sm:$0xff] %v4990_v19  ;;  %5622 = vst [vmem:[#allocation54_spill] sm:$0xff] %v4992_v55  ;;  %v3495_v0 = vpop.f32.mrb[101].mxu0  ;;  %v3621_v3 = vpop.f32.mrb[101].mxu1 }
 0x1b3   :  { %v5002_v24 = vpop.f32.mrb[102].mxu0  ;;  %v5004_v12 = vpop.f32.mrb[102].mxu1 }
 0x1b4   :  { %5623 = vst [vmem:[#allocation55_spill] sm:$0xff] %v5002_v24  ;;  %5624 = vst [vmem:[#allocation56_spill] sm:$0xff] %v5004_v12  ;;  %v3496_v63 = vpop.f32.mrb[103].mxu0  ;;  %v3622_v43 = vpop.f32.mrb[103].mxu1 }
 0x1b5   :  { %v4000_v43 = vld [vmem:[%s5500_s0 + $0x288] sm:$0xff]  }
 0x1b6   :  { %3738 = vmatmul.mubr.msk.bf16.gmra.mrb[208].mxu0 %vm251_vm2, %v3998_v13  ;;  %3864 = vmatmul.mubr.msk.bf16.gmra.mrb[208].mxu1 %vm251_vm2, %v3999_v7  ;;  %v4001_v13 = vld [vmem:[%s5500_s0 + $0x36c] sm:$0xff]  }
 0x1b7   :  { %3741 = vmatprep.mubr.msk.bf16.mxu0 %vm4011_vm0, %v5576_v31  ;;  %3867 = vmatprep.mubr.msk.bf16.mxu1 %vm4011_vm0, %v5576_v31 }
 0x1b9   :  { %v5014_v0 = vpop.f32.mrb[104].mxu0  ;;  %v5016_v3 = vpop.f32.mrb[104].mxu1 }
 0x1ba   :  { %5625 = vst [vmem:[#allocation57_spill] sm:$0xff] %v5014_v0  ;;  %5626 = vst [vmem:[#allocation58_spill] sm:$0xff] %v5016_v3  ;;  %v3499_v36 = vpop.f32.mrb[105].mxu0  ;;  %v3625_v63 = vpop.f32.mrb[105].mxu1 }
 0x1bb   :  { %v5026_v7 = vpop.f32.mrb[106].mxu0  ;;  %v5028_v12 = vpop.f32.mrb[106].mxu1 }
 0x1bc   :  { %5627 = vst [vmem:[#allocation59_spill] sm:$0xff] %v5026_v7  ;;  %5628 = vst [vmem:[#allocation60_spill] sm:$0xff] %v5028_v12  ;;  %v3500_v55 = vpop.f32.mrb[107].mxu0  ;;  %v3626_v19 = vpop.f32.mrb[107].mxu1 }
 0x1bd   :  { %v4002_v19 = vld [vmem:[%s5500_s0 + $0x290] sm:$0xff]  }
 0x1be   :  { %3742 = vmatmul.mubr.msk.bf16.gmra.mrb[212].mxu0 %vm251_vm2, %v4000_v43  ;;  %3868 = vmatmul.mubr.msk.bf16.gmra.mrb[212].mxu1 %vm251_vm2, %v4001_v13  ;;  %v4003_v43 = vld [vmem:[%s5500_s0 + $0x374] sm:$0xff]  }
 0x1bf   :  { %3745 = vmatprep.mubr.msk.bf16.mxu0 %vm4011_vm0, %v5576_v31  ;;  %3871 = vmatprep.mubr.msk.bf16.mxu1 %vm4011_vm0, %v5576_v31 }
 0x1c1   :  { %v5038_v36 = vpop.f32.mrb[108].mxu0  ;;  %v5040_v63 = vpop.f32.mrb[108].mxu1 }
 0x1c2   :  { %5629 = vst [vmem:[#allocation61_spill] sm:$0xff] %v5038_v36  ;;  %5630 = vst [vmem:[#allocation62_spill] sm:$0xff] %v5040_v63  ;;  %v3503_v24 = vpop.f32.mrb[109].mxu0  ;;  %v3629_v55 = vpop.f32.mrb[109].mxu1  ;;  %v5636_v36 = vmax.f32 %v4402_v5, %v4404_v6 }
 0x1c3   :  { %v5050_v13 = vpop.f32.mrb[110].mxu0  ;;  %v5052_v12 = vpop.f32.mrb[110].mxu1 }
 0x1c4   :  { %5631 = vst [vmem:[#allocation63_spill] sm:$0xff] %v5050_v13  ;;  %5632 = vst [vmem:[#allocation64_spill] sm:$0xff] %v5052_v12  ;;  %v3504_v3 = vpop.f32.mrb[111].mxu0  ;;  %v3630_v0 = vpop.f32.mrb[111].mxu1 }
 0x1c5   :  { %v4004_v0 = vld [vmem:[%s5500_s0 + $0x298] sm:$0xff]  }
 0x1c6   :  { %3746 = vmatmul.mubr.msk.bf16.gmra.mrb[216].mxu0 %vm251_vm2, %v4002_v19  ;;  %3872 = vmatmul.mubr.msk.bf16.gmra.mrb[216].mxu1 %vm251_vm2, %v4003_v43  ;;  %v4005_v19 = vld [vmem:[%s5500_s0 + $0x37c] sm:$0xff]  }
 0x1c7   :  { %3749 = vmatprep.mubr.msk.bf16.mxu0 %vm4011_vm0, %v5576_v31  ;;  %3875 = vmatprep.mubr.msk.bf16.mxu1 %vm4011_vm0, %v5576_v31 }
 0x1c9   :  { %v5062_v24 = vpop.f32.mrb[112].mxu0  ;;  %v5064_v55 = vpop.f32.mrb[112].mxu1 }
 0x1ca   :  { %5633 = vst [vmem:[#allocation65_spill] sm:$0xff] %v5062_v24  ;;  %5634 = vst [vmem:[#allocation66_spill] sm:$0xff] %v5064_v55  ;;  %v3507_v7 = vpop.f32.mrb[113].mxu0  ;;  %v3633_v3 = vpop.f32.mrb[113].mxu1 }
 0x1cb   :  { %v604_v43 = vpop.f32.mrb[114].mxu0  ;;  %v1156_v12 = vpop.f32.mrb[114].mxu1 }
 0x1cc   :  { %v3508_v13 = vpop.f32.mrb[115].mxu0  ;;  %v3634_v63 = vpop.f32.mrb[115].mxu1 }
 0x1cd   :  { %v4006_v63 = vld [vmem:[%s5500_s0 + $0x2a0] sm:$0xff]  }
 0x1ce   :  { %3750 = vmatmul.mubr.msk.bf16.gmra.mrb[220].mxu0 %vm251_vm2, %v4004_v0  ;;  %3876 = vmatmul.mubr.msk.bf16.gmra.mrb[220].mxu1 %vm251_vm2, %v4005_v19  ;;  %v4007_v13 = vld [vmem:[%s5500_s0 + $0x384] sm:$0xff]  }
 0x1cf   :  { %3753 = vmatprep.mubr.msk.bf16.mxu0 %vm4011_vm0, %v5576_v31  ;;  %3879 = vmatprep.mubr.msk.bf16.mxu1 %vm4011_vm0, %v5576_v31 }
 0x1d1   :  { %v1538_v7 = vpop.f32.mrb[116].mxu0  ;;  %v2147_v3 = vpop.f32.mrb[116].mxu1 }
 0x1d2   :  { %v1768_v55 = vmax.f32 %v5635_v48, %v1538_v7  ;;  %v3647_v43 = vpop.f32.mrb[117].mxu0  ;;  %v3773_v12 = vpop.f32.mrb[117].mxu1  ;;  %v4009_v7 = vld [vmem:[%s5500_s0 + $0x38c] ss:$0 sps:$4 sm:$0xff]  }
 0x1d3   :  { %v1541_v0 = vpop.f32.mrb[118].mxu0  ;;  %v2150_v19 = vpop.f32.mrb[118].mxu1 }
 0x1d4   :  { %v2377_v24 = vmax.f32 %v1768_v55, %v2147_v3  ;;  %v1769_v1 = vmax.f32 %v5636_v36, %v1541_v0  ;;  %v3648_v21 = vpop.f32.mrb[119].mxu0  ;;  %v3774_v61 = vpop.f32.mrb[119].mxu1 }
 0x1d6   :  { %v3190_v62 = vpack.c.bf16 %v2377_v24, %v2377_v24  ;;  %v2378_v48 = vmax.f32 %v1769_v1, %v2150_v19  ;;  %3754 = vmatmul.mubr.msk.bf16.gmra.mrb[224].mxu0 %vm251_vm2, %v4006_v63  ;;  %3880 = vmatmul.mubr.msk.bf16.gmra.mrb[224].mxu1 %vm251_vm2, %v4007_v13  ;;  %v5637_v1 = vmax.f32 %v4414_v10, %v4416_v11 }
 0x1d7   :  { %3757 = vmatprep.mubr.msk.bf16.mxu0 %vm4011_vm0, %v5576_v31  ;;  %3883 = vmatprep.mubr.msk.bf16.mxu1 %vm4011_vm0, %v5576_v31  ;;  %v4008_v31 = vld [vmem:[%s5500_s0 + $0x2a8] ss:$0 sps:$4 sm:$0xff]   ;;  %v5638_v63 = vmax.f32 %v4426_v17, %v4428_v18  ;;  %v5639_v17 = vmax.f32 %v4438_v22, %v4440_v23 }
 0x1d8   :  { %2664 = vst.msk [vmem:[%s5501_s2] sm:$0xf] %vm2663_vm3, %v3190_v62  ;;  %v3191_v5 = vpack.c.bf16 %v2378_v48, %v2378_v48 }
 0x1d9   :  { %v1546_v6 = vpop.f32.mrb[120].mxu0  ;;  %v2155_v21 = vpop.f32.mrb[120].mxu1 }
 0x1da   :  { %2665 = vst.msk [vmem:[%s5501_s2 + $0x4] sm:$0xf] %vm2663_vm3, %v3191_v5  ;;  %v1770_v36 = vmax.f32 %v5637_v1, %v1546_v6  ;;  %v3651_v24 = vpop.f32.mrb[121].mxu0  ;;  %v3777_v55 = vpop.f32.mrb[121].mxu1 }
 0x1db   :  { %v1549_v3 = vpop.f32.mrb[122].mxu0  ;;  %v2158_v43 = vpop.f32.mrb[122].mxu1  ;;  %v5640_v24 = vmax.f32 %v4450_v29, %v4452_v30  ;;  %v5641_v29 = vmax.f32 %v4462_v34, %v4464_v35 }
 0x1dc   :  { %v2379_v12 = vmax.f32 %v1770_v36, %v2155_v21  ;;  %v1771_v13 = vmax.f32 %v5638_v63, %v1549_v3  ;;  %v3652_v0 = vpop.f32.mrb[123].mxu0  ;;  %v3778_v10 = vpop.f32.mrb[123].mxu1 }
 0x1de   :  { %v3192_v11 = vpack.c.bf16 %v2379_v12, %v2379_v12  ;;  %v2380_v19 = vmax.f32 %v1771_v13, %v2158_v43  ;;  %3758 = vmatmul.mubr.msk.bf16.gmra.mrb[228].mxu0 %vm251_vm2, %v4008_v31  ;;  %3884 = vmatmul.mubr.msk.bf16.gmra.mrb[228].mxu1 %vm251_vm2, %v4009_v7 }
 0x1e0   :  { %2666 = vst.msk [vmem:[%s5501_s2 + $0x8] sm:$0xf] %vm2663_vm3, %v3192_v11  ;;  %v3193_v61 = vpack.c.bf16 %v2380_v19, %v2380_v19  ;;  %v5642_v19 = vmax.f32 %v4474_v41, %v4476_v42  ;;  %v5643_v41 = vmax.f32 %v4486_v46, %v4488_v47 }
 0x1e1   :  { %v1554_v62 = vpop.f32.mrb[124].mxu0  ;;  %v2163_v48 = vpop.f32.mrb[124].mxu1 }
 0x1e2   :  { %2667 = vst.msk [vmem:[%s5501_s2 + $0xc] sm:$0xf] %vm2663_vm3, %v3193_v61  ;;  %v1772_v18 = vmax.f32 %v5639_v17, %v1554_v62  ;;  %v3655_v5 = vpop.f32.mrb[125].mxu0  ;;  %v3781_v6 = vpop.f32.mrb[125].mxu1 }
 0x1e3   :  { %v1557_v21 = vpop.f32.mrb[126].mxu0  ;;  %v2166_v1 = vpop.f32.mrb[126].mxu1 }
 0x1e4   :  { %v2381_v36 = vmax.f32 %v1772_v18, %v2163_v48  ;;  %v1773_v55 = vmax.f32 %v5640_v24, %v1557_v21  ;;  %v3656_v31 = vpop.f32.mrb[127].mxu0  ;;  %v3782_v7 = vpop.f32.mrb[127].mxu1 }
 0x1e6   :  { %v3194_v3 = vpack.c.bf16 %v2381_v36, %v2381_v36  ;;  %v2382_v43 = vmax.f32 %v1773_v55, %v2166_v1  ;;  %v5644_v55 = vmax.f32 %v4498_v53, %v4500_v54  ;;  %v5645_v53 = vmax.f32 %v4510_v58, %v4512_v59 }
 0x1e8   :  { %2668 = vst.msk [vmem:[%s5501_s2 + $0x10] sm:$0xf] %vm2663_vm3, %v3194_v3  ;;  %v3195_v22 = vpack.c.bf16 %v2382_v43, %v2382_v43 }
 0x1e9   :  { %v1562_v23 = vpop.f32.mrb[128].mxu0  ;;  %v2171_v12 = vpop.f32.mrb[128].mxu1 }
 0x1ea   :  { %2669 = vst.msk [vmem:[%s5501_s2 + $0x14] sm:$0xf] %vm2663_vm3, %v3195_v22  ;;  %v1774_v30 = vmax.f32 %v5641_v29, %v1562_v23  ;;  %v3659_v63 = vpop.f32.mrb[129].mxu0  ;;  %v3785_v13 = vpop.f32.mrb[129].mxu1 }
 0x1eb   :  { %v1565_v0 = vpop.f32.mrb[130].mxu0  ;;  %v2174_v10 = vpop.f32.mrb[130].mxu1 }
 0x1ec   :  { %v2383_v11 = vmax.f32 %v1774_v30, %v2171_v12  ;;  %v1775_v61 = vmax.f32 %v5642_v19, %v1565_v0  ;;  %v3660_v62 = vpop.f32.mrb[131].mxu0  ;;  %v3786_v48 = vpop.f32.mrb[131].mxu1  ;;  %v5646_v0 = vmax.f32 %v4522_v8, %v4524_v9  ;;  %v5647_v8 = vmax.f32 %v4534_v16, %v4536_v20 }
 0x1ee   :  { %v3196_v17 = vpack.c.bf16 %v2383_v11, %v2383_v11  ;;  %v2384_v18 = vmax.f32 %v1775_v61, %v2174_v10 }
 0x1f0   :  { %2670 = vst.msk [vmem:[%s5501_s2 + $0x18] sm:$0xf] %vm2663_vm3, %v3196_v17  ;;  %v3197_v34 = vpack.c.bf16 %v2384_v18, %v2384_v18 }
 0x1f1   :  { %v1570_v35 = vpop.f32.mrb[132].mxu0  ;;  %v2179_v5 = vpop.f32.mrb[132].mxu1 }
 0x1f2   :  { %2671 = vst.msk [vmem:[%s5501_s2 + $0x1c] sm:$0xf] %vm2663_vm3, %v3197_v34  ;;  %v1776_v42 = vmax.f32 %v5643_v41, %v1570_v35  ;;  %v3663_v6 = vpop.f32.mrb[133].mxu0  ;;  %v3789_v21 = vpop.f32.mrb[133].mxu1  ;;  %v5648_v41 = vmax.f32 %v4546_v32, %v4548_v33  ;;  %v5649_v32 = vmax.f32 %v4558_v40, %v4560_v44 }
 0x1f3   :  { %v1573_v1 = vpop.f32.mrb[134].mxu0  ;;  %v2182_v36 = vpop.f32.mrb[134].mxu1 }
 0x1f4   :  { %v2385_v24 = vmax.f32 %v1776_v42, %v2179_v5  ;;  %v1777_v31 = vmax.f32 %v5644_v55, %v1573_v1  ;;  %v3664_v7 = vpop.f32.mrb[135].mxu0  ;;  %v3790_v3 = vpop.f32.mrb[135].mxu1 }
 0x1f6   :  { %v3198_v43 = vpack.c.bf16 %v2385_v24, %v2385_v24  ;;  %v2386_v22 = vmax.f32 %v1777_v31, %v2182_v36 }
 0x1f8   :  { %2672 = vst.msk [vmem:[%s5501_s2 + $0x20] sm:$0xf] %vm2663_vm3, %v3198_v43  ;;  %v3199_v46 = vpack.c.bf16 %v2386_v22, %v2386_v22  ;;  %v5650_v22 = vmax.f32 %v4570_v56, %v4572_v57  ;;  %v5651_v56 = vmax.f32 %v4582_v4, %v4584_v14 }
 0x1f9   :  { %v1578_v47 = vpop.f32.mrb[136].mxu0  ;;  %v2187_v23 = vpop.f32.mrb[136].mxu1 }
 0x1fa   :  { %2673 = vst.msk [vmem:[%s5501_s2 + $0x24] sm:$0xf] %vm2663_vm3, %v3199_v46  ;;  %v1778_v54 = vmax.f32 %v5645_v53, %v1578_v47  ;;  %v3667_v12 = vpop.f32.mrb[137].mxu0  ;;  %v3793_v29 = vpop.f32.mrb[137].mxu1 }
 0x1fb   :  { %v1581_v30 = vpop.f32.mrb[138].mxu0  ;;  %v2190_v63 = vpop.f32.mrb[138].mxu1 }
 0x1fc   :  { %v2387_v13 = vmax.f32 %v1778_v54, %v2187_v23  ;;  %v1779_v10 = vmax.f32 %v5646_v0, %v1581_v30  ;;  %v3668_v11 = vpop.f32.mrb[139].mxu0  ;;  %v3794_v19 = vpop.f32.mrb[139].mxu1 }
 0x1fe   :  { %v3200_v61 = vpack.c.bf16 %v2387_v13, %v2387_v13  ;;  %v2388_v62 = vmax.f32 %v1779_v10, %v2190_v63  ;;  %v5652_v10 = vmax.f32 %v4594_v38, %v4596_v39  ;;  %v5653_v38 = vmax.f32 %v4606_v52, %v4608_v2 }
 0x200   :  { %2674 = vst.msk [vmem:[%s5501_s2 + $0x28] sm:$0xf] %vm2663_vm3, %v3200_v61  ;;  %v3201_v58 = vpack.c.bf16 %v2388_v62, %v2388_v62 }
 0x201   :  { %v1586_v59 = vpop.f32.mrb[140].mxu0  ;;  %v2195_v48 = vpop.f32.mrb[140].mxu1 }
 0x202   :  { %2675 = vst.msk [vmem:[%s5501_s2 + $0x2c] sm:$0xf] %vm2663_vm3, %v3201_v58  ;;  %v1780_v9 = vmax.f32 %v5647_v8, %v1586_v59  ;;  %v3671_v17 = vpop.f32.mrb[141].mxu0  ;;  %v3797_v18 = vpop.f32.mrb[141].mxu1 }
 0x203   :  { %v1589_v34 = vpop.f32.mrb[142].mxu0  ;;  %v2198_v35 = vpop.f32.mrb[142].mxu1 }
 0x204   :  { %v2389_v5 = vmax.f32 %v1780_v9, %v2195_v48  ;;  %v1781_v42 = vmax.f32 %v5648_v41, %v1589_v34  ;;  %v3672_v6 = vpop.f32.mrb[143].mxu0  ;;  %v3798_v21 = vpop.f32.mrb[143].mxu1  ;;  %v5654_v34 = vmax.f32 %v4618_v50, %v4620_v51  ;;  %v5655_v50 = vmax.f32 %v4630_v25, %v4632_v26 }
 0x206   :  { %v3202_v1 = vpack.c.bf16 %v2389_v5, %v2389_v5  ;;  %v2390_v36 = vmax.f32 %v1781_v42, %v2198_v35 }
 0x208   :  { %2676 = vst.msk [vmem:[%s5501_s2 + $0x30] sm:$0xf] %vm2663_vm3, %v3202_v1  ;;  %v3203_v16 = vpack.c.bf16 %v2390_v36, %v2390_v36 }
 0x209   :  { %v1594_v20 = vpop.f32.mrb[144].mxu0  ;;  %v2203_v24 = vpop.f32.mrb[144].mxu1 }
 0x20a   :  { %2677 = vst.msk [vmem:[%s5501_s2 + $0x34] sm:$0xf] %vm2663_vm3, %v3203_v16  ;;  %v1782_v33 = vmax.f32 %v5649_v32, %v1594_v20  ;;  %v3675_v55 = vpop.f32.mrb[145].mxu0  ;;  %v3801_v31 = vpop.f32.mrb[145].mxu1  ;;  %v5656_v32 = vmax.f32 %v4642_v28, %v4644_v45  ;;  %v5657_v45 = vmax.f32 %v4654_v49, %v4656_v15 }
 0x20b   :  { %v1597_v7 = vpop.f32.mrb[146].mxu0  ;;  %v2206_v3 = vpop.f32.mrb[146].mxu1 }
 0x20c   :  { %v2391_v43 = vmax.f32 %v1782_v33, %v2203_v24  ;;  %v1783_v46 = vmax.f32 %v5650_v22, %v1597_v7  ;;  %v3676_v47 = vpop.f32.mrb[147].mxu0  ;;  %v3802_v23 = vpop.f32.mrb[147].mxu1 }
 0x20e   :  { %v3204_v53 = vpack.c.bf16 %v2391_v43, %v2391_v43  ;;  %v2392_v54 = vmax.f32 %v1783_v46, %v2206_v3 }
 0x210   :  { %2678 = vst.msk [vmem:[%s5501_s2 + $0x38] sm:$0xf] %vm2663_vm3, %v3204_v53  ;;  %v3205_v40 = vpack.c.bf16 %v2392_v54, %v2392_v54  ;;  %v5658_v54 = vmax.f32 %v4666_v27, %v4668_v60  ;;  %v5659_v60 = vld [vmem:[#allocation2_spill] sm:$0xff] }
 0x211   :  { %v1602_v44 = vpop.f32.mrb[148].mxu0  ;;  %v2211_v12 = vpop.f32.mrb[148].mxu1  ;;  %v5660_v27 = vmax.f32 %v4678_v37, %v5659_v60 }
 0x212   :  { %2679 = vst.msk [vmem:[%s5501_s2 + $0x3c] sm:$0xf] %vm2663_vm3, %v3205_v40  ;;  %v1784_v57 = vmax.f32 %v5651_v56, %v1602_v44  ;;  %v3679_v29 = vpop.f32.mrb[149].mxu0  ;;  %v3805_v30 = vpop.f32.mrb[149].mxu1 }
 0x213   :  { %v1605_v63 = vpop.f32.mrb[150].mxu0  ;;  %v2214_v13 = vpop.f32.mrb[150].mxu1 }
 0x214   :  { %v2393_v0 = vmax.f32 %v1784_v57, %v2211_v12  ;;  %v1785_v11 = vmax.f32 %v5652_v10, %v1605_v63  ;;  %v3680_v19 = vpop.f32.mrb[151].mxu0  ;;  %v3806_v61 = vpop.f32.mrb[151].mxu1 }
 0x215   :  { %v5661_v19 = vld [vmem:[#allocation3_spill] sm:$0xff]  ;;  %v5662_v61 = vld [vmem:[#allocation4_spill] sm:$0xff] }
 0x216   :  { %v3206_v62 = vpack.c.bf16 %v2393_v0, %v2393_v0  ;;  %v2394_v58 = vmax.f32 %v1785_v11, %v2214_v13 }
 0x218   :  { %2680 = vst.msk [vmem:[%s5501_s2 + $0x40] sm:$0xf] %vm2663_vm3, %v3206_v62  ;;  %v3207_v4 = vpack.c.bf16 %v2394_v58, %v2394_v58  ;;  %v5663_v62 = vmax.f32 %v5661_v19, %v5662_v61 }
 0x219   :  { %v1610_v14 = vpop.f32.mrb[152].mxu0  ;;  %v2219_v59 = vpop.f32.mrb[152].mxu1 }
 0x21a   :  { %2681 = vst.msk [vmem:[%s5501_s2 + $0x44] sm:$0xf] %vm2663_vm3, %v3207_v4  ;;  %v1786_v39 = vmax.f32 %v5653_v38, %v1610_v14  ;;  %v3683_v48 = vpop.f32.mrb[153].mxu0  ;;  %v3809_v8 = vpop.f32.mrb[153].mxu1 }
 0x21b   :  { %v1613_v9 = vpop.f32.mrb[154].mxu0  ;;  %v2222_v17 = vpop.f32.mrb[154].mxu1  ;;  %v5664_v8 = vld [vmem:[#allocation5_spill] sm:$0xff] }
 0x21c   :  { %v2395_v18 = vmax.f32 %v1786_v39, %v2219_v59  ;;  %v1787_v35 = vmax.f32 %v5654_v34, %v1613_v9  ;;  %v3684_v5 = vpop.f32.mrb[155].mxu0  ;;  %v3810_v41 = vpop.f32.mrb[155].mxu1  ;;  %v5665_v9 = vld [vmem:[#allocation6_spill] sm:$0xff] }
 0x21e   :  { %v3208_v42 = vpack.c.bf16 %v2395_v18, %v2395_v18  ;;  %v2396_v6 = vmax.f32 %v1787_v35, %v2222_v17  ;;  %v5666_v17 = vmax.f32 %v5664_v8, %v5665_v9 }
 0x220   :  { %2682 = vst.msk [vmem:[%s5501_s2 + $0x48] sm:$0xf] %vm2663_vm3, %v3208_v42  ;;  %v3209_v52 = vpack.c.bf16 %v2396_v6, %v2396_v6  ;;  %v5667_v6 = vld [vmem:[#allocation7_spill] sm:$0xff] }
 0x221   :  { %v1618_v2 = vpop.f32.mrb[156].mxu0  ;;  %v2227_v21 = vpop.f32.mrb[156].mxu1 }
 0x222   :  { %2683 = vst.msk [vmem:[%s5501_s2 + $0x4c] sm:$0xf] %vm2663_vm3, %v3209_v52  ;;  %v1788_v51 = vmax.f32 %v5655_v50, %v1618_v2  ;;  %v3687_v1 = vpop.f32.mrb[157].mxu0  ;;  %v3813_v36 = vpop.f32.mrb[157].mxu1  ;;  %v5668_v52 = vld [vmem:[#allocation8_spill] sm:$0xff] }
 0x223   :  { %v1621_v16 = vpop.f32.mrb[158].mxu0  ;;  %v2230_v20 = vpop.f32.mrb[158].mxu1  ;;  %v5669_v2 = vmax.f32 %v5667_v6, %v5668_v52 }
 0x224   :  { %v2397_v24 = vmax.f32 %v1788_v51, %v2227_v21  ;;  %v1789_v33 = vmax.f32 %v5656_v32, %v1621_v16  ;;  %v3688_v55 = vpop.f32.mrb[159].mxu0  ;;  %v3814_v31 = vpop.f32.mrb[159].mxu1  ;;  %v5670_v32 = vld [vmem:[#allocation9_spill] sm:$0xff] }
 0x226   :  { %v3210_v7 = vpack.c.bf16 %v2397_v24, %v2397_v24  ;;  %v2398_v3 = vmax.f32 %v1789_v33, %v2230_v20  ;;  %v5671_v33 = vld [vmem:[#allocation10_spill] sm:$0xff] }
 0x227   :  { %v5672_v55 = vmax.f32 %v5670_v32, %v5671_v33 }
 0x228   :  { %2684 = vst.msk [vmem:[%s5501_s2 + $0x50] sm:$0xf] %vm2663_vm3, %v3210_v7  ;;  %v3211_v25 = vpack.c.bf16 %v2398_v3, %v2398_v3 }
 0x229   :  { %v1626_v26 = vpop.f32.mrb[160].mxu0  ;;  %v2235_v43 = vpop.f32.mrb[160].mxu1 }
 0x22a   :  { %2685 = vst.msk [vmem:[%s5501_s2 + $0x54] sm:$0xf] %vm2663_vm3, %v3211_v25  ;;  %v1790_v28 = vmax.f32 %v5657_v45, %v1626_v26  ;;  %v3691_v22 = vpop.f32.mrb[161].mxu0  ;;  %v3817_v46 = vpop.f32.mrb[161].mxu1  ;;  %v5673_v45 = vld [vmem:[#allocation11_spill] sm:$0xff] }
 0x22b   :  { %v1629_v47 = vpop.f32.mrb[162].mxu0  ;;  %v2238_v23 = vpop.f32.mrb[162].mxu1 }
 0x22c   :  { %v2399_v53 = vmax.f32 %v1790_v28, %v2235_v43  ;;  %v1791_v40 = vmax.f32 %v5658_v54, %v1629_v47  ;;  %v3692_v44 = vpop.f32.mrb[163].mxu0  ;;  %v3818_v12 = vpop.f32.mrb[163].mxu1  ;;  %v5674_v28 = vld [vmem:[#allocation12_spill] sm:$0xff] }
 0x22d   :  { %v5675_v22 = vmax.f32 %v5673_v45, %v5674_v28 }
 0x22e   :  { %v3212_v56 = vpack.c.bf16 %v2399_v53, %v2399_v53  ;;  %v2400_v57 = vmax.f32 %v1791_v40, %v2238_v23 }
 0x230   :  { %2686 = vst.msk [vmem:[%s5501_s2 + $0x58] sm:$0xf] %vm2663_vm3, %v3212_v56  ;;  %v3213_v49 = vpack.c.bf16 %v2400_v57, %v2400_v57  ;;  %v5676_v56 = vld [vmem:[#allocation13_spill] sm:$0xff]  ;;  %v5677_v57 = vld [vmem:[#allocation14_spill] sm:$0xff] }
 0x231   :  { %v1634_v15 = vpop.f32.mrb[164].mxu0  ;;  %v2243_v29 = vpop.f32.mrb[164].mxu1 }
 0x232   :  { %2687 = vst.msk [vmem:[%s5501_s2 + $0x5c] sm:$0xf] %vm2663_vm3, %v3213_v49  ;;  %v1792_v30 = vmax.f32 %v5660_v27, %v1634_v15  ;;  %v3695_v63 = vpop.f32.mrb[165].mxu0  ;;  %v3821_v13 = vpop.f32.mrb[165].mxu1  ;;  %v5678_v49 = vmax.f32 %v5676_v56, %v5677_v57 }
 0x233   :  { %v1637_v0 = vpop.f32.mrb[166].mxu0  ;;  %v2246_v10 = vpop.f32.mrb[166].mxu1  ;;  %v5679_v13 = vld [vmem:[#allocation15_spill] sm:$0xff] }
 0x234   :  { %v2401_v11 = vmax.f32 %v1792_v30, %v2243_v29  ;;  %v1793_v58 = vmax.f32 %v5663_v62, %v1637_v0  ;;  %v3696_v4 = vpop.f32.mrb[167].mxu0  ;;  %v3822_v14 = vpop.f32.mrb[167].mxu1  ;;  %v5680_v0 = vld [vmem:[#allocation16_spill] sm:$0xff] }
 0x236   :  { %v3214_v59 = vpack.c.bf16 %v2401_v11, %v2401_v11  ;;  %v2402_v38 = vmax.f32 %v1793_v58, %v2246_v10  ;;  %v5681_v10 = vmax.f32 %v5679_v13, %v5680_v0 }
 0x238   :  { %2688 = vst.msk [vmem:[%s5501_s2 + $0x60] sm:$0xf] %vm2663_vm3, %v3214_v59  ;;  %v3215_v37 = vpack.c.bf16 %v2402_v38, %v2402_v38  ;;  %v5682_v38 = vld [vmem:[#allocation17_spill] sm:$0xff] }
 0x239   :  { %v1642_v39 = vpop.f32.mrb[168].mxu0  ;;  %v2251_v48 = vpop.f32.mrb[168].mxu1 }
 0x23a   :  { %2689 = vst.msk [vmem:[%s5501_s2 + $0x64] sm:$0xf] %vm2663_vm3, %v3215_v37  ;;  %v1794_v18 = vmax.f32 %v5666_v17, %v1642_v39  ;;  %v3699_v34 = vpop.f32.mrb[169].mxu0  ;;  %v3825_v35 = vpop.f32.mrb[169].mxu1  ;;  %v5683_v37 = vld [vmem:[#allocation18_spill] sm:$0xff] }
 0x23b   :  { %v1645_v5 = vpop.f32.mrb[170].mxu0  ;;  %v2254_v41 = vpop.f32.mrb[170].mxu1  ;;  %v5684_v39 = vmax.f32 %v5682_v38, %v5683_v37  ;;  %v5685_v35 = vld [vmem:[#allocation19_spill] sm:$0xff] }
 0x23c   :  { %v2403_v42 = vmax.f32 %v1794_v18, %v2251_v48  ;;  %v1795_v21 = vmax.f32 %v5669_v2, %v1645_v5  ;;  %v3700_v50 = vpop.f32.mrb[171].mxu0  ;;  %v3826_v51 = vpop.f32.mrb[171].mxu1  ;;  %v5686_v5 = vld [vmem:[#allocation20_spill] sm:$0xff] }
 0x23e   :  { %v3216_v1 = vpack.c.bf16 %v2403_v42, %v2403_v42  ;;  %v2404_v36 = vmax.f32 %v1795_v21, %v2254_v41  ;;  %v5687_v41 = vmax.f32 %v5685_v35, %v5686_v5 }
 0x240   :  { %2690 = vst.msk [vmem:[%s5501_s2 + $0x68] sm:$0xf] %vm2663_vm3, %v3216_v1  ;;  %v3217_v16 = vpack.c.bf16 %v2404_v36, %v2404_v36  ;;  %v5688_v36 = vld [vmem:[#allocation21_spill] sm:$0xff] }
 0x241   :  { %v1650_v20 = vpop.f32.mrb[172].mxu0  ;;  %v2259_v24 = vpop.f32.mrb[172].mxu1 }
 0x242   :  { %2691 = vst.msk [vmem:[%s5501_s2 + $0x6c] sm:$0xf] %vm2663_vm3, %v3217_v16  ;;  %v1796_v31 = vmax.f32 %v5672_v55, %v1650_v20  ;;  %v3703_v7 = vpop.f32.mrb[173].mxu0  ;;  %v3829_v3 = vpop.f32.mrb[173].mxu1  ;;  %v5689_v16 = vld [vmem:[#allocation22_spill] sm:$0xff] }
 0x243   :  { %v1653_v25 = vpop.f32.mrb[174].mxu0  ;;  %v2262_v26 = vpop.f32.mrb[174].mxu1  ;;  %v5690_v20 = vmax.f32 %v5688_v36, %v5689_v16  ;;  %v5691_v3 = vld [vmem:[#allocation23_spill] sm:$0xff] }
 0x244   :  { %v2405_v43 = vmax.f32 %v1796_v31, %v2259_v24  ;;  %v1797_v46 = vmax.f32 %v5675_v22, %v1653_v25  ;;  %v3704_v47 = vpop.f32.mrb[175].mxu0  ;;  %v3830_v23 = vpop.f32.mrb[175].mxu1  ;;  %v5692_v25 = vld [vmem:[#allocation24_spill] sm:$0xff] }
 0x246   :  { %v3218_v53 = vpack.c.bf16 %v2405_v43, %v2405_v43  ;;  %v2406_v54 = vmax.f32 %v1797_v46, %v2262_v26  ;;  %v5693_v26 = vmax.f32 %v5691_v3, %v5692_v25 }
 0x248   :  { %2692 = vst.msk [vmem:[%s5501_s2 + $0x70] sm:$0xf] %vm2663_vm3, %v3218_v53  ;;  %v3219_v40 = vpack.c.bf16 %v2406_v54, %v2406_v54  ;;  %v5694_v54 = vld [vmem:[#allocation25_spill] sm:$0xff] }
 0x249   :  { %v1658_v44 = vpop.f32.mrb[176].mxu0  ;;  %v2267_v12 = vpop.f32.mrb[176].mxu1 }
 0x24a   :  { %2693 = vst.msk [vmem:[%s5501_s2 + $0x74] sm:$0xf] %vm2663_vm3, %v3219_v40  ;;  %v1798_v15 = vmax.f32 %v5678_v49, %v1658_v44  ;;  %v3707_v29 = vpop.f32.mrb[177].mxu0  ;;  %v3833_v60 = vpop.f32.mrb[177].mxu1  ;;  %v5695_v40 = vld [vmem:[#allocation26_spill] sm:$0xff] }
 0x24b   :  { %v1661_v27 = vpop.f32.mrb[178].mxu0  ;;  %v2270_v30 = vpop.f32.mrb[178].mxu1  ;;  %v5696_v44 = vmax.f32 %v5694_v54, %v5695_v40  ;;  %v5697_v60 = vld [vmem:[#allocation27_spill] sm:$0xff] }
 0x24c   :  { %v2407_v63 = vmax.f32 %v1798_v15, %v2267_v12  ;;  %v1799_v11 = vmax.f32 %v5681_v10, %v1661_v27  ;;  %v3708_v19 = vpop.f32.mrb[179].mxu0  ;;  %v3834_v61 = vpop.f32.mrb[179].mxu1  ;;  %v5698_v27 = vld [vmem:[#allocation28_spill] sm:$0xff] }
 0x24e   :  { %v3220_v62 = vpack.c.bf16 %v2407_v63, %v2407_v63  ;;  %v2408_v58 = vmax.f32 %v1799_v11, %v2270_v30  ;;  %v5699_v30 = vmax.f32 %v5697_v60, %v5698_v27 }
 0x250   :  { %2694 = vst.msk [vmem:[%s5501_s2 + $0x78] sm:$0xf] %vm2663_vm3, %v3220_v62  ;;  %v3221_v4 = vpack.c.bf16 %v2408_v58, %v2408_v58  ;;  %v5700_v58 = vld [vmem:[#allocation29_spill] sm:$0xff] }
 0x251   :  { %v1666_v14 = vpop.f32.mrb[180].mxu0  ;;  %v2275_v59 = vpop.f32.mrb[180].mxu1 }
 0x252   :  { %2695 = vst.msk [vmem:[%s5501_s2 + $0x7c] sm:$0xf] %vm2663_vm3, %v3221_v4  ;;  %v1800_v48 = vmax.f32 %v5684_v39, %v1666_v14  ;;  %v3711_v8 = vpop.f32.mrb[181].mxu0  ;;  %v3837_v9 = vpop.f32.mrb[181].mxu1  ;;  %v5701_v4 = vld [vmem:[#allocation30_spill] sm:$0xff] }
 0x253   :  { %v1669_v17 = vpop.f32.mrb[182].mxu0  ;;  %v2278_v18 = vpop.f32.mrb[182].mxu1  ;;  %v5702_v14 = vmax.f32 %v5700_v58, %v5701_v4  ;;  %v5703_v9 = vld [vmem:[#allocation31_spill] sm:$0xff] }
 0x254   :  { %v2409_v34 = vmax.f32 %v1800_v48, %v2275_v59  ;;  %v1801_v42 = vmax.f32 %v5687_v41, %v1669_v17  ;;  %v3712_v6 = vpop.f32.mrb[183].mxu0  ;;  %v3838_v52 = vpop.f32.mrb[183].mxu1  ;;  %v5704_v17 = vld [vmem:[#allocation32_spill] sm:$0xff] }
 0x256   :  { %v3222_v2 = vpack.c.bf16 %v2409_v34, %v2409_v34  ;;  %v2410_v21 = vmax.f32 %v1801_v42, %v2278_v18  ;;  %v5705_v18 = vmax.f32 %v5703_v9, %v5704_v17 }
 0x258   :  { %2696 = vst.msk [vmem:[%s5501_s2 + $0x80] sm:$0xf] %vm2663_vm3, %v3222_v2  ;;  %v3223_v50 = vpack.c.bf16 %v2410_v21, %v2410_v21  ;;  %v5706_v21 = vld [vmem:[#allocation33_spill] sm:$0xff] }
 0x259   :  { %v1674_v51 = vpop.f32.mrb[184].mxu0  ;;  %v2283_v1 = vpop.f32.mrb[184].mxu1 }
 0x25a   :  { %2697 = vst.msk [vmem:[%s5501_s2 + $0x84] sm:$0xf] %vm2663_vm3, %v3223_v50  ;;  %v1802_v24 = vmax.f32 %v5690_v20, %v1674_v51  ;;  %v3715_v32 = vpop.f32.mrb[185].mxu0  ;;  %v3841_v33 = vpop.f32.mrb[185].mxu1  ;;  %v5707_v50 = vld [vmem:[#allocation34_spill] sm:$0xff] }
 0x25b   :  { %v1677_v55 = vpop.f32.mrb[186].mxu0  ;;  %v2286_v31 = vpop.f32.mrb[186].mxu1  ;;  %v5708_v51 = vmax.f32 %v5706_v21, %v5707_v50  ;;  %v5709_v33 = vld [vmem:[#allocation35_spill] sm:$0xff] }
 0x25c   :  { %v2411_v7 = vmax.f32 %v1802_v24, %v2283_v1  ;;  %v1803_v43 = vmax.f32 %v5693_v26, %v1677_v55  ;;  %v3716_v45 = vpop.f32.mrb[187].mxu0  ;;  %v3842_v28 = vpop.f32.mrb[187].mxu1  ;;  %v5710_v55 = vld [vmem:[#allocation36_spill] sm:$0xff] }
 0x25e   :  { %v3224_v22 = vpack.c.bf16 %v2411_v7, %v2411_v7  ;;  %v2412_v46 = vmax.f32 %v1803_v43, %v2286_v31  ;;  %v5711_v31 = vmax.f32 %v5709_v33, %v5710_v55 }
 0x260   :  { %2698 = vst.msk [vmem:[%s5501_s2 + $0x88] sm:$0xf] %vm2663_vm3, %v3224_v22  ;;  %v3225_v47 = vpack.c.bf16 %v2412_v46, %v2412_v46  ;;  %v5712_v46 = vld [vmem:[#allocation37_spill] sm:$0xff] }
 0x261   :  { %v1682_v23 = vpop.f32.mrb[188].mxu0  ;;  %v2291_v53 = vpop.f32.mrb[188].mxu1 }
 0x262   :  { %2699 = vst.msk [vmem:[%s5501_s2 + $0x8c] sm:$0xf] %vm2663_vm3, %v3225_v47  ;;  %v1804_v12 = vmax.f32 %v5696_v44, %v1682_v23  ;;  %v3719_v56 = vpop.f32.mrb[189].mxu0  ;;  %v3845_v57 = vpop.f32.mrb[189].mxu1  ;;  %v5713_v47 = vld [vmem:[#allocation38_spill] sm:$0xff] }
 0x263   :  { %v1685_v49 = vpop.f32.mrb[190].mxu0  ;;  %v2294_v15 = vpop.f32.mrb[190].mxu1  ;;  %v5714_v23 = vmax.f32 %v5712_v46, %v5713_v47  ;;  %v5715_v57 = vld [vmem:[#allocation39_spill] sm:$0xff] }
 0x264   :  { %v2413_v29 = vmax.f32 %v1804_v12, %v2291_v53  ;;  %v1805_v63 = vmax.f32 %v5699_v30, %v1685_v49  ;;  %v3720_v13 = vpop.f32.mrb[191].mxu0  ;;  %v3846_v0 = vpop.f32.mrb[191].mxu1  ;;  %v5716_v49 = vld [vmem:[#allocation40_spill] sm:$0xff] }
 0x266   :  { %v3226_v10 = vpack.c.bf16 %v2413_v29, %v2413_v29  ;;  %v2414_v11 = vmax.f32 %v1805_v63, %v2294_v15  ;;  %v5717_v15 = vmax.f32 %v5715_v57, %v5716_v49 }
 0x268   :  { %2700 = vst.msk [vmem:[%s5501_s2 + $0x90] sm:$0xf] %vm2663_vm3, %v3226_v10  ;;  %v3227_v19 = vpack.c.bf16 %v2414_v11, %v2414_v11  ;;  %v5718_v11 = vld [vmem:[#allocation41_spill] sm:$0xff] }
 0x269   :  { %v1690_v61 = vpop.f32.mrb[192].mxu0  ;;  %v2299_v62 = vpop.f32.mrb[192].mxu1 }
 0x26a   :  { %2701 = vst.msk [vmem:[%s5501_s2 + $0x94] sm:$0xf] %vm2663_vm3, %v3227_v19  ;;  %v1806_v59 = vmax.f32 %v5702_v14, %v1690_v61  ;;  %v3723_v38 = vpop.f32.mrb[193].mxu0  ;;  %v3849_v37 = vpop.f32.mrb[193].mxu1  ;;  %v5719_v19 = vld [vmem:[#allocation42_spill] sm:$0xff] }
 0x26b   :  { %v1693_v39 = vpop.f32.mrb[194].mxu0  ;;  %v2302_v48 = vpop.f32.mrb[194].mxu1  ;;  %v5720_v61 = vmax.f32 %v5718_v11, %v5719_v19  ;;  %v5721_v37 = vld [vmem:[#allocation43_spill] sm:$0xff] }
 0x26c   :  { %v2415_v8 = vmax.f32 %v1806_v59, %v2299_v62  ;;  %v1807_v34 = vmax.f32 %v5705_v18, %v1693_v39  ;;  %v3724_v35 = vpop.f32.mrb[195].mxu0  ;;  %v3850_v5 = vpop.f32.mrb[195].mxu1  ;;  %v5722_v39 = vld [vmem:[#allocation44_spill] sm:$0xff] }
 0x26e   :  { %v3228_v41 = vpack.c.bf16 %v2415_v8, %v2415_v8  ;;  %v2416_v42 = vmax.f32 %v1807_v34, %v2302_v48  ;;  %v5723_v48 = vmax.f32 %v5721_v37, %v5722_v39 }
 0x270   :  { %2702 = vst.msk [vmem:[%s5501_s2 + $0x98] sm:$0xf] %vm2663_vm3, %v3228_v41  ;;  %v3229_v6 = vpack.c.bf16 %v2416_v42, %v2416_v42  ;;  %v5724_v42 = vld [vmem:[#allocation45_spill] sm:$0xff] }
 0x271   :  { %v1698_v52 = vpop.f32.mrb[196].mxu0  ;;  %v2307_v2 = vpop.f32.mrb[196].mxu1 }
 0x272   :  { %2703 = vst.msk [vmem:[%s5501_s2 + $0x9c] sm:$0xf] %vm2663_vm3, %v3229_v6  ;;  %v1808_v1 = vmax.f32 %v5708_v51, %v1698_v52  ;;  %v3727_v36 = vpop.f32.mrb[197].mxu0  ;;  %v3853_v16 = vpop.f32.mrb[197].mxu1  ;;  %v5725_v6 = vld [vmem:[#allocation46_spill] sm:$0xff] }
 0x273   :  { %v1701_v20 = vpop.f32.mrb[198].mxu0  ;;  %v2310_v24 = vpop.f32.mrb[198].mxu1  ;;  %v5726_v52 = vmax.f32 %v5724_v42, %v5725_v6  ;;  %v5727_v16 = vld [vmem:[#allocation47_spill] sm:$0xff] }
 0x274   :  { %v2417_v32 = vmax.f32 %v1808_v1, %v2307_v2  ;;  %v1809_v7 = vmax.f32 %v5711_v31, %v1701_v20  ;;  %v3728_v3 = vpop.f32.mrb[199].mxu0  ;;  %v3854_v25 = vpop.f32.mrb[199].mxu1  ;;  %v5728_v20 = vld [vmem:[#allocation48_spill] sm:$0xff] }
 0x276   :  { %v3230_v26 = vpack.c.bf16 %v2417_v32, %v2417_v32  ;;  %v2418_v43 = vmax.f32 %v1809_v7, %v2310_v24  ;;  %v5729_v24 = vmax.f32 %v5727_v16, %v5728_v20 }
 0x278   :  { %2704 = vst.msk [vmem:[%s5501_s2 + $0xa0] sm:$0xf] %vm2663_vm3, %v3230_v26  ;;  %v3231_v45 = vpack.c.bf16 %v2418_v43, %v2418_v43  ;;  %v5730_v43 = vld [vmem:[#allocation49_spill] sm:$0xff] }
 0x279   :  { %v1706_v28 = vpop.f32.mrb[200].mxu0  ;;  %v2315_v22 = vpop.f32.mrb[200].mxu1 }
 0x27a   :  { %2705 = vst.msk [vmem:[%s5501_s2 + $0xa4] sm:$0xf] %vm2663_vm3, %v3231_v45  ;;  %v1810_v53 = vmax.f32 %v5714_v23, %v1706_v28  ;;  %v3731_v54 = vpop.f32.mrb[201].mxu0  ;;  %v3857_v40 = vpop.f32.mrb[201].mxu1  ;;  %v5731_v45 = vld [vmem:[#allocation50_spill] sm:$0xff] }
 0x27b   :  { %v1709_v44 = vpop.f32.mrb[202].mxu0  ;;  %v2318_v12 = vpop.f32.mrb[202].mxu1  ;;  %v5732_v28 = vmax.f32 %v5730_v43, %v5731_v45  ;;  %v5733_v40 = vld [vmem:[#allocation51_spill] sm:$0xff] }
 0x27c   :  { %v2419_v56 = vmax.f32 %v1810_v53, %v2315_v22  ;;  %v1811_v29 = vmax.f32 %v5717_v15, %v1709_v44  ;;  %v3732_v60 = vpop.f32.mrb[203].mxu0  ;;  %v3858_v27 = vpop.f32.mrb[203].mxu1  ;;  %v5734_v44 = vld [vmem:[#allocation52_spill] sm:$0xff] }
 0x27e   :  { %v3232_v30 = vpack.c.bf16 %v2419_v56, %v2419_v56  ;;  %v2420_v63 = vmax.f32 %v1811_v29, %v2318_v12  ;;  %v5735_v12 = vmax.f32 %v5733_v40, %v5734_v44 }
 0x280   :  { %2706 = vst.msk [vmem:[%s5501_s2 + $0xa8] sm:$0xf] %vm2663_vm3, %v3232_v30  ;;  %v3233_v13 = vpack.c.bf16 %v2420_v63, %v2420_v63  ;;  %v5736_v63 = vld [vmem:[#allocation53_spill] sm:$0xff] }
 0x281   :  { %v1714_v0 = vpop.f32.mrb[204].mxu0  ;;  %v2323_v10 = vpop.f32.mrb[204].mxu1 }
 0x282   :  { %2707 = vst.msk [vmem:[%s5501_s2 + $0xac] sm:$0xf] %vm2663_vm3, %v3233_v13  ;;  %v1812_v62 = vmax.f32 %v5720_v61, %v1714_v0  ;;  %v3735_v58 = vpop.f32.mrb[205].mxu0  ;;  %v3861_v4 = vpop.f32.mrb[205].mxu1  ;;  %v5737_v13 = vld [vmem:[#allocation54_spill] sm:$0xff] }
 0x283   :  { %v1717_v14 = vpop.f32.mrb[206].mxu0  ;;  %v2326_v59 = vpop.f32.mrb[206].mxu1  ;;  %v5738_v0 = vmax.f32 %v5736_v63, %v5737_v13  ;;  %v5739_v4 = vld [vmem:[#allocation55_spill] sm:$0xff] }
 0x284   :  { %v2421_v38 = vmax.f32 %v1812_v62, %v2323_v10  ;;  %v1813_v8 = vmax.f32 %v5723_v48, %v1717_v14  ;;  %v3736_v9 = vpop.f32.mrb[207].mxu0  ;;  %v3862_v17 = vpop.f32.mrb[207].mxu1  ;;  %v5740_v14 = vld [vmem:[#allocation56_spill] sm:$0xff] }
 0x286   :  { %v3234_v18 = vpack.c.bf16 %v2421_v38, %v2421_v38  ;;  %v2422_v34 = vmax.f32 %v1813_v8, %v2326_v59  ;;  %v5741_v59 = vmax.f32 %v5739_v4, %v5740_v14 }
 0x288   :  { %2708 = vst.msk [vmem:[%s5501_s2 + $0xb0] sm:$0xf] %vm2663_vm3, %v3234_v18  ;;  %v3235_v35 = vpack.c.bf16 %v2422_v34, %v2422_v34  ;;  %v5742_v34 = vld [vmem:[#allocation57_spill] sm:$0xff] }
 0x289   :  { %v1722_v5 = vpop.f32.mrb[208].mxu0  ;;  %v2331_v41 = vpop.f32.mrb[208].mxu1 }
 0x28a   :  { %2709 = vst.msk [vmem:[%s5501_s2 + $0xb4] sm:$0xf] %vm2663_vm3, %v3235_v35  ;;  %v1814_v2 = vmax.f32 %v5726_v52, %v1722_v5  ;;  %v3739_v21 = vpop.f32.mrb[209].mxu0  ;;  %v3865_v50 = vpop.f32.mrb[209].mxu1  ;;  %v5743_v35 = vld [vmem:[#allocation58_spill] sm:$0xff] }
 0x28b   :  { %v1725_v51 = vpop.f32.mrb[210].mxu0  ;;  %v2334_v1 = vpop.f32.mrb[210].mxu1  ;;  %v5744_v5 = vmax.f32 %v5742_v34, %v5743_v35  ;;  %v5745_v50 = vld [vmem:[#allocation59_spill] sm:$0xff] }
 0x28c   :  { %v2423_v36 = vmax.f32 %v1814_v2, %v2331_v41  ;;  %v1815_v32 = vmax.f32 %v5729_v24, %v1725_v51  ;;  %v3740_v33 = vpop.f32.mrb[211].mxu0  ;;  %v3866_v55 = vpop.f32.mrb[211].mxu1  ;;  %v5746_v51 = vld [vmem:[#allocation60_spill] sm:$0xff] }
 0x28e   :  { %v3236_v31 = vpack.c.bf16 %v2423_v36, %v2423_v36  ;;  %v2424_v7 = vmax.f32 %v1815_v32, %v2334_v1  ;;  %v5747_v1 = vmax.f32 %v5745_v50, %v5746_v51 }
 0x290   :  { %2710 = vst.msk [vmem:[%s5501_s2 + $0xb8] sm:$0xf] %vm2663_vm3, %v3236_v31  ;;  %v3237_v3 = vpack.c.bf16 %v2424_v7, %v2424_v7  ;;  %v5748_v7 = vld [vmem:[#allocation61_spill] sm:$0xff] }
 0x291   :  { %v1730_v25 = vpop.f32.mrb[212].mxu0  ;;  %v2339_v26 = vpop.f32.mrb[212].mxu1 }
 0x292   :  { %2711 = vst.msk [vmem:[%s5501_s2 + $0xbc] sm:$0xf] %vm2663_vm3, %v3237_v3  ;;  %v1816_v22 = vmax.f32 %v5732_v28, %v1730_v25  ;;  %v3743_v46 = vpop.f32.mrb[213].mxu0  ;;  %v3869_v47 = vpop.f32.mrb[213].mxu1  ;;  %v5749_v3 = vld [vmem:[#allocation62_spill] sm:$0xff] }
 0x293   :  { %v1733_v23 = vpop.f32.mrb[214].mxu0  ;;  %v2342_v53 = vpop.f32.mrb[214].mxu1  ;;  %v5750_v25 = vmax.f32 %v5748_v7, %v5749_v3  ;;  %v5751_v47 = vld [vmem:[#allocation63_spill] sm:$0xff] }
 0x294   :  { %v2425_v54 = vmax.f32 %v1816_v22, %v2339_v26  ;;  %v1817_v56 = vmax.f32 %v5735_v12, %v1733_v23  ;;  %v3744_v57 = vpop.f32.mrb[215].mxu0  ;;  %v3870_v49 = vpop.f32.mrb[215].mxu1  ;;  %v5752_v23 = vld [vmem:[#allocation64_spill] sm:$0xff] }
 0x296   :  { %v3238_v15 = vpack.c.bf16 %v2425_v54, %v2425_v54  ;;  %v2426_v29 = vmax.f32 %v1817_v56, %v2342_v53  ;;  %v5753_v53 = vmax.f32 %v5751_v47, %v5752_v23 }
 0x298   :  { %2712 = vst.msk [vmem:[%s5501_s2 + $0xc0] sm:$0xf] %vm2663_vm3, %v3238_v15  ;;  %v3239_v60 = vpack.c.bf16 %v2426_v29, %v2426_v29  ;;  %v5754_v29 = vld [vmem:[#allocation65_spill] sm:$0xff] }
 0x299   :  { %v1738_v27 = vpop.f32.mrb[216].mxu0  ;;  %v2347_v30 = vpop.f32.mrb[216].mxu1 }
 0x29a   :  { %2713 = vst.msk [vmem:[%s5501_s2 + $0xc4] sm:$0xf] %vm2663_vm3, %v3239_v60  ;;  %v1818_v10 = vmax.f32 %v5738_v0, %v1738_v27  ;;  %v3747_v11 = vpop.f32.mrb[217].mxu0  ;;  %v3873_v19 = vpop.f32.mrb[217].mxu1  ;;  %v5755_v60 = vld [vmem:[#allocation66_spill] sm:$0xff] }
 0x29b   :  { %v1741_v61 = vpop.f32.mrb[218].mxu0  ;;  %v2350_v62 = vpop.f32.mrb[218].mxu1  ;;  %v5756_v27 = vmax.f32 %v5754_v29, %v5755_v60 }
 0x29c   :  { %v2427_v58 = vmax.f32 %v1818_v10, %v2347_v30  ;;  %v1819_v38 = vmax.f32 %v5741_v59, %v1741_v61  ;;  %v3748_v37 = vpop.f32.mrb[219].mxu0  ;;  %v3874_v39 = vpop.f32.mrb[219].mxu1 }
 0x29e   :  { %v3240_v48 = vpack.c.bf16 %v2427_v58, %v2427_v58  ;;  %v2428_v8 = vmax.f32 %v1819_v38, %v2350_v62 }
 0x2a0   :  { %2714 = vst.msk [vmem:[%s5501_s2 + $0xc8] sm:$0xf] %vm2663_vm3, %v3240_v48  ;;  %v3241_v9 = vpack.c.bf16 %v2428_v8, %v2428_v8 }
 0x2a1   :  { %v1746_v17 = vpop.f32.mrb[220].mxu0  ;;  %v2355_v18 = vpop.f32.mrb[220].mxu1 }
 0x2a2   :  { %2715 = vst.msk [vmem:[%s5501_s2 + $0xcc] sm:$0xf] %vm2663_vm3, %v3241_v9  ;;  %v1820_v41 = vmax.f32 %v5744_v5, %v1746_v17  ;;  %v3751_v42 = vpop.f32.mrb[221].mxu0  ;;  %v3877_v6 = vpop.f32.mrb[221].mxu1 }
 0x2a3   :  { %v1749_v52 = vpop.f32.mrb[222].mxu0  ;;  %v2358_v2 = vpop.f32.mrb[222].mxu1 }
 0x2a4   :  { %v2429_v21 = vmax.f32 %v1820_v41, %v2355_v18  ;;  %v1821_v36 = vmax.f32 %v5747_v1, %v1749_v52  ;;  %v3752_v16 = vpop.f32.mrb[223].mxu0  ;;  %v3878_v20 = vpop.f32.mrb[223].mxu1 }
 0x2a6   :  { %v3242_v24 = vpack.c.bf16 %v2429_v21, %v2429_v21  ;;  %v2430_v32 = vmax.f32 %v1821_v36, %v2358_v2 }
 0x2a8   :  { %2716 = vst.msk [vmem:[%s5501_s2 + $0xd0] sm:$0xf] %vm2663_vm3, %v3242_v24  ;;  %v3243_v33 = vpack.c.bf16 %v2430_v32, %v2430_v32 }
 0x2a9   :  { %v1754_v55 = vpop.f32.mrb[224].mxu0  ;;  %v2363_v31 = vpop.f32.mrb[224].mxu1 }
 0x2aa   :  { %2717 = vst.msk [vmem:[%s5501_s2 + $0xd4] sm:$0xf] %vm2663_vm3, %v3243_v33  ;;  %v1822_v26 = vmax.f32 %v5750_v25, %v1754_v55  ;;  %v3755_v43 = vpop.f32.mrb[225].mxu0  ;;  %v3881_v45 = vpop.f32.mrb[225].mxu1 }
 0x2ab   :  { %v1757_v28 = vpop.f32.mrb[226].mxu0  ;;  %v2366_v22 = vpop.f32.mrb[226].mxu1 }
 0x2ac   :  { %v2431_v46 = vmax.f32 %v1822_v26, %v2363_v31  ;;  %v1823_v54 = vmax.f32 %v5753_v53, %v1757_v28  ;;  %v3756_v40 = vpop.f32.mrb[227].mxu0  ;;  %v3882_v44 = vpop.f32.mrb[227].mxu1 }
 0x2ae   :  { %v3244_v12 = vpack.c.bf16 %v2431_v46, %v2431_v46  ;;  %v2432_v56 = vmax.f32 %v1823_v54, %v2366_v22 }
 0x2b0   :  { %2718 = vst.msk [vmem:[%s5501_s2 + $0xd8] sm:$0xf] %vm2663_vm3, %v3244_v12  ;;  %v3245_v57 = vpack.c.bf16 %v2432_v56, %v2432_v56 }
 0x2b1   :  { %v1762_v49 = vpop.f32.mrb[228].mxu0  ;;  %v2371_v15 = vpop.f32.mrb[228].mxu1 }
 0x2b2   :  { %2719 = vst.msk [vmem:[%s5501_s2 + $0xdc] sm:$0xf] %vm2663_vm3, %v3245_v57  ;;  %v1824_v30 = vmax.f32 %v5756_v27, %v1762_v49  ;;  %v3759_v63 = vpop.f32.mrb[229].mxu0  ;;  %v3885_v13 = vpop.f32.mrb[229].mxu1 }
 0x2b3   :  { %v1765_v0 = vpop.f32.mrb[230].mxu0  ;;  %v2374_v10 = vpop.f32.mrb[230].mxu1 }
 0x2b4   :  { %v2433_v11 = vmax.f32 %v1824_v30, %v2371_v15  ;;  %v3760_v19 = vpop.f32.mrb[231].mxu0  ;;  %v3886_v61 = vpop.f32.mrb[231].mxu1 }
 0x2b6   :  { %v3246_v62 = vpack.c.bf16 %v2433_v11, %v2433_v11 }
 0x2b8   :  { %2720 = vst.msk [vmem:[%s5501_s2 + $0xe0] sm:$0xf] %vm2663_vm3, %v3246_v62 }

// kernel: lenet5_forward.4
= control target key start
LH: loop header
LB: loop body
LE: loop exit
PB: predicated region body
PF: predicated region fallthrough
CT: control target
= control target key end

     0   :  { %v912_v0 = vmov 0   ;;  %vm139_vm0 = vcmask 187392   ;;  %vm155_vm1 = vcmask 1042432   ;;  %vm156_vm2 = vcmask 1043456   ;;  %s1268_s1 = inlined_call_operand.vmem [shape: bf16[151,16], index: 1, kind: input, shape index: {}]   ;;  %s1269_s0 = inlined_call_operand.vmem [shape: bf16[4,72,151], index: 0, kind: input, shape index: {}]   ;;  %s1270_s2 = inlined_call_operand.vmem [shape: bf16[72,16], index: 2, kind: output, shape index: {}]  }
   0x1   :  { %162 = vmatprep.subr.bf16.mxu0 %v912_v0  ;;  %301 = vmatprep.subr.bf16.mxu1 %v912_v0  ;;  %v934_v1 = vld [vmem:[%s1268_s1] sm:$0xff]   ;;  %v941_v2 = vld [vmem:[%s1268_s1 + $0x8] sm:$0xff]   ;;  %v950_v3 = vld [vmem:[%s1268_s1 + $0x10] sm:$0xff]   ;;  %v913_v11 = vmov 65535   ;;  %vm715_vm3 = vcmask 125952  }
   0x2   :  { %163 = vmatpush1.bf16.msra.mxu0 %v934_v1  ;;  %302 = vmatpush1.bf16.msra.mxu1 %v934_v1  ;;  %v959_v4 = vld [vmem:[%s1268_s1 + $0x18] sm:$0xff]   ;;  %v858_v5 = vld [vmem:[%s1269_s0 + $0x4] ss:$8 sps:$4 sm:$0xff]   ;;  %v994_v9 = vld [vmem:[%s1268_s1 + $0x30] sm:$0xff]   ;;  %v157_v12 = vsel %vm155_vm1, 4294967295, %v913_v11 }
   0x3   :  { %164 = vmatprep.subr.bf16.mxu0 %v912_v0  ;;  %303 = vmatprep.subr.bf16.mxu1 %v912_v0  ;;  %v861_v6 = vld [vmem:[%s1269_s0 + $0x4c] ss:$8 sps:$4 sm:$0xff]   ;;  %v975_v7 = vld [vmem:[%s1268_s1 + $0x20] sm:$0xff]   ;;  %v1003_v10 = vld [vmem:[%s1268_s1 + $0x38] sm:$0xff]   ;;  %v158_v15 = vsel %vm156_vm2, %v157_v12, 0 }
   0x4   :  { %749 = vmatprep.mubr.msk.bf16.mxu0 %vm139_vm0, %v858_v5  ;;  %773 = vmatprep.mubr.msk.bf16.mxu1 %vm139_vm0, %v861_v6  ;;  %v985_v8 = vld [vmem:[%s1268_s1 + $0x28] sm:$0xff]   ;;  %v1010_v13 = vld [vmem:[%s1268_s1 + $0x40] sm:$0xff]   ;;  %v862_v19 = vld [vmem:[%s1269_s0 + $0x14] ss:$8 sps:$4 sm:$0xff]  }
   0x5   :  { %v855_v14 = vld [vmem:[%s1268_s1 + $0x48] ss:$0 sps:$4 sm:$0xff]   ;;  %v864_v20 = vld [vmem:[%s1269_s0 + $0x5c] ss:$8 sps:$4 sm:$0xff]   ;;  %v866_v21 = vld [vmem:[%s1269_s0 + $0x10] ss:$8 sps:$4 sm:$0xff]  }
   0x6   :  { %165 = vmatpush1.bf16.msra.mxu0 %v941_v2  ;;  %304 = vmatpush1.bf16.msra.mxu1 %v941_v2  ;;  %v1021_v16 = vand.u32 %v855_v14, %v158_v15  ;;  %v856_v17 = vld [vmem:[%s1269_s0] ss:$8 sps:$4 sm:$0xff]   ;;  %v868_v23 = vld [vmem:[%s1269_s0 + $0x24] ss:$8 sps:$4 sm:$0xff]   ;;  %v874_v27 = vld [vmem:[%s1269_s0 + $0x34] ss:$8 sps:$4 sm:$0xff]  }
   0x7   :  { %166 = vmatprep.subr.bf16.mxu0 %v912_v0  ;;  %305 = vmatprep.subr.bf16.mxu1 %v912_v0  ;;  %v859_v18 = vld [vmem:[%s1269_s0 + $0x48] ss:$8 sps:$4 sm:$0xff]   ;;  %v867_v22 = vld [vmem:[%s1269_s0 + $0x58] ss:$8 sps:$4 sm:$0xff]   ;;  %v870_v24 = vld [vmem:[%s1269_s0 + $0x6c] ss:$8 sps:$4 sm:$0xff]  }
   0x8   :  { %v872_v25 = vld [vmem:[%s1269_s0 + $0x20] ss:$8 sps:$4 sm:$0xff]   ;;  %v876_v28 = vld [vmem:[%s1269_s0 + $0x7c] ss:$8 sps:$4 sm:$0xff]   ;;  %v878_v29 = vld [vmem:[%s1269_s0 + $0x30] ss:$8 sps:$4 sm:$0xff]  }
   0x9   :  { %v873_v26 = vld [vmem:[%s1269_s0 + $0x68] ss:$8 sps:$4 sm:$0xff]   ;;  %v879_v30 = vld [vmem:[%s1269_s0 + $0x78] ss:$8 sps:$4 sm:$0xff]   ;;  %v886_v37 = vld [vmem:[%s1269_s0 + $0x94] ss:$8 sps:$4 sm:$0xff]  }
   0xa   :  { %167 = vmatpush1.bf16.msra.mxu0 %v950_v3  ;;  %306 = vmatpush1.bf16.msra.mxu1 %v950_v3  ;;  %v39_v31 = vld [vmem:[%s1269_s0 + $0x40] sm:$0xff]  ;;  %v762_v32 = vld [vmem:[%s1269_s0 + $0x88] sm:$0xff]  ;;  %v884_v39 = vld [vmem:[%s1269_s0 + $0x90] ss:$8 sps:$4 sm:$0xff]  }
   0xb   :  { %168 = vmatprep.subr.bf16.mxu0 %v912_v0  ;;  %307 = vmatprep.subr.bf16.mxu1 %v912_v0  ;;  %v738_v33 = vcombine.high %v39_v31, %v39_v31  ;;  %v772_v34 = vcombine.high %v762_v32, %v762_v32  ;;  %v737_v35 = vcombine.low %v39_v31, %v39_v31  ;;  %v889_v38 = vld [vmem:[%s1269_s0 + $0xdc] ss:$8 sps:$4 sm:$0xff]   ;;  %v887_v40 = vld [vmem:[%s1269_s0 + $0xd8] ss:$8 sps:$4 sm:$0xff]   ;;  %v892_v42 = vld [vmem:[%s1269_s0 + $0xec] ss:$8 sps:$4 sm:$0xff]  }
   0xc   :  { %v771_v36 = vcombine.low %v762_v32, %v762_v32  ;;  %v890_v41 = vld [vmem:[%s1269_s0 + $0xa4] ss:$8 sps:$4 sm:$0xff]   ;;  %v894_v43 = vld [vmem:[%s1269_s0 + $0xa0] ss:$8 sps:$4 sm:$0xff]   ;;  %v896_v45 = vld [vmem:[%s1269_s0 + $0xb4] ss:$8 sps:$4 sm:$0xff]  }
   0xd   :  { %v895_v44 = vld [vmem:[%s1269_s0 + $0xe8] ss:$8 sps:$4 sm:$0xff]   ;;  %v898_v46 = vld [vmem:[%s1269_s0 + $0xfc] ss:$8 sps:$4 sm:$0xff]   ;;  %v901_v48 = vld [vmem:[%s1269_s0 + $0xf8] ss:$8 sps:$4 sm:$0xff]  }
   0xe   :  { %169 = vmatpush1.bf16.msra.mxu0 %v959_v4  ;;  %308 = vmatpush1.bf16.msra.mxu1 %v959_v4  ;;  %v900_v47 = vld [vmem:[%s1269_s0 + $0xb0] ss:$8 sps:$4 sm:$0xff]   ;;  %v902_v49 = vld [vmem:[%s1269_s0 + $0xc4] ss:$8 sps:$4 sm:$0xff]   ;;  %v906_v53 = vld [vmem:[%s1269_s0 + $0xc0] ss:$8 sps:$4 sm:$0xff]  }
   0xf   :  { %170 = vmatprep.subr.bf16.mxu0 %v912_v0  ;;  %309 = vmatprep.subr.bf16.mxu1 %v912_v0  ;;  %v904_v50 = vld [vmem:[%s1269_s0 + $0x10c] ss:$8 sps:$4 sm:$0xff]   ;;  %v810_v52 = vld [vmem:[%s1269_s0 + $0x118] sm:$0xff]  ;;  %v907_v54 = vld [vmem:[%s1269_s0 + $0x108] ss:$8 sps:$4 sm:$0xff]  }
  0x10   :  { %v786_v51 = vld [vmem:[%s1269_s0 + $0xd0] sm:$0xff]  ;;  %v820_v56 = vcombine.high %v810_v52, %v810_v52  ;;  %v819_v58 = vcombine.low %v810_v52, %v810_v52 }
  0x11   :  { %v796_v55 = vcombine.high %v786_v51, %v786_v51  ;;  %v795_v57 = vcombine.low %v786_v51, %v786_v51 }
  0x12   :  { %171 = vmatpush1.bf16.msra.mxu0 %v975_v7  ;;  %310 = vmatpush1.bf16.msra.mxu1 %v975_v7 }
  0x13   :  { %172 = vmatprep.subr.bf16.mxu0 %v912_v0  ;;  %311 = vmatprep.subr.bf16.mxu1 %v912_v0 }
  0x16   :  { %173 = vmatpush1.bf16.msra.mxu0 %v985_v8  ;;  %312 = vmatpush1.bf16.msra.mxu1 %v985_v8 }
  0x17   :  { %174 = vmatprep.subr.bf16.mxu0 %v912_v0  ;;  %313 = vmatprep.subr.bf16.mxu1 %v912_v0 }
  0x1a   :  { %175 = vmatpush1.bf16.msra.mxu0 %v994_v9  ;;  %314 = vmatpush1.bf16.msra.mxu1 %v994_v9 }
  0x1b   :  { %176 = vmatprep.subr.bf16.mxu0 %v912_v0  ;;  %315 = vmatprep.subr.bf16.mxu1 %v912_v0 }
  0x1e   :  { %177 = vmatpush1.bf16.msra.mxu0 %v1003_v10  ;;  %316 = vmatpush1.bf16.msra.mxu1 %v1003_v10 }
  0x1f   :  { %178 = vmatprep.subr.bf16.mxu0 %v912_v0  ;;  %317 = vmatprep.subr.bf16.mxu1 %v912_v0 }
  0x22   :  { %179 = vmatpush1.bf16.msra.mxu0 %v1010_v13  ;;  %318 = vmatpush1.bf16.msra.mxu1 %v1010_v13 }
  0x23   :  { %180 = vmatprep.subr.bf16.mxu0 %v912_v0  ;;  %319 = vmatprep.subr.bf16.mxu1 %v912_v0 }
  0x26   :  { %181 = vmatpush1.bf16.msra.mxu0 %v1021_v16  ;;  %320 = vmatpush1.bf16.msra.mxu1 %v1021_v16 }
  0x27   :  { %449 = vmatprep.subr.bf16.mxu0 %v912_v0  ;;  %597 = vmatprep.subr.bf16.mxu1 %v912_v0 }
  0x29   :  { %195 = vmatmul.mubr.bf16.vlgmr.msra.gmra.mrb[0].mxu0 %v856_v17  ;;  %334 = vmatmul.mubr.bf16.vlgmr.msra.gmra.mrb[0].mxu1 %v859_v18 }
  0x2a   :  { %450 = vmatpush1.bf16.msra.mxu0 %v934_v1  ;;  %598 = vmatpush1.bf16.msra.mxu1 %v934_v1 }
  0x2b   :  { %451 = vmatprep.subr.bf16.mxu0 %v912_v0  ;;  %599 = vmatprep.subr.bf16.mxu1 %v912_v0 }
  0x2c   :  { %750 = vmatprep.mubr.msk.bf16.mxu0 %vm139_vm0, %v862_v19  ;;  %774 = vmatprep.mubr.msk.bf16.mxu1 %vm139_vm0, %v864_v20 }
  0x2e   :  { %452 = vmatpush1.bf16.msra.mxu0 %v941_v2  ;;  %600 = vmatpush1.bf16.msra.mxu1 %v941_v2 }
  0x2f   :  { %453 = vmatprep.subr.bf16.mxu0 %v912_v0  ;;  %601 = vmatprep.subr.bf16.mxu1 %v912_v0 }
  0x31   :  { %203 = vmatmul.mubr.bf16.gmra.mrb[4].mxu0 %v866_v21  ;;  %342 = vmatmul.mubr.bf16.gmra.mrb[4].mxu1 %v867_v22 }
  0x32   :  { %454 = vmatpush1.bf16.msra.mxu0 %v950_v3  ;;  %602 = vmatpush1.bf16.msra.mxu1 %v950_v3 }
  0x33   :  { %455 = vmatprep.subr.bf16.mxu0 %v912_v0  ;;  %603 = vmatprep.subr.bf16.mxu1 %v912_v0 }
  0x34   :  { %751 = vmatprep.mubr.msk.bf16.mxu0 %vm139_vm0, %v868_v23  ;;  %775 = vmatprep.mubr.msk.bf16.mxu1 %vm139_vm0, %v870_v24 }
  0x36   :  { %456 = vmatpush1.bf16.msra.mxu0 %v959_v4  ;;  %604 = vmatpush1.bf16.msra.mxu1 %v959_v4 }
  0x37   :  { %457 = vmatprep.subr.bf16.mxu0 %v912_v0  ;;  %605 = vmatprep.subr.bf16.mxu1 %v912_v0 }
  0x39   :  { %211 = vmatmul.mubr.bf16.gmra.mrb[8].mxu0 %v872_v25  ;;  %350 = vmatmul.mubr.bf16.gmra.mrb[8].mxu1 %v873_v26 }
  0x3a   :  { %458 = vmatpush1.bf16.msra.mxu0 %v975_v7  ;;  %606 = vmatpush1.bf16.msra.mxu1 %v975_v7 }
  0x3b   :  { %459 = vmatprep.subr.bf16.mxu0 %v912_v0  ;;  %607 = vmatprep.subr.bf16.mxu1 %v912_v0 }
  0x3c   :  { %752 = vmatprep.mubr.msk.bf16.mxu0 %vm139_vm0, %v874_v27  ;;  %776 = vmatprep.mubr.msk.bf16.mxu1 %vm139_vm0, %v876_v28 }
  0x3e   :  { %460 = vmatpush1.bf16.msra.mxu0 %v985_v8  ;;  %608 = vmatpush1.bf16.msra.mxu1 %v985_v8 }
  0x3f   :  { %461 = vmatprep.subr.bf16.mxu0 %v912_v0  ;;  %609 = vmatprep.subr.bf16.mxu1 %v912_v0 }
  0x41   :  { %219 = vmatmul.mubr.bf16.gmra.mrb[12].mxu0 %v878_v29  ;;  %358 = vmatmul.mubr.bf16.gmra.mrb[12].mxu1 %v879_v30 }
  0x42   :  { %462 = vmatpush1.bf16.msra.mxu0 %v994_v9  ;;  %610 = vmatpush1.bf16.msra.mxu1 %v994_v9 }
  0x43   :  { %463 = vmatprep.subr.bf16.mxu0 %v912_v0  ;;  %611 = vmatprep.subr.bf16.mxu1 %v912_v0 }
  0x44   :  { %753 = vmatprep.mubr.msk.bf16.mxu0 %vm139_vm0, %v738_v33  ;;  %777 = vmatprep.mubr.msk.bf16.mxu1 %vm139_vm0, %v772_v34 }
  0x46   :  { %464 = vmatpush1.bf16.msra.mxu0 %v1003_v10  ;;  %612 = vmatpush1.bf16.msra.mxu1 %v1003_v10 }
  0x47   :  { %465 = vmatprep.subr.bf16.mxu0 %v912_v0  ;;  %613 = vmatprep.subr.bf16.mxu1 %v912_v0 }
  0x49   :  { %227 = vmatmul.mubr.bf16.gmra.mrb[16].mxu0 %v737_v35  ;;  %366 = vmatmul.mubr.bf16.gmra.mrb[16].mxu1 %v771_v36 }
  0x4a   :  { %466 = vmatpush1.bf16.msra.mxu0 %v1010_v13  ;;  %614 = vmatpush1.bf16.msra.mxu1 %v1010_v13 }
  0x4b   :  { %467 = vmatprep.subr.bf16.mxu0 %v912_v0  ;;  %615 = vmatprep.subr.bf16.mxu1 %v912_v0 }
  0x4c   :  { %797 = vmatprep.mubr.msk.bf16.mxu0 %vm139_vm0, %v886_v37  ;;  %821 = vmatprep.mubr.msk.bf16.mxu1 %vm139_vm0, %v889_v38 }
  0x4e   :  { %468 = vmatpush1.bf16.msra.mxu0 %v1021_v16  ;;  %616 = vmatpush1.bf16.msra.mxu1 %v1021_v16 }
  0x51   :  { %482 = vmatmul.mubr.bf16.vlgmr.msra.gmra.mrb[20].mxu0 %v884_v39  ;;  %630 = vmatmul.mubr.bf16.vlgmr.msra.gmra.mrb[20].mxu1 %v887_v40 }
  0x52   :  { %798 = vmatprep.mubr.msk.bf16.mxu0 %vm139_vm0, %v890_v41  ;;  %822 = vmatprep.mubr.msk.bf16.mxu1 %vm139_vm0, %v892_v42 }
  0x59   :  { %490 = vmatmul.mubr.bf16.gmra.mrb[24].mxu0 %v894_v43  ;;  %638 = vmatmul.mubr.bf16.gmra.mrb[24].mxu1 %v895_v44 }
  0x5a   :  { %799 = vmatprep.mubr.msk.bf16.mxu0 %vm139_vm0, %v896_v45  ;;  %823 = vmatprep.mubr.msk.bf16.mxu1 %vm139_vm0, %v898_v46 }
  0x61   :  { %498 = vmatmul.mubr.bf16.gmra.mrb[28].mxu0 %v900_v47  ;;  %646 = vmatmul.mubr.bf16.gmra.mrb[28].mxu1 %v901_v48 }
  0x62   :  { %800 = vmatprep.mubr.msk.bf16.mxu0 %vm139_vm0, %v902_v49  ;;  %824 = vmatprep.mubr.msk.bf16.mxu1 %vm139_vm0, %v904_v50 }
  0x69   :  { %506 = vmatmul.mubr.bf16.gmra.mrb[32].mxu0 %v906_v53  ;;  %654 = vmatmul.mubr.bf16.gmra.mrb[32].mxu1 %v907_v54 }
  0x6a   :  { %801 = vmatprep.mubr.msk.bf16.mxu0 %vm139_vm0, %v796_v55  ;;  %825 = vmatprep.mubr.msk.bf16.mxu1 %vm139_vm0, %v820_v56 }
  0x71   :  { %514 = vmatmul.mubr.bf16.gmra.mrb[36].mxu0 %v795_v57  ;;  %662 = vmatmul.mubr.bf16.gmra.mrb[36].mxu1 %v819_v58 }
  0xfc   :  { %v196_v59 = vpop.f32.mrb[0].mxu0  ;;  %v335_v60 = vpop.f32.mrb[0].mxu1 }
  0xfd   :  { %v373_v61 = vmax.f32 %v196_v59, %v335_v60  ;;  %v198_v62 = vpop.f32.mrb[1].mxu0  ;;  %v337_v63 = vpop.f32.mrb[1].mxu1 }
  0xfe   :  { %v199_v0 = vpop.f32.mrb[2].mxu0  ;;  %v338_v1 = vpop.f32.mrb[2].mxu1 }
  0xff   :  { %v374_v2 = vmax.f32 %v199_v0, %v338_v1  ;;  %v201_v3 = vpop.f32.mrb[3].mxu0  ;;  %v340_v4 = vpop.f32.mrb[3].mxu1 }
 0x104   :  { %v204_v5 = vpop.f32.mrb[4].mxu0  ;;  %v343_v6 = vpop.f32.mrb[4].mxu1 }
 0x105   :  { %v375_v7 = vmax.f32 %v204_v5, %v343_v6  ;;  %v206_v8 = vpop.f32.mrb[5].mxu0  ;;  %v345_v9 = vpop.f32.mrb[5].mxu1 }
 0x106   :  { %v207_v10 = vpop.f32.mrb[6].mxu0  ;;  %v346_v11 = vpop.f32.mrb[6].mxu1 }
 0x107   :  { %v376_v12 = vmax.f32 %v207_v10, %v346_v11  ;;  %v209_v13 = vpop.f32.mrb[7].mxu0  ;;  %v348_v14 = vpop.f32.mrb[7].mxu1 }
 0x10c   :  { %v1187_v15 = vpop.f32.mrb[8].mxu0  ;;  %v1189_v16 = vpop.f32.mrb[8].mxu1 }
 0x10d   :  { %v377_v17 = vmax.f32 %v1187_v15, %v1189_v16  ;;  %v214_v18 = vpop.f32.mrb[9].mxu0  ;;  %v353_v19 = vpop.f32.mrb[9].mxu1 }
 0x10e   :  { %v1193_v20 = vpop.f32.mrb[10].mxu0  ;;  %v1195_v21 = vpop.f32.mrb[10].mxu1 }
 0x10f   :  { %v378_v22 = vmax.f32 %v1193_v20, %v1195_v21  ;;  %v217_v23 = vpop.f32.mrb[11].mxu0  ;;  %v356_v24 = vpop.f32.mrb[11].mxu1 }
 0x114   :  { %v1199_v25 = vpop.f32.mrb[12].mxu0  ;;  %v1201_v26 = vpop.f32.mrb[12].mxu1 }
 0x115   :  { %v379_v27 = vmax.f32 %v1199_v25, %v1201_v26  ;;  %v222_v28 = vpop.f32.mrb[13].mxu0  ;;  %v361_v29 = vpop.f32.mrb[13].mxu1 }
 0x116   :  { %v1205_v30 = vpop.f32.mrb[14].mxu0  ;;  %v1207_v31 = vpop.f32.mrb[14].mxu1 }
 0x117   :  { %v380_v32 = vmax.f32 %v1205_v30, %v1207_v31  ;;  %v225_v33 = vpop.f32.mrb[15].mxu0  ;;  %v364_v34 = vpop.f32.mrb[15].mxu1 }
 0x11c   :  { %v1211_v35 = vpop.f32.mrb[16].mxu0  ;;  %v1213_v36 = vpop.f32.mrb[16].mxu1 }
 0x11d   :  { %v381_v37 = vmax.f32 %v1211_v35, %v1213_v36  ;;  %v230_v38 = vpop.f32.mrb[17].mxu0  ;;  %v369_v39 = vpop.f32.mrb[17].mxu1 }
 0x11e   :  { %v231_v40 = vpop.f32.mrb[18].mxu0  ;;  %v370_v41 = vpop.f32.mrb[18].mxu1 }
 0x11f   :  { %v232_v42 = vpop.f32.mrb[19].mxu0  ;;  %v371_v43 = vpop.f32.mrb[19].mxu1 }
 0x124   :  { %v483_v44 = vpop.f32.mrb[20].mxu0  ;;  %v631_v45 = vpop.f32.mrb[20].mxu1 }
 0x125   :  { %v521_v46 = vmax.f32 %v373_v61, %v483_v44  ;;  %v485_v47 = vpop.f32.mrb[21].mxu0  ;;  %v633_v48 = vpop.f32.mrb[21].mxu1 }
 0x126   :  { %v486_v49 = vpop.f32.mrb[22].mxu0  ;;  %v634_v50 = vpop.f32.mrb[22].mxu1 }
 0x127   :  { %v669_v51 = vmax.f32 %v521_v46, %v631_v45  ;;  %v522_v52 = vmax.f32 %v374_v2, %v486_v49  ;;  %v488_v53 = vpop.f32.mrb[23].mxu0  ;;  %v636_v54 = vpop.f32.mrb[23].mxu1 }
 0x129   :  { %v835_v55 = vpack.c.bf16 %v669_v51, %v669_v51  ;;  %v670_v56 = vmax.f32 %v522_v52, %v634_v50 }
 0x12b   :  { %716 = vst.msk [vmem:[%s1270_s2] sm:$0xf] %vm715_vm3, %v835_v55  ;;  %v836_v57 = vpack.c.bf16 %v670_v56, %v670_v56 }
 0x12c   :  { %v491_v58 = vpop.f32.mrb[24].mxu0  ;;  %v639_v59 = vpop.f32.mrb[24].mxu1 }
 0x12d   :  { %717 = vst.msk [vmem:[%s1270_s2 + $0x4] sm:$0xf] %vm715_vm3, %v836_v57  ;;  %v523_v60 = vmax.f32 %v375_v7, %v491_v58  ;;  %v493_v61 = vpop.f32.mrb[25].mxu0  ;;  %v641_v62 = vpop.f32.mrb[25].mxu1 }
 0x12e   :  { %v494_v63 = vpop.f32.mrb[26].mxu0  ;;  %v642_v0 = vpop.f32.mrb[26].mxu1 }
 0x12f   :  { %v671_v1 = vmax.f32 %v523_v60, %v639_v59  ;;  %v524_v2 = vmax.f32 %v376_v12, %v494_v63  ;;  %v496_v3 = vpop.f32.mrb[27].mxu0  ;;  %v644_v4 = vpop.f32.mrb[27].mxu1 }
 0x131   :  { %v837_v5 = vpack.c.bf16 %v671_v1, %v671_v1  ;;  %v672_v6 = vmax.f32 %v524_v2, %v642_v0 }
 0x133   :  { %718 = vst.msk [vmem:[%s1270_s2 + $0x8] sm:$0xf] %vm715_vm3, %v837_v5  ;;  %v838_v8 = vpack.c.bf16 %v672_v6, %v672_v6 }
 0x134   :  { %v499_v9 = vpop.f32.mrb[28].mxu0  ;;  %v647_v10 = vpop.f32.mrb[28].mxu1 }
 0x135   :  { %719 = vst.msk [vmem:[%s1270_s2 + $0xc] sm:$0xf] %vm715_vm3, %v838_v8  ;;  %v525_v7 = vmax.f32 %v377_v17, %v499_v9  ;;  %v501_v11 = vpop.f32.mrb[29].mxu0  ;;  %v649_v12 = vpop.f32.mrb[29].mxu1 }
 0x136   :  { %v502_v13 = vpop.f32.mrb[30].mxu0  ;;  %v650_v14 = vpop.f32.mrb[30].mxu1 }
 0x137   :  { %v673_v18 = vmax.f32 %v525_v7, %v647_v10  ;;  %v526_v19 = vmax.f32 %v378_v22, %v502_v13  ;;  %v504_v23 = vpop.f32.mrb[31].mxu0  ;;  %v652_v24 = vpop.f32.mrb[31].mxu1 }
 0x139   :  { %v839_v28 = vpack.c.bf16 %v673_v18, %v673_v18  ;;  %v674_v29 = vmax.f32 %v526_v19, %v650_v14 }
 0x13b   :  { %720 = vst.msk [vmem:[%s1270_s2 + $0x10] sm:$0xf] %vm715_vm3, %v839_v28  ;;  %v840_v15 = vpack.c.bf16 %v674_v29, %v674_v29 }
 0x13c   :  { %v507_v16 = vpop.f32.mrb[32].mxu0  ;;  %v655_v17 = vpop.f32.mrb[32].mxu1 }
 0x13d   :  { %721 = vst.msk [vmem:[%s1270_s2 + $0x14] sm:$0xf] %vm715_vm3, %v840_v15  ;;  %v527_v20 = vmax.f32 %v379_v27, %v507_v16  ;;  %v509_v21 = vpop.f32.mrb[33].mxu0  ;;  %v657_v22 = vpop.f32.mrb[33].mxu1 }
 0x13e   :  { %v510_v33 = vpop.f32.mrb[34].mxu0  ;;  %v658_v34 = vpop.f32.mrb[34].mxu1 }
 0x13f   :  { %v675_v38 = vmax.f32 %v527_v20, %v655_v17  ;;  %v528_v39 = vmax.f32 %v380_v32, %v510_v33  ;;  %v512_v40 = vpop.f32.mrb[35].mxu0  ;;  %v660_v41 = vpop.f32.mrb[35].mxu1 }
 0x141   :  { %v841_v42 = vpack.c.bf16 %v675_v38, %v675_v38  ;;  %v676_v43 = vmax.f32 %v528_v39, %v658_v34 }
 0x143   :  { %722 = vst.msk [vmem:[%s1270_s2 + $0x18] sm:$0xf] %vm715_vm3, %v841_v42  ;;  %v842_v25 = vpack.c.bf16 %v676_v43, %v676_v43 }
 0x144   :  { %v515_v26 = vpop.f32.mrb[36].mxu0  ;;  %v663_v27 = vpop.f32.mrb[36].mxu1 }
 0x145   :  { %723 = vst.msk [vmem:[%s1270_s2 + $0x1c] sm:$0xf] %vm715_vm3, %v842_v25  ;;  %v529_v30 = vmax.f32 %v381_v37, %v515_v26  ;;  %v517_v31 = vpop.f32.mrb[37].mxu0  ;;  %v665_v32 = vpop.f32.mrb[37].mxu1 }
 0x146   :  { %v518_v44 = vpop.f32.mrb[38].mxu0  ;;  %v666_v45 = vpop.f32.mrb[38].mxu1 }
 0x147   :  { %v677_v46 = vmax.f32 %v529_v30, %v663_v27  ;;  %v519_v47 = vpop.f32.mrb[39].mxu0  ;;  %v667_v48 = vpop.f32.mrb[39].mxu1 }
 0x149   :  { %v843_v49 = vpack.c.bf16 %v677_v46, %v677_v46 }
 0x14b   :  { %724 = vst.msk [vmem:[%s1270_s2 + $0x20] sm:$0xf] %vm715_vm3, %v843_v49 }

// kernel: lenet5_forward.5
= control target key start
LH: loop header
LB: loop body
LE: loop exit
PB: predicated region body
PF: predicated region fallthrough
CT: control target
= control target key end

     0   :  { %v914_v36 = vmov 0.0   ;;  %vm915_vm0 = vmmov 0   ;;  %vm334_vm1 = vcmask 1040384   ;;  %v916_v45 = vmov 0   ;;  %s1133_s1 = inlined_call_operand.vmem [shape: bf16[577,121], index: 1, kind: input, shape index: {}]   ;;  %s1134_s0 = inlined_call_operand.vmem [shape: bf16[8,577], index: 0, kind: input, shape index: {}]   ;;  %s1135_s2 = inlined_call_operand.vmem [shape: bf16[121,85], index: 2, kind: input, shape index: {}]   ;;  %s1136_s3 = inlined_call_operand.vmem [shape: bf16[85,10], index: 3, kind: input, shape index: {}]   ;;  %s1137_s4 = inlined_call_operand.vmem [shape: f32[8,10], index: 4, kind: output, shape index: {}]  }
   0x1   :  { %v858_v0 = vld [vmem:[%s1133_s1 + $0x40] sm:$0xff]   ;;  %v862_v4 = vld [vmem:[%s1133_s1 + $0x48] sm:$0xff]   ;;  %v866_v8 = vld [vmem:[%s1133_s1 + $0x50] sm:$0xff]   ;;  %v336_v46 = vsel %vm334_vm1, 65535, %v916_v45  ;;  %vm330_vm2 = vcmask 531456   ;;  %vm529_vm3 = vcmask 1043456  }
   0x2   :  { %v859_v1 = vld [vmem:[%s1133_s1 + $0xc0] sm:$0xff]   ;;  %738 = vmatprep.subr.bf16.mxu0 %v858_v0  ;;  %v863_v5 = vld [vmem:[%s1133_s1 + $0xc8] sm:$0xff]   ;;  %v867_v9 = vld [vmem:[%s1133_s1 + $0xd0] sm:$0xff]   ;;  %vm530_vm4 = vcmask 1044480   ;;  %v917_v56 = vmov 65535   ;;  %vm525_vm5 = vcmask 990208  }
   0x3   :  { %v860_v2 = vld [vmem:[%s1133_s1] sm:$0xff]   ;;  %760 = vmatprep.subr.bf16.mxu1 %v859_v1  ;;  %v864_v6 = vld [vmem:[%s1133_s1 + $0x8] sm:$0xff]   ;;  %v868_v10 = vld [vmem:[%s1133_s1 + $0x10] sm:$0xff]   ;;  %v531_v57 = vsel %vm529_vm3, 4294967295, %v917_v56  ;;  %vm626_vm6 = vcmask 1041408   ;;  %vm627_vm7 = vcmask 1042432  }
   0x4   :  { %v861_v3 = vld [vmem:[%s1133_s1 + $0x80] sm:$0xff]   ;;  %739 = vmatpush3.bf16.msra.mxu0 %v860_v2  ;;  %v865_v7 = vld [vmem:[%s1133_s1 + $0x88] sm:$0xff]   ;;  %v869_v11 = vld [vmem:[%s1133_s1 + $0x90] sm:$0xff]   ;;  %v532_v58 = vsel %vm530_vm4, %v531_v57, 0  ;;  %vm622_vm8 = vcmask 695296   ;;  %vm673_vm9 = vcmask 80896  }
   0x5   :  { %761 = vmatpush3.bf16.msra.mxu1 %v861_v3  ;;  %740 = vmatprep.subr.bf16.mxu0 %v862_v4  ;;  %v870_v12 = vld [vmem:[%s1133_s1 + $0x58] sm:$0xff]   ;;  %v874_v16 = vld [vmem:[%s1133_s1 + $0x60] sm:$0xff]   ;;  %v878_v20 = vld [vmem:[%s1133_s1 + $0x68] sm:$0xff]  }
   0x6   :  { %762 = vmatprep.subr.bf16.mxu1 %v863_v5  ;;  %v871_v13 = vld [vmem:[%s1133_s1 + $0xd8] sm:$0xff]   ;;  %v875_v17 = vld [vmem:[%s1133_s1 + $0xe0] sm:$0xff]   ;;  %v879_v21 = vld [vmem:[%s1133_s1 + $0xe8] sm:$0xff]  }
   0x7   :  { %v872_v14 = vld [vmem:[%s1133_s1 + $0x18] sm:$0xff]   ;;  %v876_v18 = vld [vmem:[%s1133_s1 + $0x20] sm:$0xff]   ;;  %v880_v22 = vld [vmem:[%s1133_s1 + $0x28] sm:$0xff]  }
   0x8   :  { %741 = vmatpush3.bf16.msra.mxu0 %v864_v6  ;;  %v873_v15 = vld [vmem:[%s1133_s1 + $0x98] sm:$0xff]   ;;  %v877_v19 = vld [vmem:[%s1133_s1 + $0xa0] sm:$0xff]   ;;  %v881_v23 = vld [vmem:[%s1133_s1 + $0xa8] sm:$0xff]  }
   0x9   :  { %763 = vmatpush3.bf16.msra.mxu1 %v865_v7  ;;  %742 = vmatprep.subr.bf16.mxu0 %v866_v8  ;;  %v882_v24 = vld [vmem:[%s1133_s1 + $0x70] sm:$0xff]   ;;  %v886_v28 = vld [vmem:[%s1133_s1 + $0x78] sm:$0xff]   ;;  %v18_v32 = vld [vmem:[%s1134_s0] sm:$0xff] }
   0xa   :  { %764 = vmatprep.subr.bf16.mxu1 %v867_v9  ;;  %v883_v25 = vld [vmem:[%s1133_s1 + $0xf0] sm:$0xff]   ;;  %v887_v29 = vld [vmem:[%s1133_s1 + $0xf8] sm:$0xff]   ;;  %v679_v33 = vcombine.low %v18_v32, %v18_v32  ;;  %v680_v34 = vcombine.high %v18_v32, %v18_v32  ;;  %v19_v35 = vld [vmem:[%s1134_s0 + $0x8] sm:$0xff] }
   0xb   :  { %v884_v26 = vld [vmem:[%s1133_s1 + $0x30] sm:$0xff]   ;;  %v888_v30 = vld [vmem:[%s1133_s1 + $0x38] sm:$0xff]   ;;  %v681_v37 = vcombine.low %v19_v35, %v19_v35  ;;  %v682_v38 = vcombine.high %v19_v35, %v19_v35  ;;  %v895_v39 = vld [vmem:[%s1133_s1 + $0x100] sm:$0xff]  }
   0xc   :  { %743 = vmatpush3.bf16.msra.mxu0 %v868_v10  ;;  %v885_v27 = vld [vmem:[%s1133_s1 + $0xb0] sm:$0xff]   ;;  %v889_v31 = vld [vmem:[%s1133_s1 + $0xb8] sm:$0xff]   ;;  %372 = vmatprep.mubr.bf16.mxu0 %v680_v34  ;;  %v896_v40 = vld [vmem:[%s1133_s1 + $0x108] sm:$0xff]  }
   0xd   :  { %765 = vmatpush3.bf16.msra.mxu1 %v869_v11  ;;  %744 = vmatprep.subr.bf16.mxu0 %v870_v12  ;;  %v900_v41 = vld [vmem:[%s1135_s2] sm:$0xff]   ;;  %v897_v42 = vld [vmem:[%s1133_s1 + $0x110] sm:$0xff]   ;;  %v898_v43 = vld [vmem:[%s1133_s1 + $0x118] sm:$0xff]  }
   0xe   :  { %766 = vmatprep.subr.bf16.mxu1 %v871_v13  ;;  %412 = vmatprep.mubr.bf16.mxu1 %v682_v38  ;;  %v899_v44 = vld [vmem:[%s1133_s1 + $0x120] ss:$0 sps:$4 sm:$0x11]   ;;  %v892_v48 = vld [vmem:[%s1134_s0 + $0x10] ss:$0 sps:$4 sm:$0xff]   ;;  %v901_v49 = vld [vmem:[%s1135_s2 + $0x8] sm:$0xff]  }
   0xf   :  { %v338_v47 = vand.u32 %v899_v44, %v336_v46  ;;  %v902_v50 = vld [vmem:[%s1135_s2 + $0x10] sm:$0xff]   ;;  %v903_v51 = vld [vmem:[%s1135_s2 + $0x18] sm:$0xff]   ;;  %v904_v52 = vld [vmem:[%s1135_s2 + $0x20] sm:$0xff]  }
  0x10   :  { %745 = vmatpush3.bf16.msra.mxu0 %v872_v14  ;;  %v905_v53 = vld [vmem:[%s1135_s2 + $0x28] sm:$0xff]   ;;  %v906_v54 = vld [vmem:[%s1135_s2 + $0x30] sm:$0xff]   ;;  %v907_v55 = vld [vmem:[%s1135_s2 + $0x38] sm:$0x1f]  }
  0x11   :  { %767 = vmatpush3.bf16.msra.mxu1 %v873_v15  ;;  %746 = vmatprep.subr.bf16.mxu0 %v874_v16  ;;  %v534_v59 = vand.u32 %v907_v55, %v532_v58  ;;  %v908_v60 = vld [vmem:[%s1136_s3] sm:$0xff]   ;;  %v909_v61 = vld [vmem:[%s1136_s3 + $0x8] sm:$0xff]   ;;  %v910_v62 = vld [vmem:[%s1136_s3 + $0x10] sm:$0xff]  }
  0x12   :  { %768 = vmatprep.subr.bf16.mxu1 %v875_v17  ;;  %v911_v63 = vld [vmem:[%s1136_s3 + $0x18] sm:$0xff]   ;;  %v912_v0 = vld [vmem:[%s1136_s3 + $0x20] sm:$0xff]  }
  0x14   :  { %747 = vmatpush3.bf16.msra.mxu0 %v876_v18 }
  0x15   :  { %769 = vmatpush3.bf16.msra.mxu1 %v877_v19  ;;  %748 = vmatprep.subr.bf16.mxu0 %v878_v20  ;;  %v913_v19 = vld [vmem:[%s1136_s3 + $0x28] ss:$0 sps:$4 sm:$0x77]   ;;  %v628_v20 = vsel %vm626_vm6, 4294967295, %v917_v56 }
  0x16   :  { %770 = vmatprep.subr.bf16.mxu1 %v879_v21  ;;  %v629_v21 = vsel %vm627_vm7, %v628_v20, 0 }
  0x18   :  { %749 = vmatpush3.bf16.msra.mxu0 %v880_v22  ;;  %v631_v22 = vand.u32 %v913_v19, %v629_v21 }
  0x19   :  { %771 = vmatpush3.bf16.msra.mxu1 %v881_v23  ;;  %750 = vmatprep.subr.bf16.mxu0 %v882_v24 }
  0x1a   :  { %772 = vmatprep.subr.bf16.mxu1 %v883_v25 }
  0x1c   :  { %751 = vmatpush3.bf16.msra.mxu0 %v884_v26 }
  0x1d   :  { %773 = vmatpush3.bf16.msra.mxu1 %v885_v27  ;;  %752 = vmatprep.subr.bf16.mxu0 %v886_v28 }
  0x1e   :  { %774 = vmatprep.subr.bf16.mxu1 %v887_v29 }
  0x20   :  { %753 = vmatpush3.bf16.msra.mxu0 %v888_v30 }
  0x21   :  { %775 = vmatpush3.bf16.msra.mxu1 %v889_v31  ;;  %804 = vmatprep.subr.bf16.mxu0 %v914_v36 }
  0x22   :  { %818 = vmatprep.subr.bf16.mxu1 %v914_v36 }
  0x23   :  { %373 = vmatmul.mubr.bf16.vlgmr.msra.gmra.mrb[0].mxu0 %v679_v33 }
  0x24   :  { %413 = vmatmul.mubr.bf16.vlgmr.msra.gmra.mrb[0].mxu1 %v681_v37  ;;  %805 = vmatpush3.bf16.msra.mxu0 %v895_v39 }
  0x25   :  { %806 = vmatprep.subr.bf16.mxu0 %v914_v36  ;;  %814 = vmatprep.mubr.msk.bf16.mxu0 %vm915_vm0, %v914_v36 }
  0x26   :  { %834 = vmatprep.mubr.msk.bf16.mxu1 %vm915_vm0, %v914_v36  ;;  %819 = vmatpush3.bf16.msra.mxu1 %v900_v41 }
  0x27   :  { %820 = vmatprep.subr.bf16.mxu1 %v914_v36 }
  0x28   :  { %807 = vmatpush3.bf16.msra.mxu0 %v896_v40 }
  0x29   :  { %808 = vmatprep.subr.bf16.mxu0 %v914_v36 }
  0x2a   :  { %821 = vmatpush3.bf16.msra.mxu1 %v901_v49 }
  0x2b   :  { %822 = vmatprep.subr.bf16.mxu1 %v914_v36 }
  0x2c   :  { %809 = vmatpush3.bf16.msra.mxu0 %v897_v42 }
  0x2d   :  { %810 = vmatprep.subr.bf16.mxu0 %v914_v36 }
  0x2e   :  { %823 = vmatpush3.bf16.msra.mxu1 %v902_v50 }
  0x2f   :  { %824 = vmatprep.subr.bf16.mxu1 %v914_v36 }
  0x30   :  { %811 = vmatpush3.bf16.msra.mxu0 %v898_v43 }
  0x31   :  { %812 = vmatprep.subr.bf16.mxu0 %v914_v36 }
  0x32   :  { %825 = vmatpush3.bf16.msra.mxu1 %v903_v51 }
  0x33   :  { %826 = vmatprep.subr.bf16.mxu1 %v914_v36 }
  0x34   :  { %813 = vmatpush3.bf16.msra.mxu0 %v338_v47 }
  0x35   :  { %838 = vmatprep.subr.bf16.mxu0 %v914_v36 }
  0x36   :  { %827 = vmatpush3.bf16.msra.mxu1 %v904_v52 }
  0x37   :  { %815 = vmatmul.mubr.msk.bf16.vlgmr.msra.gmra.mrb[4].mxu0 %vm330_vm2, %v892_v48  ;;  %828 = vmatprep.subr.bf16.mxu1 %v914_v36 }
  0x38   :  { %850 = vmatprep.mubr.msk.bf16.mxu0 %vm915_vm0, %v914_v36  ;;  %839 = vmatpush3.bf16.msra.mxu0 %v908_v60 }
  0x39   :  { %840 = vmatprep.subr.bf16.mxu0 %v914_v36 }
  0x3a   :  { %829 = vmatpush3.bf16.msra.mxu1 %v905_v53 }
  0x3b   :  { %830 = vmatprep.subr.bf16.mxu1 %v914_v36 }
  0x3c   :  { %841 = vmatpush3.bf16.msra.mxu0 %v909_v61 }
  0x3d   :  { %842 = vmatprep.subr.bf16.mxu0 %v914_v36 }
  0x3e   :  { %831 = vmatpush3.bf16.msra.mxu1 %v906_v54 }
  0x3f   :  { %832 = vmatprep.subr.bf16.mxu1 %v914_v36 }
  0x40   :  { %843 = vmatpush3.bf16.msra.mxu0 %v910_v62 }
  0x41   :  { %844 = vmatprep.subr.bf16.mxu0 %v914_v36 }
  0x42   :  { %833 = vmatpush3.bf16.msra.mxu1 %v534_v59 }
  0x44   :  { %845 = vmatpush3.bf16.msra.mxu0 %v911_v63 }
  0x45   :  { %846 = vmatprep.subr.bf16.mxu0 %v914_v36 }
  0x48   :  { %847 = vmatpush3.bf16.msra.mxu0 %v912_v0 }
  0x49   :  { %848 = vmatprep.subr.bf16.mxu0 %v914_v36 }
  0x4c   :  { %849 = vmatpush3.bf16.msra.mxu0 %v631_v22 }
  0xf6   :  { %v754_v1 = vpop.f32.mrb[0].mxu0 }
  0xf7   :  { %v776_v2 = vpop.f32.mrb[0].mxu1  ;;  %v755_v3 = vpop.f32.mrb[1].mxu0 }
  0xf8   :  { %v756_v4 = vadd.f32 %v755_v3, %v754_v1  ;;  %v777_v5 = vpop.f32.mrb[1].mxu1  ;;  %v757_v6 = vpop.f32.mrb[2].mxu0 }
  0xf9   :  { %v778_v7 = vadd.f32 %v777_v5, %v776_v2  ;;  %v758_v8 = vpop.f32.mrb[3].mxu0  ;;  %v779_v9 = vpop.f32.mrb[2].mxu1 }
  0xfa   :  { %v780_v10 = vpop.f32.mrb[3].mxu1 }
  0xfb   :  { %v415_v11 = vadd.f32 %v778_v7, %v756_v4 }
 0x10a   :  { %v454_v12 = vpop.f32.mrb[4].mxu0 }
 0x10b   :  { %v455_v13 = vadd.f32 %v454_v12, %v415_v11  ;;  %v816_v14 = vpop.f32.mrb[5].mxu0 }
 0x10c   :  { %v457_v15 = vpop.f32.mrb[6].mxu0 }
 0x10d   :  { %v460_v16 = vmax.f32 %v455_v13, 0.0  ;;  %v817_v17 = vpop.f32.mrb[7].mxu0 }
 0x10f   :  { %v461_v18 = vpack.c.bf16 %v460_v16, %v460_v16 }
 0x111   :  { %835 = vmatmul.mubr.msk.bf16.vlgmr.msra.gmra.mrb[4].mxu1 %vm525_vm5, %v461_v18 }
 0x1e4   :  { %v570_v23 = vpop.f32.mrb[4].mxu1 }
 0x1e5   :  { %v576_v24 = vmax.f32 %v570_v23, 0.0  ;;  %v836_v25 = vpop.f32.mrb[5].mxu1 }
 0x1e6   :  { %v573_v26 = vpop.f32.mrb[6].mxu1 }
 0x1e7   :  { %v577_v27 = vpack.c.bf16 %v576_v24, %v576_v24  ;;  %v837_v28 = vpop.f32.mrb[7].mxu1 }
 0x1e9   :  { %851 = vmatmul.mubr.msk.bf16.vlgmr.msra.gmra.mrb[8].mxu0 %vm622_vm8, %v577_v27 }
 0x2bc   :  { %v667_v29 = vpop.f32.mrb[8].mxu0 }
 0x2bd   :  { %674 = vst.msk [vmem:[%s1137_s4] sm:$0xff] %vm673_vm9, %v667_v29  ;;  %v852_v30 = vpop.f32.mrb[9].mxu0 }
 0x2be   :  { %v670_v31 = vpop.f32.mrb[10].mxu0 }
 0x2bf   :  { %v853_v32 = vpop.f32.mrb[11].mxu0 }

</bundles_post_ra>
